<compile_context>
chip_gen: v7x
topology: tpu7x:2x2x1
jax: 0.10.0
libtpu: 0.0.40
codegen_flags: <defaults>
</compile_context>

<pallas_src>
import jax
import jax.numpy as jnp
from jax.experimental import pallas as pl
from jax.experimental.pallas import tpu as pltpu


def _round_up(x, m):
    return (x + m - 1) // m * m


def _select_config():
    """Generation-gated tiling / scoped-VMEM config.

    v5e / v6e: 128 MiB physical VMEM -> bigger weight tiles, ~100 MiB limit.
    v7x: 64 MiB per TensorCore -> smaller tiles, 48 MiB limit.
    Falls back to the conservative (v7x-sized) config if the query fails.
    """
    vmem_bytes = None
    try:
        info = pltpu.get_tpu_info()
        vmem_bytes = getattr(info, "vmem_capacity_bytes", None)
    except Exception:
        vmem_bytes = None
    if vmem_bytes is not None and vmem_bytes >= 100 * 1024 * 1024:
        return {"max_tk": 7168, "vmem_limit": 100 * 1024 * 1024}
    return {"max_tk": 3584, "vmem_limit": 48 * 1024 * 1024}


def _pick_tk(din, max_tk):
    """Largest 256-aligned exact divisor of `din` that is <= max_tk.

    Exact divisors avoid zero-padding the (Din, 5376) weight; for
    Din = 3*224*224 = 150528 this picks 7168 (v5e/v6e) or 3584 (v7x).
    Falls back to a 256-aligned tile + zero padding if no divisor exists.
    """
    best = None
    d = 256
    while d <= min(din, max_tk):
        if din % d == 0:
            best = d
        d += 256
    if best is not None:
        return best
    return min(max_tk, _round_up(din, 256))


# ----------------------------------------------------------------------------
# Stage 1: for each feature-column tile n (parallel) and input tile k (reduce):
#   feat[:, n_tile]   = sum_k x[:, k_tile] @ Wcat[k_tile, n_tile]   (+ bcat)
#   h_partial[n]      = feat[:, n_tile] @ W1[n_tile, :]             (at last k)
# The (B, tn) feature slice only ever lives in VMEM scratch.
# ----------------------------------------------------------------------------
def _backbone_kernel(x_ref, wcat_ref, bcat_ref, w1_ref, hpart_ref, feat_acc):
    k = pl.program_id(1)

    @pl.when(k == 0)
    def _():
        feat_acc[...] = jnp.zeros_like(feat_acc)

    # Backbone stand-in projection for this (n, k) tile (bf16 MXU, f32 acc).
    feat_acc[...] += jnp.dot(
        x_ref[...], wcat_ref[...], preferred_element_type=jnp.float32)

    @pl.when(k == pl.num_programs(1) - 1)
    def _():
        # This feature slice is complete: add bias and reduce it straight into
        # a (B, 512) partial hidden (the 5376-wide feature never hits HBM).
        feat = feat_acc[...] + bcat_ref[...]
        hpart_ref[...] = jnp.dot(
            feat.astype(w1_ref.dtype), w1_ref[...],
            preferred_element_type=jnp.float32)


# ----------------------------------------------------------------------------
# Stage 2 (tiny epilogue): sum partial hiddens, bias, ReLU, Dropout(eval),
# Linear(512, NC) into a lane-padded output.
# ----------------------------------------------------------------------------
def _classifier_kernel(hpart_ref, b1_ref, w2_ref, b2_ref, o_ref):
    h = jnp.sum(hpart_ref[...], axis=0) + b1_ref[...]
    h = jnp.maximum(h, 0.0)  # ReLU
    # TODO(synk): nn.Dropout(0.5) is identity in eval mode; training-mode
    # stochastic masking (pltpu.prng_random_bits) is not implemented here.
    o_ref[...] = (
        jnp.dot(h.astype(w2_ref.dtype), w2_ref[...],
                preferred_element_type=jnp.float32)
        + b2_ref[...])


def pack_params(params, in_dim, *, tn=1792):
    """One-time weight packing: concat + bf16 cast + K / lane padding.

    Done outside the per-call path so the forward only touches the activation;
    re-packing the (Din, 5376) weight per call would cost more HBM traffic
    than the kernel itself.
    """
    assert tn % 128 == 0, f"tn={tn} must be a multiple of 128 (lane width)"
    cfg = _select_config()
    tk = _pick_tk(in_dim, cfg["max_tk"])
    kp = _round_up(in_dim, tk)

    # TODO(synk): pretrained resnet50 / resnet101 / efficientnet-b0 feature
    # extractors are replaced by deterministic linear stand-ins with the same
    # output widths (2048, 2048, 1280), fused into one concatenated weight.
    wcat = jnp.concatenate(
        (params["w_r50"], params["w_r101"], params["w_eff"]), axis=1)  # (Din, 5376)
    bcat = jnp.concatenate(
        (params["b_r50"], params["b_r101"], params["b_eff"]), axis=1)  # (1, 5376)
    feat_width = wcat.shape[1]
    assert feat_width % tn == 0, (
        f"feature width {feat_width} must be divisible by tn={tn}")

    if kp != in_dim:  # only when Din has no 256-aligned divisor <= max_tk
        wcat = jnp.pad(wcat, ((0, kp - in_dim), (0, 0)))

    nc = params["w2"].shape[1]
    ncp = _round_up(nc, 128)  # lane-dense classifier output
    w2, b2 = params["w2"], params["b2"]
    if ncp != nc:
        w2 = jnp.pad(w2, ((0, 0), (0, ncp - nc)))
        b2 = jnp.pad(b2, ((0, 0), (0, ncp - nc)))

    # bf16 for MXU operands (halves weight HBM traffic); biases stay f32.
    # TODO(synk): optional int8 (v5e/v6e) or fp8 (v7x) weight quantization for
    # a further ~2x on the weight-bound stream is not implemented here.
    return {
        "wcat": wcat.astype(jnp.bfloat16),        # (Kp, 5376)
        "bcat": bcat.astype(jnp.float32),         # (1, 5376)
        "w1": params["w1"].astype(jnp.bfloat16),  # (5376, 512)
        "b1": params["b1"].astype(jnp.float32),   # (1, 512)
        "w2": w2.astype(jnp.bfloat16),            # (512, NCp)
        "b2": b2.astype(jnp.float32),             # (1, NCp)
        "din": in_dim, "kp": kp, "tk": tk, "tn": tn, "nc": nc,
        "vmem_limit": cfg["vmem_limit"],
    }


def ensemble_net_forward(x_nchw, packed):
    """Fused EnsembleNet forward. Returns (B, num_classes) float32 logits."""
    B = x_nchw.shape[0]
    x_flat = x_nchw.reshape(B, -1)  # NCHW -> (B, C*H*W)
    din, kp, tk, tn = packed["din"], packed["kp"], packed["tk"], packed["tn"]
    assert x_flat.shape[1] == din
    if kp != din:
        x_flat = jnp.pad(x_flat, ((0, 0), (0, kp - din)))
    xb = x_flat.astype(jnp.bfloat16)

    wcat, bcat = packed["wcat"], packed["bcat"]
    w1, b1 = packed["w1"], packed["b1"]
    w2, b2 = packed["w2"], packed["b2"]
    feat_width, hid = w1.shape                    # 5376, 512
    ncp = w2.shape[1]
    n_tiles, k_tiles = feat_width // tn, kp // tk

    # Stage 1: weight-bandwidth-bound main kernel.  n ('parallel') indexes
    # independent 1792-wide feature slices -> partial hiddens, so v7x's two
    # TensorCores split the grid; k is the Din reduction (innermost,
    # 'arbitrary').  Note x is re-streamed n_tiles (=3) times, negligible
    # next to the Wcat stream at these batch sizes.
    h_partials = pl.pallas_call(
        _backbone_kernel,
        out_shape=jax.ShapeDtypeStruct((n_tiles, B, hid), jnp.float32),
        grid=(n_tiles, k_tiles),
        in_specs=[
            pl.BlockSpec((B, tk), lambda n, k: (0, k)),      # x
            pl.BlockSpec((tk, tn), lambda n, k: (k, n)),     # Wcat
            pl.BlockSpec((1, tn), lambda n, k: (0, n)),      # bcat
            pl.BlockSpec((tn, hid), lambda n, k: (n, 0)),    # W1
        ],
        out_specs=pl.BlockSpec((None, B, hid), lambda n, k: (n, 0, 0)),
        scratch_shapes=[pltpu.VMEM((B, tn), jnp.float32)],   # feature slice
        compiler_params=pltpu.CompilerParams(
            dimension_semantics=("parallel", "arbitrary"),
            vmem_limit_bytes=packed["vmem_limit"],
        ),
    )(xb, wcat, bcat, w1)

    # Stage 2: tiny fused classifier epilogue (everything fits in VMEM).
    out = pl.pallas_call(
        _classifier_kernel,
        out_shape=jax.ShapeDtypeStruct((B, ncp), jnp.float32),
        grid=(1,),
        in_specs=[
            pl.BlockSpec((n_tiles, B, hid), lambda i: (0, 0, 0)),
            pl.BlockSpec((1, hid), lambda i: (0, 0)),
            pl.BlockSpec((hid, ncp), lambda i: (0, 0)),
            pl.BlockSpec((1, ncp), lambda i: (0, 0)),
        ],
        out_specs=pl.BlockSpec((B, ncp), lambda i: (0, 0)),
    )(h_partials, b1, w2, b2)

    return out[:, :packed["nc"]]


def init_params(key, in_dim, num_classes):
    ks = jax.random.split(key, 10)
    s = 0.02
    return {
        "w_r50": s * jax.random.normal(ks[0], (in_dim, 2048), jnp.float32),
        "b_r50": s * jax.random.normal(ks[1], (1, 2048), jnp.float32),
        "w_r101": s * jax.random.normal(ks[2], (in_dim, 2048), jnp.float32),
        "b_r101": s * jax.random.normal(ks[3], (1, 2048), jnp.float32),
        "w_eff": s * jax.random.normal(ks[4], (in_dim, 1280), jnp.float32),
        "b_eff": s * jax.random.normal(ks[5], (1, 1280), jnp.float32),
        # classifier: Linear(2048+2048+1280=5376, 512), Linear(512, num_classes)
        "w1": s * jax.random.normal(ks[6], (5376, 512), jnp.float32),
        "b1": s * jax.random.normal(ks[7], (1, 512), jnp.float32),
        "w2": s * jax.random.normal(ks[8], (512, num_classes), jnp.float32),
        "b2": s * jax.random.normal(ks[9], (1, num_classes), jnp.float32),
    }


if __name__ == "__main__":
    B, C, Himg, Wimg = 2, 3, 16, 16
    num_classes = 10

    key = jax.random.PRNGKey(0)
    kx, kparam = jax.random.split(key)
    x = jax.random.normal(kx, (B, C, Himg, Wimg), jnp.float32)  # NCHW like PyTorch
    params = init_params(kparam, C * Himg * Wimg, num_classes)
    packed = pack_params(params, C * Himg * Wimg)  # one-time weight packing

    out = ensemble_net_forward(x, packed)
    out = jax.block_until_ready(out)
    assert out.shape == (B, num_classes), out.shape

    # Reference in plain JAX using the same bf16 operand / f32 accumulate recipe.
    x_flat = x.reshape(B, -1)
    wcat = jnp.concatenate(
        (params["w_r50"], params["w_r101"], params["w_eff"]), axis=1)
    bcat = jnp.concatenate(
        (params["b_r50"], params["b_r101"], params["b_eff"]), axis=1)
    bf16 = jnp.bfloat16
    feat_ref = jnp.dot(x_flat.astype(bf16), wcat.astype(bf16),
                       preferred_element_type=jnp.float32) + bcat
    h_ref = jnp.maximum(
        jnp.dot(feat_ref.astype(bf16), params["w1"].astype(bf16),
                preferred_element_type=jnp.float32) + params["b1"], 0.0)
    ref = jnp.dot(h_ref.astype(bf16), params["w2"].astype(bf16),
                  preferred_element_type=jnp.float32) + params["b2"]
    assert jnp.allclose(out, ref, atol=3e-2, rtol=3e-2), (
        float(jnp.max(jnp.abs(out - ref))))

    print("KERNEL_OK")
</pallas_src>

<mosaic_0001>
module attributes {stable_mosaic.version = 11 : i64} {
  func.func @_backbone_kernel(%arg0: i32, %arg1: i32, %arg2: memref<2x768xbf16, #tpu.memory_space<vmem>>, %arg3: memref<768x1792xbf16, #tpu.memory_space<vmem>>, %arg4: memref<1x1792xf32, #tpu.memory_space<vmem>>, %arg5: memref<1792x512xbf16, #tpu.memory_space<vmem>>, %arg6: memref<1x2x512xf32, #tpu.memory_space<vmem>>, %arg7: memref<2x1792xf32, #tpu.memory_space<vmem>>) attributes {dimension_semantics = [#tpu.dimension_semantics<parallel>, #tpu.dimension_semantics<arbitrary>], iteration_bounds = array<i64: 3, 1>, scalar_prefetch = 0 : i64, scratch_operands = 1 : i64, tpu.core_type = #tpu.core_type<tc>, window_params = [{transform_indices = @transform_0, window_bounds = array<i64: 2, 768>}, {transform_indices = @transform_1, window_bounds = array<i64: 768, 1792>}, {transform_indices = @transform_2, window_bounds = array<i64: 1, 1792>}, {transform_indices = @transform_3, window_bounds = array<i64: 1792, 512>}, {transform_indices = @transform_4, window_bounds = array<i64: 1, 2, 512>}]} {
    %c0_i32 = arith.constant 0 : i32
    %0 = arith.cmpi eq, %arg1, %c0_i32 : i32
    %1 = arith.extui %0 : i1 to i32
    %c0_i32_0 = arith.constant 0 : i32
    %2 = arith.cmpi ne, %1, %c0_i32_0 : i32
    scf.if %2 {
      %cst_10 = arith.constant 0.000000e+00 : f32
      %12 = vector.broadcast %cst_10 : f32 to vector<2x1792xf32>
      %c0_11 = arith.constant 0 : index
      %c0_12 = arith.constant 0 : index
      %13 = vector.load %arg7[%c0_11, %c0_12] : memref<2x1792xf32, #tpu.memory_space<vmem>>, vector<2x1792xf32>
      tpu.vector_store %arg7[%c0_11, %c0_12], %12 {strides = array<i32>} : memref<2x1792xf32, #tpu.memory_space<vmem>>, vector<2x1792xf32>,
    } else {
    }
    %c0 = arith.constant 0 : index
    %c0_1 = arith.constant 0 : index
    %3 = vector.load %arg7[%c0, %c0_1] : memref<2x1792xf32, #tpu.memory_space<vmem>>, vector<2x1792xf32>
    %c0_2 = arith.constant 0 : index
    %c0_3 = arith.constant 0 : index
    %4 = vector.load %arg2[%c0_2, %c0_3] : memref<2x768xbf16, #tpu.memory_space<vmem>>, vector<2x768xbf16>
    %c0_4 = arith.constant 0 : index
    %c0_5 = arith.constant 0 : index
    %5 = vector.load %arg3[%c0_4, %c0_5] : memref<768x1792xbf16, #tpu.memory_space<vmem>>, vector<768x1792xbf16>
    %cst = arith.constant dense<0.000000e+00> : vector<2x1792xf32>
    %6 = tpu.matmul %4, %5, %cst {dimension_numbers = #tpu.dot_dimension_numbers<[1], [0], [0], [1], [0, 0, 1, 1], [], []>} : vector<2x768xbf16>, vector<768x1792xbf16>, vector<2x1792xf32> -> vector<2x1792xf32>
    %7 = arith.addf %3, %6 : vector<2x1792xf32>
    %c0_6 = arith.constant 0 : index
    %c0_7 = arith.constant 0 : index
    %8 = vector.load %arg7[%c0_6, %c0_7] : memref<2x1792xf32, #tpu.memory_space<vmem>>, vector<2x1792xf32>
    tpu.vector_store %arg7[%c0_6, %c0_7], %7 {strides = array<i32>} : memref<2x1792xf32, #tpu.memory_space<vmem>>, vector<2x1792xf32>,
    %c0_i32_8 = arith.constant 0 : i32
    %9 = arith.cmpi eq, %arg1, %c0_i32_8 : i32
    %10 = arith.extui %9 : i1 to i32
    %c0_i32_9 = arith.constant 0 : i32
    %11 = arith.cmpi ne, %10, %c0_i32_9 : i32
    scf.if %11 {
      %c0_10 = arith.constant 0 : index
      %c0_11 = arith.constant 0 : index
      %12 = vector.load %arg7[%c0_10, %c0_11] : memref<2x1792xf32, #tpu.memory_space<vmem>>, vector<2x1792xf32>
      %c0_12 = arith.constant 0 : index
      %c0_13 = arith.constant 0 : index
      %13 = vector.load %arg4[%c0_12, %c0_13] : memref<1x1792xf32, #tpu.memory_space<vmem>>, vector<1x1792xf32>
      %14 = vector.broadcast %13 : vector<1x1792xf32> to vector<2x1792xf32>
      %15 = arith.addf %12, %14 : vector<2x1792xf32>
      %16 = arith.truncf %15 : vector<2x1792xf32> to vector<2x1792xbf16>
      %c0_14 = arith.constant 0 : index
      %c0_15 = arith.constant 0 : index
      %17 = vector.load %arg5[%c0_14, %c0_15] : memref<1792x512xbf16, #tpu.memory_space<vmem>>, vector<1792x512xbf16>
      %cst_16 = arith.constant dense<0.000000e+00> : vector<2x512xf32>
      %18 = tpu.matmul %16, %17, %cst_16 {dimension_numbers = #tpu.dot_dimension_numbers<[1], [0], [0], [1], [0, 0, 1, 1], [], []>} : vector<2x1792xbf16>, vector<1792x512xbf16>, vector<2x512xf32> -> vector<2x512xf32>
      %c0_17 = arith.constant 0 : index
      %c0_18 = arith.constant 0 : index
      %c0_19 = arith.constant 0 : index
      %19 = vector.load %arg6[%c0_17, %c0_18, %c0_19] : memref<1x2x512xf32, #tpu.memory_space<vmem>>, vector<1x2x512xf32>
      %20 = vector.shape_cast %19 : vector<1x2x512xf32> to vector<2x512xf32>
      %21 = vector.shape_cast %18 : vector<2x512xf32> to vector<1x2x512xf32>
      tpu.vector_store %arg6[%c0_17, %c0_18, %c0_19], %21 {strides = array<i32>} : memref<1x2x512xf32, #tpu.memory_space<vmem>>, vector<1x2x512xf32>,
    } else {
    }
    return
  }
  func.func @transform_0(%arg0: i32, %arg1: i32) -> (i32, i32) {
    %c0_i32 = arith.constant 0 : i32
    %c0_i32_0 = arith.constant 0 : i32
    return %c0_i32, %arg1 : i32, i32
  }
  func.func @transform_1(%arg0: i32, %arg1: i32) -> (i32, i32) {
    %c0_i32 = arith.constant 0 : i32
    return %arg1, %arg0 : i32, i32
  }
  func.func @transform_2(%arg0: i32, %arg1: i32) -> (i32, i32) {
    %c0_i32 = arith.constant 0 : i32
    %c0_i32_0 = arith.constant 0 : i32
    return %c0_i32, %arg0 : i32, i32
  }
  func.func @transform_3(%arg0: i32, %arg1: i32) -> (i32, i32) {
    %c0_i32 = arith.constant 0 : i32
    %c0_i32_0 = arith.constant 0 : i32
    return %arg0, %c0_i32 : i32, i32
  }
  func.func @transform_4(%arg0: i32, %arg1: i32) -> (i32, i32, i32) {
    %c0_i32 = arith.constant 0 : i32
    %c0_i32_0 = arith.constant 0 : i32
    %c0_i32_1 = arith.constant 0 : i32
    return %arg0, %c0_i32, %c0_i32_0 : i32, i32, i32
  }
}

</mosaic_0001>

<bundles_post_ra>
// kernel: tpu_custom_call.1
= control target key start
LH: loop header
LB: loop body
LE: loop exit
PB: predicated region body
PF: predicated region fallthrough
CT: control target
= control target key end

     0   :  { %s14042_s0 = inlined_call_operand.hbm [shape: bf16[2,768], index: 0, kind: input, shape index: {}]   ;;  %s14043_s1 = inlined_call_operand.hbm [shape: bf16[768,5376], index: 1, kind: input, shape index: {}]   ;;  %s14044_s2 = inlined_call_operand.hbm [shape: f32[1,5376], index: 2, kind: input, shape index: {}]   ;;  %s14045_s3 = inlined_call_operand.hbm [shape: bf16[5376,512], index: 3, kind: input, shape index: {}]   ;;  %s14046_s4 = inlined_call_operand.hbm [shape: f32[3,2,512], index: 4, kind: output, shape index: {}]  }
   0x1   :  { %14059 = sst [smem:[#allocation20_spill]] %s14043_s1 }
   0x2   :  { %9 = vsyncpa [#allocation4], 0 }
   0x3   :  { %10 = vsyncpa [#allocation7], 0 }
   0x4   :  { %12 = vsyncpa [#allocation7 + $0x1], 0 }
   0x5   :  { %13 = vsyncpa [#allocation10], 0 }
   0x6   :  { %15 = vsyncpa [#allocation10 + $0x1], 0 }
   0x7   :  { %16 = vsyncpa [#allocation5], 0 }
   0x8   :  { %18 = vsyncpa [#allocation5 + $0x1], 0  ;;  %s12314_s15 = smov 0   ;;  %s12316_s16 = smov 0  }
   0x9   :  { %s12318_s17 = smov 0   ;;  %s12320_s18 = smov 0  }
   0xa   :  { %s12322_s19 = smov 0   ;;  %s12324_s20 = smov 0  }
   0xb LB: > { %14060 = sst [smem:[#allocation16_spill]] %s12262_s17  ;;  %s36_s21 = sadd.s32 1, %s12270_s19  ;;  %s12274_s20 = sphi %s12324_s20, %s24_s20   ;;  %s12270_s19 = sphi %s12322_s19, %s14088_s19   ;;  %s12266_s18 = sphi %s12320_s18, %s14087_s18   ;;  %s12262_s17 = sphi %s12318_s17, %s14083_s17   ;;  %s12258_s16 = sphi %s12316_s16, %s14086_s16   ;;  %s12254_s15 = sphi %s12314_s15, %s14085_s15  }
   0xc   : > { %s71_s22 = sadd.s32 1, %s12262_s17  ;;  %p38_p0 = scmp.ge.s32.totalorder %s36_s21, 3 }
   0xd   : > { %p14047_p1 = scmp.ne.s32.totalorder %s12262_s17, %s12258_s16  ;;  %p79_p2 = scmp.eq.s32.totalorder %s12274_s20, 0 }
   0xe   : > { %s14090_s21 = smov (%p38_p0, %s36_s21), 0  ;;  %p10325_p4 = scmp.lt.s32.totalorder %s12274_s20, 3 }
   0xf   : > { %14061 = sst [smem:[#allocation17_spill]] %s14090_s21  ;;  %p80_p3 = por %p79_p2, %p14047_p1 }
  0x10   : > { %s67_s23 = ssub.s32 %s12270_s19, %s14090_s21  ;;  %s200_s24 = sand.u32 1, %s12274_s20  }
  0x11   : > { %p69_p5 = scmp.eq.s32.totalorder %s67_s23, 0  ;;  %s12359_s25 = sand.u32 1, %s12262_s17  }
  0x12   : > { %s10180_s26 = smul.u32 896, %s12270_s19  ;;  %s14063_s1 = sld [smem:[#allocation20_spill]] }
  0x13   : > { %s12363_s27 = scalar_select %p69_p5, %s12262_s17, %s71_s22  }
  0x14   : > { %s10288_s28 = smul.u32 5376, %s12359_s25  ;;  %p12371_p6 = pnand %p10325_p4, %p80_p3 }
  0x15   : > { %14062 = sst [smem:[#allocation18_spill]] %s12363_s27  ;;  %s12377_s9 = scalar_lea.sflag [#allocation7], %s200_s24 }
  0x16   : > { %s14064_s6 = scalar_select %p12371_p6, 1, 0 }
  0x17   : > { %s204_s7 = scalar_lea.vmem [#allocation6], %s10288_s28  ;;  %p12383_p8 = pneg %p12371_p6 }
  0x18   : > { %s12369_s5 = scalar_lea.hbm %s14063_s1, %s10180_s26  ;;  %s214_s8 = sshll.u32 %s204_s7, 4  ;;  %s12375_s8 = int_to_ptr.vmem [resolvable:$true] %s214_s8 }
  0x19   : > { %s12066_s10 = scalar_lea.hbm %s12369_s5, 86016  ;;  %s12071_s14 = scalar_lea.hbm %s14063_s1, 258048 }
  0x1a   : > { %p12067_p7 = scmp.ne.s32.totalorder %s12369_s5, %s12066_s10  ;;  %p12072_p11 = scmp.lt.u32.totalorder %s12369_s5, %s14063_s1 }
  0x1b   : > { %s14065_s11 = scalar_select %p12383_p8, 1, 0 }
  0x1c   : > { %p12069_p9 = pnand %p12383_p8, %p12067_p7  ;;  %p12073_p12 = scmp.lt.u32.totalorder %s12071_s14, %s12066_s10 }
  0x1d   : > { %p12075_p0 = scmp.lt.u32.totalorder %s12066_s10, %s12369_s5 }
  0x1e   : > { %p12070_p10 = pneg %p12069_p9  ;;  %p12074_p13 = por %p12073_p12, %p12072_p11 }
  0x20   : > { %p12076_p2 = por %p12075_p0, %p12074_p13 }
  0x22   : > { %p12077_p3 = pnand %p12076_p2, %p12070_p10 }
  0x24   : > { %12080 = shalt.err (!%p12077_p3)
}
  0x25   : > { %s12081_s24 = scalar_lea.vmem %s12375_s8, 86016  ;;  %s12276_s26 = smov [#allocation6]  }
  0x26   : > { %p12082_p4 = scmp.ne.s32.totalorder %s12375_s8, %s12081_s24  ;;  %s12086_s28 = sshll.u32 %s12276_s26, 4  ;;  %s12087_s28 = int_to_ptr.vmem [resolvable:$false] %s12086_s28 }
  0x27   : > { %s12088_s29 = scalar_lea.vmem %s12087_s28, 172032  ;;  %p12089_p9 = scmp.lt.s32.totalorder %s12375_s8, %s12087_s28 }
  0x28   : > { %p12084_p5 = pnand %p12082_p4, %p12383_p8  ;;  %p12090_p1 = scmp.lt.s32.totalorder %s12088_s29, %s12081_s24 }
  0x2a   : > { %p12085_p7 = pneg %p12084_p5  ;;  %p12091_p11 = por %p12090_p1, %p12089_p9 }
  0x2c   : > { %p12092_p12 = pnand %p12091_p11, %p12085_p7 }
  0x2e   : > { %12095 = shalt.err (!%p12092_p12)
}
  0x2f   : > { %s12277_s30 = smov 2688   ;;  %s12278_s7 = smov 896  }
  0x30   : > { %s12279_s10 = smov 56   ;;  %s12408_s12 = sadd.s32 4294967295, %s12274_s20  }
  0x31   : > { %10313 = dma.hbm_to_vmem [thread:$0]  (!%p12371_p6), %s12369_s5, 86016, %s12375_s8, %s12377_s9, %s12277_s30, %s12278_s7, %s12279_s10  }
  0x32   : > { %s9044_s13 = sadd.s32 4294967294, %s12274_s20   ;;  %p84_p1 = scmp.ne.s32.totalorder %s12258_s16, %s12254_s15 }
  0x33   : > { %p14051_p10 = scmp.eq.s32.totalorder %s12408_s12, 0  ;;  %p160_p13 = scmp.eq.s32.totalorder %s12408_s12, 2 }
  0x34   : > { %p166_p0 = scmp.eq.s32.totalorder %s9044_s13, 2  ;;  %p9045_p3 = scmp.ge.s32.totalorder %s12274_s20, 1 }
  0x35   : > { %p12417_p2 = por %p14051_p10, %p84_p1  ;;  %p14067_p4 = scmp.ne.s32.totalorder %s12262_s17, %s12258_s16 }
  0x36   : > { %p12429_p7 = por %p166_p0, %p84_p1  ;;  %p173_p9 = scmp.lt.s32.totalorder %s12274_s20, 4 }
  0x37   : > { %s14066_s14 = scalar_select %p12417_p2, 1, 0 }
  0x38   : > { %p12425_p5 = por %p160_p13, %p14067_p4  ;;  %s10289_s22 = smul.u32 14, %s12359_s25 }
  0x39   : > { %s14069_s8 = scalar_select %p12429_p7, 1, 0 }
  0x3a   : > { %s14068_s5 = scalar_select %p12425_p5, 1, 0 }
  0x3b   : > { %14070 = sst [smem:[#allocation19_spill]] %s14069_s8  ;;  %p12435_p11 = pnand %p9045_p3, %p173_p9 }
  0x3c   : > { %s12280_s24 = smov [#allocation3]   ;;  %s10181_s28 = smul.u32 224, %s12270_s19 }
  0x3d   : > { %s14071_s23 = scalar_select %p12435_p11, 1, 0 }
  0x3e   : > { %s189_s26 = sshll.u32 %s12280_s24, 4  ;;  %p10306_p12 = pneg %p12435_p11  ;;  %s190_s26 = int_to_ptr.vmem [resolvable:$true] %s189_s26 }
  0x3f   : > { %s228_s29 = scalar_lea.vmem [#allocation8], %s10289_s22  ;;  %s12451_s1 = scalar_lea.hbm %s14044_s2, %s10181_s28 }
  0x40   : > { %s236_s30 = sshll.u32 %s228_s29, 4  ;;  %p12444_p1 = pnand %p10306_p12, %p14051_p10  ;;  %s12453_s30 = int_to_ptr.vmem [resolvable:$true] %s236_s30 }
  0x41   : > { %s10290_s24 = smul.u32 3584, %s12359_s25  ;;  %s12096_s22 = scalar_lea.hbm %s14042_s0, 96 }
  0x42   : > { %s10185_s21 = smul.u32 57344, %s12270_s19  ;;  %p12097_p13 = scmp.ne.s32.totalorder %s14042_s0, %s12096_s22 }
  0x43   : > { %p12098_p0 = pneg %p12444_p1  ;;  %p12103_p9 = scmp.lt.u32.totalorder %s12096_s22, %s14042_s0 }
  0x45   : > { %p12099_p3 = pnand %p12098_p0, %p12097_p13 }
  0x47   : > { %p12100_p4 = pneg %p12099_p3 }
  0x49   : > { %p12105_p12 = pnand %p12103_p9, %p12100_p4 }
  0x4b   : > { %12108 = shalt.err (!%p12105_p12)
}
  0x4c   : > { %s12109_s28 = scalar_lea.vmem %s190_s26, 96  ;;  %p12117_p2 = scmp.lt.s32.totalorder %s190_s26, %s190_s26 }
  0x4d   : > { %p12110_p10 = scmp.ne.s32.totalorder %s190_s26, %s12109_s28  ;;  %p12118_p11 = scmp.lt.s32.totalorder %s12109_s28, %s12109_s28 }
  0x4f   : > { %p12112_p7 = pnand %p12110_p10, %p12098_p0  ;;  %p12119_p6 = por %p12118_p11, %p12117_p2 }
  0x51   : > { %p12113_p5 = pneg %p12112_p7 }
  0x53   : > { %p12120_p8 = pnand %p12119_p6, %p12113_p5 }
  0x55   : > { %12123 = shalt.err (!%p12120_p8)
}
  0x56   : > { %10309 = dma.hbm_to_vmem [thread:$0]  (!%p12444_p1), %s14042_s0, 96, %s190_s26, [#allocation4]  }
  0x57   : > { %s12124_s8 = scalar_lea.hbm %s12451_s1, 224  ;;  %p14073_p10 = scmp.ne.s32.totalorder %s14065_s11, 0 }
  0x58   : > { %p12125_p13 = scmp.ne.s32.totalorder %s12451_s1, %s12124_s8  ;;  %s12129_s10 = scalar_lea.hbm %s14044_s2, 672 }
  0x59   : > { %p12130_p6 = scmp.lt.u32.totalorder %s12451_s1, %s14044_s2  ;;  %p12131_p8 = scmp.lt.u32.totalorder %s12129_s10, %s12124_s8 }
  0x5a   : > { %p12127_p7 = pnand %p12125_p13, %p14073_p10  ;;  %p12133_p5 = scmp.lt.u32.totalorder %s12124_s8, %s12451_s1 }
  0x5b   : > { %p12132_p2 = por %p12131_p8, %p12130_p6 }
  0x5c   : > { %p12128_p0 = pneg %p12127_p7 }
  0x5d   : > { %p12134_p11 = por %p12133_p5, %p12132_p2 }
  0x5f   : > { %p12135_p3 = pnand %p12134_p11, %p12128_p0 }
  0x61   : > { %12138 = shalt.err (!%p12135_p3)
}
  0x62   : > { %s12139_s26 = scalar_lea.vmem %s12453_s30, 224  ;;  %s12281_s28 = smov [#allocation8]  }
  0x63   : > { %p12140_p1 = scmp.ne.s32.totalorder %s12453_s30, %s12139_s26  ;;  %s12144_s17 = sshll.u32 %s12281_s28, 4  ;;  %s12145_s17 = int_to_ptr.vmem [resolvable:$false] %s12144_s17 }
  0x64   : > { %s12146_s27 = scalar_lea.vmem %s12145_s17, 448  ;;  %p12147_p12 = scmp.lt.s32.totalorder %s12453_s30, %s12145_s17 }
  0x65   : > { %p12142_p4 = pnand %p12140_p1, %p14073_p10  ;;  %p12148_p13 = scmp.lt.s32.totalorder %s12146_s27, %s12139_s26 }
  0x67   : > { %p12143_p9 = pneg %p12142_p4  ;;  %p12149_p7 = por %p12148_p13, %p12147_p12 }
  0x69   : > { %p12150_p6 = pnand %p12149_p7, %p12143_p9 }
  0x6b   : > { %12153 = shalt.err (!%p12150_p6)
}
  0x6c   : > { %p14074_p0 = scmp.ne.s32.totalorder %s14064_s6, 0  ;;  %s12500_s29 = scalar_lea.hbm %s14045_s3, %s10185_s21 }
  0x6d   : > { %s247_s10 = scalar_lea.vmem [#allocation9], %s10290_s24  ;;  %s244_s7 = scalar_lea.sflag [#allocation10], %s12359_s25 }
  0x6e   : > { %10316 = dma.hbm_to_vmem [thread:$0]  (!%p14074_p0), %s12451_s1, 224, %s12453_s30, %s12377_s9  }
  0x6f   : > { %s255_s13 = sshll.u32 %s247_s10, 4  ;;  %s12154_s26 = scalar_lea.hbm %s12500_s29, 57344  ;;  %s12504_s13 = int_to_ptr.vmem [resolvable:$true] %s255_s13 }
  0x70   : > { %p12155_p8 = scmp.ne.s32.totalorder %s12500_s29, %s12154_s26  ;;  %s12159_s21 = scalar_lea.hbm %s14045_s3, 172032 }
  0x71   : > { %p12160_p11 = scmp.lt.u32.totalorder %s12500_s29, %s14045_s3  ;;  %p12161_p3 = scmp.lt.u32.totalorder %s12159_s21, %s12154_s26 }
  0x72   : > { %p12157_p2 = pnand %p12155_p8, %p14073_p10  ;;  %p12163_p4 = scmp.lt.u32.totalorder %s12154_s26, %s12500_s29 }
  0x73   : > { %p12162_p1 = por %p12161_p3, %p12160_p11 }
  0x74   : > { %p12158_p5 = pneg %p12157_p2 }
  0x75   : > { %p12164_p9 = por %p12163_p4, %p12162_p1 }
  0x77   : > { %p12165_p12 = pnand %p12164_p9, %p12158_p5 }
  0x79   : > { %12168 = shalt.err (!%p12165_p12)
}
  0x7a   : > { %s12169_s24 = scalar_lea.vmem %s12504_s13, 57344  ;;  %s12282_s17 = smov [#allocation9]  }
  0x7b   : > { %p12170_p13 = scmp.ne.s32.totalorder %s12504_s13, %s12169_s24  ;;  %s12174_s27 = sshll.u32 %s12282_s17, 4  ;;  %s12175_s27 = int_to_ptr.vmem [resolvable:$false] %s12174_s27 }
  0x7c   : > { %s12176_s8 = scalar_lea.vmem %s12175_s27, 114688  ;;  %p12177_p8 = scmp.lt.s32.totalorder %s12504_s13, %s12175_s27 }
  0x7d   : > { %p12172_p7 = pnand %p12170_p13, %p14073_p10  ;;  %p12178_p2 = scmp.lt.s32.totalorder %s12176_s8, %s12169_s24 }
  0x7f   : > { %p12173_p6 = pneg %p12172_p7  ;;  %p12179_p11 = por %p12178_p2, %p12177_p8 }
  0x81   : > { %p12180_p3 = pnand %p12179_p11, %p12173_p6 }
  0x83   : > { %12183 = shalt.err (!%p12180_p3)
}
  0x84   : > { %s12283_s22 = smov 256   ;;  %s12284_s10 = smov 16  }
  0x85   : > { %10319 = dma.hbm_to_vmem [thread:$0]  (!%p14074_p0), %s12500_s29, 57344, %s12504_s13, %s244_s7, %s12283_s22, %s12283_s22, %s12284_s10  }
  0x86   : > { %p14075_p10 = scmp.ne.s32.totalorder %s14071_s23, 0 }
  0x87   : > { %p14076_p5 = scmp.eq.s32.totalorder (!%p14075_p10), %s12408_s12, 0 }
  0x88   : > { %267 = sbr.rel (%p14075_p10) target bundleno = 1541 (0x605), region = 36 }
  0x8f   : > { %12237 = dma.done.wait (%p14076_p5), [#allocation4], 96   ;;  %p14077_p1 = pmov %p14076_p5 }
  0x90   : > { %s273_s11 = sand.u32 1, %s12408_s12   ;;  %s12538_s26 = sand.u32 1, %s12258_s16  }
  0x91   : > { %12239 = vsyncadd (%p14077_p1), [#allocation4], 4294967200  ;;  %s10291_s1 = smul.u32 5376, %s12538_s26  ;;  %s274_s6 = scalar_lea.sflag [#allocation7], %s273_s11 }
  0x92   : > { %p14078_p0 = scmp.ne.s32.totalorder %s14066_s14, 0 }
  0x93   : > { %s12541_s25 = scalar_lea.vmem [#allocation6], %s10291_s1 }
  0x94   : > { %12241 = dma.done.wait (%p14078_p0), %s274_s6, 86240  }
  0x95   : > { %12243 = vsyncadd (%p14078_p0), %s274_s6, 4294881056  ;;  %s10292_s23 = smul.u32 14, %s12538_s26  ;;  %s292_s12 = scalar_lea.sflag [#allocation10], %s12538_s26 }
  0x96   : > { %s10293_s29 = smul.u32 3584, %s12538_s26 }
  0x97   : > { %s12549_s13 = scalar_lea.vmem [#allocation8], %s10292_s23 }
  0x98   : > { %s12552_s7 = scalar_lea.vmem [#allocation9], %s10293_s29 }
  0x99   : > { %12245 = dma.done.wait (%p14078_p0), %s292_s12, 57344  }
  0x9a   : > { %12247 = vsyncadd (%p14078_p0), %s292_s12, 4294909952  ;;  %v10385_v0 = vld [vmem:[%s12541_s25 + $0x4] ss:$56 sps:$4 sm:$0xff]   ;;  %v10389_v2 = vld [vmem:[%s12541_s25] ss:$56 sps:$4 sm:$0xff]   ;;  %v1025_v38 = vlaneseq  ;;  %s9054_s14 = sshll.u32 %s12538_s26, 3 }
  0x9b   : > { %v10387_v1 = vld [vmem:[%s12541_s25 + $0x704] ss:$56 sps:$4 sm:$0xff]   ;;  %4434 = vmatprep.subr.bf16.mxu1 %v10385_v0  ;;  %v10390_v3 = vld [vmem:[%s12541_s25 + $0x700] ss:$56 sps:$4 sm:$0xff]   ;;  %v10391_v4 = vld [vmem:[%s12541_s25 + $0x74] ss:$56 sps:$4 sm:$0xff]  }
  0x9c   : > { %4475 = vmatprep.subr.bf16.mxu0 %v10387_v1  ;;  %4435 = vmatpush1.bf16.msra.mxu1 %v10389_v2  ;;  %v10393_v5 = vld [vmem:[%s12541_s25 + $0x774] ss:$56 sps:$4 sm:$0xff]   ;;  %v10395_v6 = vld [vmem:[%s12541_s25 + $0x70] ss:$56 sps:$4 sm:$0xff]   ;;  %v10397_v8 = vld [vmem:[%s12541_s25 + $0xe4] ss:$56 sps:$4 sm:$0xff]  }
  0x9d   : > { %4476 = vmatpush1.bf16.msra.mxu0 %v10390_v3  ;;  %4436 = vmatprep.subr.bf16.mxu1 %v10391_v4  ;;  %v10396_v7 = vld [vmem:[%s12541_s25 + $0x770] ss:$56 sps:$4 sm:$0xff]   ;;  %v10399_v9 = vld [vmem:[%s12541_s25 + $0x7e4] ss:$56 sps:$4 sm:$0xff]   ;;  %v10401_v10 = vld [vmem:[%s12541_s25 + $0xe0] ss:$56 sps:$4 sm:$0xff]  }
  0x9e   : > { %4477 = vmatprep.subr.bf16.mxu0 %v10393_v5  ;;  %v10402_v11 = vld [vmem:[%s12541_s25 + $0x7e0] ss:$56 sps:$4 sm:$0xff]   ;;  %v10403_v12 = vld [vmem:[%s12541_s25 + $0x154] ss:$56 sps:$4 sm:$0xff]   ;;  %v10407_v14 = vld [vmem:[%s12541_s25 + $0x150] ss:$56 sps:$4 sm:$0xff]  }
  0x9f   : > { %v10405_v13 = vld [vmem:[%s12541_s25 + $0x854] ss:$56 sps:$4 sm:$0xff]   ;;  %v10408_v15 = vld [vmem:[%s12541_s25 + $0x850] ss:$56 sps:$4 sm:$0xff]   ;;  %v10409_v16 = vld [vmem:[%s12541_s25 + $0x1c4] ss:$56 sps:$4 sm:$0xff]  }
  0xa0   : > { %4437 = vmatpush1.bf16.msra.mxu1 %v10395_v6  ;;  %v10411_v17 = vld [vmem:[%s12541_s25 + $0x8c4] ss:$56 sps:$4 sm:$0xff]   ;;  %v10413_v18 = vld [vmem:[%s12541_s25 + $0x1c0] ss:$56 sps:$4 sm:$0xff]   ;;  %v10415_v20 = vld [vmem:[%s12541_s25 + $0x234] ss:$56 sps:$4 sm:$0xff]  }
  0xa1   : > { %4478 = vmatpush1.bf16.msra.mxu0 %v10396_v7  ;;  %4438 = vmatprep.subr.bf16.mxu1 %v10397_v8  ;;  %v10414_v19 = vld [vmem:[%s12541_s25 + $0x8c0] ss:$56 sps:$4 sm:$0xff]   ;;  %v10417_v21 = vld [vmem:[%s12541_s25 + $0x934] ss:$56 sps:$4 sm:$0xff]   ;;  %v10419_v22 = vld [vmem:[%s12541_s25 + $0x230] ss:$56 sps:$4 sm:$0xff]  }
  0xa2   : > { %4479 = vmatprep.subr.bf16.mxu0 %v10399_v9  ;;  %v10420_v23 = vld [vmem:[%s12541_s25 + $0x930] ss:$56 sps:$4 sm:$0xff]   ;;  %v10421_v24 = vld [vmem:[%s12541_s25 + $0x2a4] ss:$56 sps:$4 sm:$0xff]   ;;  %v10425_v26 = vld [vmem:[%s12541_s25 + $0x2a0] ss:$56 sps:$4 sm:$0xff]  }
  0xa3   : > { %v10423_v25 = vld [vmem:[%s12541_s25 + $0x9a4] ss:$56 sps:$4 sm:$0xff]   ;;  %v10426_v27 = vld [vmem:[%s12541_s25 + $0x9a0] ss:$56 sps:$4 sm:$0xff]   ;;  %v10427_v28 = vld [vmem:[%s12541_s25 + $0x314] ss:$56 sps:$4 sm:$0xff]  }
  0xa4   : > { %4439 = vmatpush1.bf16.msra.mxu1 %v10401_v10  ;;  %v10429_v29 = vld [vmem:[%s12541_s25 + $0xa14] ss:$56 sps:$4 sm:$0xff]   ;;  %v10431_v30 = vld [vmem:[%s12541_s25 + $0x310] ss:$56 sps:$4 sm:$0xff]   ;;  %v10433_v32 = vld [vmem:[%s12541_s25 + $0x384] ss:$56 sps:$4 sm:$0xff]  }
  0xa5   : > { %4480 = vmatpush1.bf16.msra.mxu0 %v10402_v11  ;;  %4440 = vmatprep.subr.bf16.mxu1 %v10403_v12  ;;  %v10432_v31 = vld [vmem:[%s12541_s25 + $0xa10] ss:$56 sps:$4 sm:$0xff]   ;;  %v10435_v33 = vld [vmem:[%s12541_s25 + $0xa84] ss:$56 sps:$4 sm:$0xff]   ;;  %v10437_v34 = vld [vmem:[%s12541_s25 + $0x380] ss:$56 sps:$4 sm:$0xff]  }
  0xa6   : > { %4481 = vmatprep.subr.bf16.mxu0 %v10405_v13  ;;  %v10438_v35 = vld [vmem:[%s12541_s25 + $0xa80] ss:$56 sps:$4 sm:$0xff]   ;;  %v12285_v36 = vmov 1966171168   ;;  %v10439_v39 = vld [vmem:[%s12541_s25 + $0x3f4] ss:$56 sps:$4 sm:$0xff]  }
  0xa7   : > { %v1023_v37 = vunpack.c.l.s4 %v12285_v36  ;;  %v10441_v40 = vld [vmem:[%s12541_s25 + $0xaf4] ss:$56 sps:$4 sm:$0xff]   ;;  %v10443_v41 = vld [vmem:[%s12541_s25 + $0x3f0] ss:$56 sps:$4 sm:$0xff]   ;;  %v12597_v43 = vshrl.u32 %v1025_v38, 7  ;;  %s10184_s9 = sshll.u32 %s12266_s18, 7 }
  0xa8   : > { %4441 = vmatpush1.bf16.msra.mxu1 %v10407_v14  ;;  %v10444_v44 = vld [vmem:[%s12541_s25 + $0xaf0] ss:$56 sps:$4 sm:$0xff]   ;;  %v10445_v45 = vld [vmem:[%s12541_s25 + $0x464] ss:$56 sps:$4 sm:$0xff]   ;;  %v10449_v47 = vld [vmem:[%s12541_s25 + $0x460] ss:$56 sps:$4 sm:$0xff]   ;;  %s13994_s17 = scalar_lea.hbm %s14046_s4, %s10184_s9 }
  0xa9   : > { %4482 = vmatpush1.bf16.msra.mxu0 %v10408_v15  ;;  %4442 = vmatprep.subr.bf16.mxu1 %v10409_v16  ;;  %v1024_v42 = vunpack.c.0.s8 %v1023_v37  ;;  %v10447_v46 = vld [vmem:[%s12541_s25 + $0xb64] ss:$56 sps:$4 sm:$0xff]   ;;  %v10450_v48 = vld [vmem:[%s12541_s25 + $0xb60] ss:$56 sps:$4 sm:$0xff]   ;;  %v10451_v50 = vld [vmem:[%s12541_s25 + $0x4d4] ss:$56 sps:$4 sm:$0xff]  }
  0xaa   : > { %4483 = vmatprep.subr.bf16.mxu0 %v10411_v17  ;;  %v10453_v51 = vld [vmem:[%s12541_s25 + $0xbd4] ss:$56 sps:$4 sm:$0xff]   ;;  %v347_v52 = vld [vmem:[#allocation3] sm:$0x3f]  ;;  %v10455_v53 = vld [vmem:[%s12541_s25 + $0x4d0] ss:$56 sps:$4 sm:$0xff]  }
  0xab   : > { %v12605_v49 = vsub.s32 %v1024_v42, %v12597_v43  ;;  %v1021_v55 = vcombine.high %v347_v52, %v347_v52  ;;  %v10456_v56 = vld [vmem:[%s12541_s25 + $0xbd0] ss:$56 sps:$4 sm:$0xff]   ;;  %v10457_v57 = vld [vmem:[%s12541_s25 + $0x544] ss:$56 sps:$4 sm:$0xff]   ;;  %v10461_v61 = vld [vmem:[%s12541_s25 + $0x540] ss:$56 sps:$4 sm:$0xff]  }
  0xac   : > { %4443 = vmatpush1.bf16.msra.mxu1 %v10413_v18  ;;  %v10459_v58 = vld [vmem:[%s12541_s25 + $0xc44] ss:$56 sps:$4 sm:$0xff]   ;;  %v10462_v0 = vld [vmem:[%s12541_s25 + $0xc40] ss:$56 sps:$4 sm:$0xff]   ;;  %v10463_v1 = vld [vmem:[%s12541_s25 + $0x5b4] ss:$56 sps:$4 sm:$0xff]  }
  0xad   : > { %4484 = vmatpush1.bf16.msra.mxu0 %v10414_v19  ;;  %4444 = vmatprep.subr.bf16.mxu1 %v10415_v20  ;;  %v1028_v54 = vrot.slane %v347_v52, %v12605_v49  ;;  %v1035_v60 = vrot.slane %v1021_v55, %v12605_v49  ;;  %v10465_v2 = vld [vmem:[%s12541_s25 + $0xcb4] ss:$56 sps:$4 sm:$0xff]   ;;  %v10467_v4 = vld [vmem:[%s12541_s25 + $0x5b0] ss:$56 sps:$4 sm:$0xff]   ;;  %v10469_v6 = vld [vmem:[%s12541_s25 + $0x624] ss:$56 sps:$4 sm:$0xff]  }
  0xae   : > { %4485 = vmatprep.subr.bf16.mxu0 %v10417_v21  ;;  %v10468_v5 = vld [vmem:[%s12541_s25 + $0xcb0] ss:$56 sps:$4 sm:$0xff]   ;;  %v10471_v7 = vld [vmem:[%s12541_s25 + $0xd24] ss:$56 sps:$4 sm:$0xff]   ;;  %v10473_v8 = vld [vmem:[%s12541_s25 + $0x620] ss:$56 sps:$4 sm:$0xff]  }
  0xaf   : > { %v1036_v59 = vcombine.high %v1028_v54, %v1028_v54  ;;  %v12620_v63 = vrot.slane %v1035_v60, %v12605_v49  ;;  %v10474_v9 = vld [vmem:[%s12541_s25 + $0xd20] ss:$56 sps:$4 sm:$0xff]   ;;  %v10475_v10 = vld [vmem:[%s12541_s25 + $0x694] ss:$56 sps:$4 sm:$0xff]   ;;  %v10479_v12 = vld [vmem:[%s12541_s25 + $0x690] ss:$56 sps:$4 sm:$0xff]   ;;  %v12641_v13 = vrot.slane %v1028_v54, %v12605_v49  ;;  %v1037_v17 = vcombine.high %v1035_v60, %v1035_v60 }
  0xb0   : > { %4445 = vmatpush1.bf16.msra.mxu1 %v10419_v22  ;;  %v10477_v11 = vld [vmem:[%s12541_s25 + $0xd94] ss:$56 sps:$4 sm:$0xff]   ;;  %v10480_v14 = vld [vmem:[%s12541_s25 + $0xd90] ss:$56 sps:$4 sm:$0xff]   ;;  %v10483_v15 = vld [vmem:[%s12541_s25 + $0xe04] ss:$56 sps:$4 sm:$0xff]  }
  0xb1   : > { %4486 = vmatpush1.bf16.msra.mxu0 %v10420_v23  ;;  %4446 = vmatprep.subr.bf16.mxu1 %v10421_v24  ;;  %v12617_v62 = vrot.slane %v1036_v59, %v12605_v49  ;;  %v10486_v16 = vld [vmem:[%s12541_s25 + $0xc] ss:$56 sps:$4 sm:$0xff]   ;;  %v10481_v18 = vld [vmem:[%s12541_s25 + $0xe00] ss:$56 sps:$4 sm:$0xff]   ;;  %v12649_v19 = vcombine.high %v12641_v13, %v12641_v13  ;;  %v10492_v22 = vld [vmem:[%s12541_s25 + $0x7c] ss:$56 sps:$4 sm:$0xff]   ;;  %v12655_v23 = vrot.slane %v1037_v17, %v12605_v49 }
  0xb2   : > { %4487 = vmatprep.subr.bf16.mxu0 %v10423_v25  ;;  %v10484_v20 = vld [vmem:[%s12541_s25 + $0x8] ss:$56 sps:$4 sm:$0xff]   ;;  %v10489_v21 = vld [vmem:[%s12541_s25 + $0xe74] ss:$56 sps:$4 sm:$0xff]   ;;  %v10490_v25 = vld [vmem:[%s12541_s25 + $0x78] ss:$56 sps:$4 sm:$0xff]  }
  0xb3   : > { %v12627_v3 = vcombine.high %v12617_v62, %v12617_v62  ;;  %4466 = vmatprep.mubr.bf16.mxu1 %v12617_v62  ;;  %v10487_v24 = vld [vmem:[%s12541_s25 + $0xe70] ss:$56 sps:$4 sm:$0xff]   ;;  %v10505_v36 = vld [vmem:[%s12541_s25 + $0xfc0] ss:$56 sps:$4 sm:$0xff]   ;;  %v10513_v38 = vld [vmem:[%s12541_s25 + $0x1034] ss:$56 sps:$4 sm:$0xff]  }
  0xb4   : > { %4447 = vmatpush1.bf16.msra.mxu1 %v10425_v26  ;;  %v10495_v26 = vld [vmem:[%s12541_s25 + $0xee4] ss:$56 sps:$4 sm:$0xff]   ;;  %v10508_v37 = vld [vmem:[%s12541_s25 + $0x1c8] ss:$56 sps:$4 sm:$0xff]   ;;  %v10537_v55 = vld [vmem:[%s12541_s25 + $0x11f4] ss:$56 sps:$4 sm:$0xff]  }
  0xb5   : > { %4488 = vmatpush1.bf16.msra.mxu0 %v10426_v27  ;;  %4448 = vmatprep.subr.bf16.mxu1 %v10427_v28  ;;  %v10498_v27 = vld [vmem:[%s12541_s25 + $0xec] ss:$56 sps:$4 sm:$0xff]   ;;  %v10493_v28 = vld [vmem:[%s12541_s25 + $0xee0] ss:$56 sps:$4 sm:$0xff]   ;;  %v10523_v49 = vld [vmem:[%s12541_s25 + $0x1110] ss:$56 sps:$4 sm:$0xff]  }
  0xb6   : > { %4489 = vmatprep.subr.bf16.mxu0 %v10429_v29  ;;  %4507 = vmatprep.mubr.bf16.mxu0 %v12627_v3  ;;  %v10496_v29 = vld [vmem:[%s12541_s25 + $0xe8] ss:$56 sps:$4 sm:$0xff]   ;;  %v10519_v42 = vld [vmem:[%s12541_s25 + $0x10a4] ss:$56 sps:$4 sm:$0xff]   ;;  %s329_s21 = scalar_lea.vmem [#allocation11], %s9054_s14  ;;  %s8891_s27 = scalar_lea.sflag [#allocation5], %s12538_s26 }
  0xb7   : > { %v10534_v52 = vld [vmem:[%s12541_s25 + $0x38c] ss:$56 sps:$4 sm:$0xff]   ;;  %v10532_v54 = vld [vmem:[%s12541_s25 + $0x388] ss:$56 sps:$4 sm:$0xff]   ;;  %s8905_s30 = sshll.u32 %s329_s21, 4  ;;  %p14079_p9 = scmp.ne.s32.totalorder %s14068_s5, 0  ;;  %s13996_s30 = int_to_ptr.vmem [resolvable:$true] %s8905_s30 }
  0xb8   : > { %4449 = vmatpush1.bf16.msra.mxu1 %v10431_v30  ;;  %v10501_v30 = vld [vmem:[%s12541_s25 + $0xf54] ss:$56 sps:$4 sm:$0xff]   ;;  %v10543_v59 = vld [vmem:[%s12541_s25 + $0x1264] ss:$56 sps:$4 sm:$0xff]   ;;  %v10565_v17 = vld [vmem:[%s12541_s25 + $0x1420] ss:$56 sps:$4 sm:$0xff]  }
  0xb9   : > { %4490 = vmatpush1.bf16.msra.mxu0 %v10432_v31  ;;  %4450 = vmatprep.subr.bf16.mxu1 %v10433_v32  ;;  %v10504_v31 = vld [vmem:[%s12541_s25 + $0x15c] ss:$56 sps:$4 sm:$0xff]   ;;  %v10499_v32 = vld [vmem:[%s12541_s25 + $0xf50] ss:$56 sps:$4 sm:$0xff]   ;;  %v10546_v60 = vld [vmem:[%s12541_s25 + $0x46c] ss:$56 sps:$4 sm:$0xff]  }
  0xba   : > { %4491 = vmatprep.subr.bf16.mxu0 %v10435_v33  ;;  %v10502_v33 = vld [vmem:[%s12541_s25 + $0x158] ss:$56 sps:$4 sm:$0xff]   ;;  %s12184_s18 = scalar_lea.vmem %s13996_s30, 128  ;;  %s12288_s8 = smov [#allocation11]  }
  0xbb   : > { %p12185_p4 = scmp.ne.s32.totalorder %s13996_s30, %s12184_s18  ;;  %s12188_s22 = sshll.u32 %s12288_s8, 4  ;;  %s12189_s22 = int_to_ptr.vmem [resolvable:$false] %s12188_s22 }
  0xbc   : > { %4451 = vmatpush1.bf16.msra.mxu1 %v10437_v34  ;;  %v10507_v34 = vld [vmem:[%s12541_s25 + $0xfc4] ss:$56 sps:$4 sm:$0xff]   ;;  %s12190_s10 = scalar_lea.vmem %s12189_s22, 256  ;;  %p12191_p7 = scmp.lt.s32.totalorder %s13996_s30, %s12189_s22 }
  0xbd   : > { %4492 = vmatpush1.bf16.msra.mxu0 %v10438_v35  ;;  %4452 = vmatprep.subr.bf16.mxu1 %v10439_v39  ;;  %v10510_v35 = vld [vmem:[%s12541_s25 + $0x1cc] ss:$56 sps:$4 sm:$0xff]   ;;  %v10516_v39 = vld [vmem:[%s12541_s25 + $0x23c] ss:$56 sps:$4 sm:$0xff]   ;;  %p12186_p12 = pnand %p12185_p4, %p14079_p9  ;;  %p12192_p6 = scmp.lt.s32.totalorder %s12190_s10, %s12184_s18 }
  0xbe   : > { %4493 = vmatprep.subr.bf16.mxu0 %v10441_v40  ;;  %v10511_v40 = vld [vmem:[%s12541_s25 + $0x1030] ss:$56 sps:$4 sm:$0xff]  }
  0xbf   : > { %p12187_p13 = pneg %p12186_p12  ;;  %p12193_p8 = por %p12192_p6, %p12191_p7 }
  0xc0   : > { %4453 = vmatpush1.bf16.msra.mxu1 %v10443_v41  ;;  %v10514_v41 = vld [vmem:[%s12541_s25 + $0x238] ss:$56 sps:$4 sm:$0xff]  }
  0xc1   : > { %4494 = vmatpush1.bf16.msra.mxu0 %v10444_v44  ;;  %4454 = vmatprep.subr.bf16.mxu1 %v10445_v45  ;;  %v10522_v44 = vld [vmem:[%s12541_s25 + $0x2ac] ss:$56 sps:$4 sm:$0xff]   ;;  %v10517_v45 = vld [vmem:[%s12541_s25 + $0x10a0] ss:$56 sps:$4 sm:$0xff]   ;;  %p12194_p2 = pnand %p12193_p8, %p12187_p13 }
  0xc2   : > { %4495 = vmatprep.subr.bf16.mxu0 %v10447_v46  ;;  %v10520_v46 = vld [vmem:[%s12541_s25 + $0x2a8] ss:$56 sps:$4 sm:$0xff]  }
  0xc4   : > { %4455 = vmatpush1.bf16.msra.mxu1 %v10449_v47  ;;  %v10525_v47 = vld [vmem:[%s12541_s25 + $0x1114] ss:$56 sps:$4 sm:$0xff]  }
  0xc5   : > { %4496 = vmatpush1.bf16.msra.mxu0 %v10450_v48  ;;  %4456 = vmatprep.subr.bf16.mxu1 %v10451_v50  ;;  %v10528_v48 = vld [vmem:[%s12541_s25 + $0x31c] ss:$56 sps:$4 sm:$0xff]   ;;  %v10526_v50 = vld [vmem:[%s12541_s25 + $0x318] ss:$56 sps:$4 sm:$0xff]  }
  0xc6   : > { %4497 = vmatprep.subr.bf16.mxu0 %v10453_v51  ;;  %v10531_v51 = vld [vmem:[%s12541_s25 + $0x1184] ss:$56 sps:$4 sm:$0xff]  }
  0xc8   : > { %4457 = vmatpush1.bf16.msra.mxu1 %v10455_v53  ;;  %v10529_v53 = vld [vmem:[%s12541_s25 + $0x1180] ss:$56 sps:$4 sm:$0xff]  }
  0xc9   : > { %4498 = vmatpush1.bf16.msra.mxu0 %v10456_v56  ;;  %4458 = vmatprep.subr.bf16.mxu1 %v10457_v57  ;;  %v10540_v56 = vld [vmem:[%s12541_s25 + $0x3fc] ss:$56 sps:$4 sm:$0xff]   ;;  %v10535_v57 = vld [vmem:[%s12541_s25 + $0x11f0] ss:$56 sps:$4 sm:$0xff]  }
  0xca   : > { %4499 = vmatprep.subr.bf16.mxu0 %v10459_v58  ;;  %v10538_v58 = vld [vmem:[%s12541_s25 + $0x3f8] ss:$56 sps:$4 sm:$0xff]  }
  0xcc   : > { %4459 = vmatpush1.bf16.msra.mxu1 %v10461_v61  ;;  %v10541_v61 = vld [vmem:[%s12541_s25 + $0x1260] ss:$56 sps:$4 sm:$0xff]  }
  0xcd   : > { %4500 = vmatpush1.bf16.msra.mxu0 %v10462_v0  ;;  %4460 = vmatprep.subr.bf16.mxu1 %v10463_v1  ;;  %v10544_v0 = vld [vmem:[%s12541_s25 + $0x468] ss:$56 sps:$4 sm:$0xff]   ;;  %v10549_v1 = vld [vmem:[%s12541_s25 + $0x12d4] ss:$56 sps:$4 sm:$0xff]  }
  0xce   : > { %4501 = vmatprep.subr.bf16.mxu0 %v10465_v2  ;;  %v10552_v2 = vld [vmem:[%s12541_s25 + $0x4dc] ss:$56 sps:$4 sm:$0xff]  }
  0xd0   : > { %4461 = vmatpush1.bf16.msra.mxu1 %v10467_v4  ;;  %v10547_v4 = vld [vmem:[%s12541_s25 + $0x12d0] ss:$56 sps:$4 sm:$0xff]  }
  0xd1   : > { %4502 = vmatpush1.bf16.msra.mxu0 %v10468_v5  ;;  %4462 = vmatprep.subr.bf16.mxu1 %v10469_v6  ;;  %v10550_v5 = vld [vmem:[%s12541_s25 + $0x4d8] ss:$56 sps:$4 sm:$0xff]   ;;  %v10555_v6 = vld [vmem:[%s12541_s25 + $0x1344] ss:$56 sps:$4 sm:$0xff]  }
  0xd2   : > { %4503 = vmatprep.subr.bf16.mxu0 %v10471_v7  ;;  %v10558_v7 = vld [vmem:[%s12541_s25 + $0x54c] ss:$56 sps:$4 sm:$0xff]  }
  0xd4   : > { %4463 = vmatpush1.bf16.msra.mxu1 %v10473_v8  ;;  %v10553_v8 = vld [vmem:[%s12541_s25 + $0x1340] ss:$56 sps:$4 sm:$0xff]  }
  0xd5   : > { %4504 = vmatpush1.bf16.msra.mxu0 %v10474_v9  ;;  %4464 = vmatprep.subr.bf16.mxu1 %v10475_v10  ;;  %v10556_v9 = vld [vmem:[%s12541_s25 + $0x548] ss:$56 sps:$4 sm:$0xff]   ;;  %v10561_v10 = vld [vmem:[%s12541_s25 + $0x13b4] ss:$56 sps:$4 sm:$0xff]  }
  0xd6   : > { %4505 = vmatprep.subr.bf16.mxu0 %v10477_v11  ;;  %v10564_v11 = vld [vmem:[%s12541_s25 + $0x5bc] ss:$56 sps:$4 sm:$0xff]  }
  0xd8   : > { %4465 = vmatpush1.bf16.msra.mxu1 %v10479_v12  ;;  %v10559_v12 = vld [vmem:[%s12541_s25 + $0x13b0] ss:$56 sps:$4 sm:$0xff]  }
  0xd9   : > { %4506 = vmatpush1.bf16.msra.mxu0 %v10480_v14  ;;  %4557 = vmatprep.subr.bf16.mxu1 %v10486_v16  ;;  %v10562_v14 = vld [vmem:[%s12541_s25 + $0x5b8] ss:$56 sps:$4 sm:$0xff]   ;;  %v10570_v16 = vld [vmem:[%s12541_s25 + $0x62c] ss:$56 sps:$4 sm:$0xff]  }
  0xda   : > { %4516 = vmatprep.subr.bf16.mxu0 %v10483_v15  ;;  %v10567_v15 = vld [vmem:[%s12541_s25 + $0x1424] ss:$56 sps:$4 sm:$0xff]  }
  0xdb   : > { %4467 = vmatmul.mubr.bf16.vlgmr.msra.gmra.mrb[0].mxu1 %v12641_v13 }
  0xdc   : > { %4508 = vmatmul.mubr.bf16.vlgmr.msra.gmra.mrb[0].mxu0 %v12649_v19  ;;  %4558 = vmatpush1.bf16.msra.mxu1 %v10484_v20  ;;  %v10573_v20 = vld [vmem:[%s12541_s25 + $0x1494] ss:$56 sps:$4 sm:$0xff]  }
  0xdd   : > { %4517 = vmatpush1.bf16.msra.mxu0 %v10481_v18  ;;  %4559 = vmatprep.subr.bf16.mxu1 %v10492_v22  ;;  %v10568_v18 = vld [vmem:[%s12541_s25 + $0x628] ss:$56 sps:$4 sm:$0xff]  }
  0xde   : > { %4518 = vmatprep.subr.bf16.mxu0 %v10489_v21  ;;  %4548 = vmatprep.mubr.bf16.mxu0 %v12655_v23  ;;  %v10576_v21 = vld [vmem:[%s12541_s25 + $0x69c] ss:$56 sps:$4 sm:$0xff]   ;;  %v10571_v22 = vld [vmem:[%s12541_s25 + $0x1490] ss:$56 sps:$4 sm:$0xff]  }
  0xdf   : > { %4589 = vmatprep.mubr.bf16.mxu1 %v12617_v62 }
  0xe0   : > { %4560 = vmatpush1.bf16.msra.mxu1 %v10490_v25  ;;  %v10580_v25 = vld [vmem:[%s12541_s25 + $0x70c] ss:$56 sps:$4 sm:$0xff]  }
  0xe1   : > { %4519 = vmatpush1.bf16.msra.mxu0 %v10487_v24  ;;  %4561 = vmatprep.subr.bf16.mxu1 %v10498_v27  ;;  %v10574_v24 = vld [vmem:[%s12541_s25 + $0x698] ss:$56 sps:$4 sm:$0xff]   ;;  %v10578_v27 = vld [vmem:[%s12541_s25 + $0x708] ss:$56 sps:$4 sm:$0xff]  }
  0xe2   : > { %4520 = vmatprep.subr.bf16.mxu0 %v10495_v26  ;;  %v10583_v26 = vld [vmem:[%s12541_s25 + $0x14] ss:$56 sps:$4 sm:$0xff]  }
  0xe4   : > { %4562 = vmatpush1.bf16.msra.mxu1 %v10496_v29  ;;  %v10586_v29 = vld [vmem:[%s12541_s25 + $0x77c] ss:$56 sps:$4 sm:$0xff]  }
  0xe5   : > { %4521 = vmatpush1.bf16.msra.mxu0 %v10493_v28  ;;  %4563 = vmatprep.subr.bf16.mxu1 %v10504_v31  ;;  %v10581_v28 = vld [vmem:[%s12541_s25 + $0x10] ss:$56 sps:$4 sm:$0xff]  }
  0xe6   : > { %4522 = vmatprep.subr.bf16.mxu0 %v10501_v30  ;;  %v10589_v30 = vld [vmem:[%s12541_s25 + $0x84] ss:$56 sps:$4 sm:$0xff]   ;;  %v10584_v31 = vld [vmem:[%s12541_s25 + $0x778] ss:$56 sps:$4 sm:$0xff]  }
  0xe8   : > { %4564 = vmatpush1.bf16.msra.mxu1 %v10502_v33  ;;  %v10592_v33 = vld [vmem:[%s12541_s25 + $0x7ec] ss:$56 sps:$4 sm:$0xff]  }
  0xe9   : > { %4523 = vmatpush1.bf16.msra.mxu0 %v10499_v32  ;;  %4565 = vmatprep.subr.bf16.mxu1 %v10510_v35  ;;  %v10587_v32 = vld [vmem:[%s12541_s25 + $0x80] ss:$56 sps:$4 sm:$0xff]  }
  0xea   : > { %4524 = vmatprep.subr.bf16.mxu0 %v10507_v34  ;;  %v10595_v34 = vld [vmem:[%s12541_s25 + $0xf4] ss:$56 sps:$4 sm:$0xff]   ;;  %v10590_v35 = vld [vmem:[%s12541_s25 + $0x7e8] ss:$56 sps:$4 sm:$0xff]  }
  0xec   : > { %4566 = vmatpush1.bf16.msra.mxu1 %v10508_v37  ;;  %v10598_v37 = vld [vmem:[%s12541_s25 + $0x85c] ss:$56 sps:$4 sm:$0xff]  }
  0xed   : > { %4525 = vmatpush1.bf16.msra.mxu0 %v10505_v36  ;;  %4567 = vmatprep.subr.bf16.mxu1 %v10516_v39  ;;  %v10593_v36 = vld [vmem:[%s12541_s25 + $0xf0] ss:$56 sps:$4 sm:$0xff]  }
  0xee   : > { %4526 = vmatprep.subr.bf16.mxu0 %v10513_v38  ;;  %v10601_v38 = vld [vmem:[%s12541_s25 + $0x164] ss:$56 sps:$4 sm:$0xff]   ;;  %v10596_v39 = vld [vmem:[%s12541_s25 + $0x858] ss:$56 sps:$4 sm:$0xff]  }
  0xf0   : > { %4568 = vmatpush1.bf16.msra.mxu1 %v10514_v41  ;;  %v10604_v41 = vld [vmem:[%s12541_s25 + $0x8cc] ss:$56 sps:$4 sm:$0xff]  }
  0xf1   : > { %4527 = vmatpush1.bf16.msra.mxu0 %v10511_v40  ;;  %4569 = vmatprep.subr.bf16.mxu1 %v10522_v44  ;;  %v10599_v40 = vld [vmem:[%s12541_s25 + $0x160] ss:$56 sps:$4 sm:$0xff]  }
  0xf2   : > { %4528 = vmatprep.subr.bf16.mxu0 %v10519_v42  ;;  %v10607_v42 = vld [vmem:[%s12541_s25 + $0x1d4] ss:$56 sps:$4 sm:$0xff]   ;;  %v10602_v44 = vld [vmem:[%s12541_s25 + $0x8c8] ss:$56 sps:$4 sm:$0xff]  }
  0xf4   : > { %4570 = vmatpush1.bf16.msra.mxu1 %v10520_v46  ;;  %v10610_v46 = vld [vmem:[%s12541_s25 + $0x93c] ss:$56 sps:$4 sm:$0xff]  }
  0xf5   : > { %4529 = vmatpush1.bf16.msra.mxu0 %v10517_v45  ;;  %4571 = vmatprep.subr.bf16.mxu1 %v10528_v48  ;;  %v10605_v45 = vld [vmem:[%s12541_s25 + $0x1d0] ss:$56 sps:$4 sm:$0xff]  }
  0xf6   : > { %4530 = vmatprep.subr.bf16.mxu0 %v10525_v47  ;;  %v10613_v47 = vld [vmem:[%s12541_s25 + $0x244] ss:$56 sps:$4 sm:$0xff]   ;;  %v10608_v48 = vld [vmem:[%s12541_s25 + $0x938] ss:$56 sps:$4 sm:$0xff]  }
  0xf8   : > { %4572 = vmatpush1.bf16.msra.mxu1 %v10526_v50  ;;  %v10616_v50 = vld [vmem:[%s12541_s25 + $0x9ac] ss:$56 sps:$4 sm:$0xff]  }
  0xf9   : > { %4531 = vmatpush1.bf16.msra.mxu0 %v10523_v49  ;;  %4573 = vmatprep.subr.bf16.mxu1 %v10534_v52  ;;  %v10611_v49 = vld [vmem:[%s12541_s25 + $0x240] ss:$56 sps:$4 sm:$0xff]  }
  0xfa   : > { %4532 = vmatprep.subr.bf16.mxu0 %v10531_v51  ;;  %v10619_v51 = vld [vmem:[%s12541_s25 + $0x2b4] ss:$56 sps:$4 sm:$0xff]   ;;  %v10614_v52 = vld [vmem:[%s12541_s25 + $0x9a8] ss:$56 sps:$4 sm:$0xff]  }
  0xfc   : > { %4574 = vmatpush1.bf16.msra.mxu1 %v10532_v54  ;;  %v10622_v54 = vld [vmem:[%s12541_s25 + $0xa1c] ss:$56 sps:$4 sm:$0xff]  }
  0xfd   : > { %4533 = vmatpush1.bf16.msra.mxu0 %v10529_v53  ;;  %4575 = vmatprep.subr.bf16.mxu1 %v10540_v56  ;;  %v10617_v53 = vld [vmem:[%s12541_s25 + $0x2b0] ss:$56 sps:$4 sm:$0xff]  }
  0xfe   : > { %4534 = vmatprep.subr.bf16.mxu0 %v10537_v55  ;;  %v10625_v55 = vld [vmem:[%s12541_s25 + $0x324] ss:$56 sps:$4 sm:$0xff]   ;;  %v10620_v56 = vld [vmem:[%s12541_s25 + $0xa18] ss:$56 sps:$4 sm:$0xff]  }
 0x100   : > { %4576 = vmatpush1.bf16.msra.mxu1 %v10538_v58  ;;  %v10628_v58 = vld [vmem:[%s12541_s25 + $0xa8c] ss:$56 sps:$4 sm:$0xff]  }
 0x101   : > { %4535 = vmatpush1.bf16.msra.mxu0 %v10535_v57  ;;  %4577 = vmatprep.subr.bf16.mxu1 %v10546_v60  ;;  %v10623_v57 = vld [vmem:[%s12541_s25 + $0x320] ss:$56 sps:$4 sm:$0xff]  }
 0x102   : > { %4536 = vmatprep.subr.bf16.mxu0 %v10543_v59  ;;  %v10631_v59 = vld [vmem:[%s12541_s25 + $0x394] ss:$56 sps:$4 sm:$0xff]   ;;  %v10626_v60 = vld [vmem:[%s12541_s25 + $0xa88] ss:$56 sps:$4 sm:$0xff]  }
 0x104   : > { %4578 = vmatpush1.bf16.msra.mxu1 %v10544_v0  ;;  %v10634_v0 = vld [vmem:[%s12541_s25 + $0xafc] ss:$56 sps:$4 sm:$0xff]  }
 0x105   : > { %4537 = vmatpush1.bf16.msra.mxu0 %v10541_v61  ;;  %4579 = vmatprep.subr.bf16.mxu1 %v10552_v2  ;;  %v10629_v61 = vld [vmem:[%s12541_s25 + $0x390] ss:$56 sps:$4 sm:$0xff]  }
 0x106   : > { %4538 = vmatprep.subr.bf16.mxu0 %v10549_v1  ;;  %v10637_v1 = vld [vmem:[%s12541_s25 + $0x404] ss:$56 sps:$4 sm:$0xff]   ;;  %v10632_v2 = vld [vmem:[%s12541_s25 + $0xaf8] ss:$56 sps:$4 sm:$0xff]  }
 0x108   : > { %4580 = vmatpush1.bf16.msra.mxu1 %v10550_v5  ;;  %v10640_v5 = vld [vmem:[%s12541_s25 + $0xb6c] ss:$56 sps:$4 sm:$0xff]  }
 0x109   : > { %4539 = vmatpush1.bf16.msra.mxu0 %v10547_v4  ;;  %4581 = vmatprep.subr.bf16.mxu1 %v10558_v7  ;;  %v10635_v4 = vld [vmem:[%s12541_s25 + $0x400] ss:$56 sps:$4 sm:$0xff]  }
 0x10a   : > { %4540 = vmatprep.subr.bf16.mxu0 %v10555_v6  ;;  %v10643_v6 = vld [vmem:[%s12541_s25 + $0x474] ss:$56 sps:$4 sm:$0xff]   ;;  %v10638_v7 = vld [vmem:[%s12541_s25 + $0xb68] ss:$56 sps:$4 sm:$0xff]  }
 0x10c   : > { %4582 = vmatpush1.bf16.msra.mxu1 %v10556_v9  ;;  %v10646_v9 = vld [vmem:[%s12541_s25 + $0xbdc] ss:$56 sps:$4 sm:$0xff]  }
 0x10d   : > { %4541 = vmatpush1.bf16.msra.mxu0 %v10553_v8  ;;  %4583 = vmatprep.subr.bf16.mxu1 %v10564_v11  ;;  %v10641_v8 = vld [vmem:[%s12541_s25 + $0x470] ss:$56 sps:$4 sm:$0xff]  }
 0x10e   : > { %4542 = vmatprep.subr.bf16.mxu0 %v10561_v10  ;;  %v10649_v10 = vld [vmem:[%s12541_s25 + $0x4e4] ss:$56 sps:$4 sm:$0xff]   ;;  %v10644_v11 = vld [vmem:[%s12541_s25 + $0xbd8] ss:$56 sps:$4 sm:$0xff]  }
 0x110   : > { %4584 = vmatpush1.bf16.msra.mxu1 %v10562_v14  ;;  %v10652_v14 = vld [vmem:[%s12541_s25 + $0xc4c] ss:$56 sps:$4 sm:$0xff]  }
 0x111   : > { %4543 = vmatpush1.bf16.msra.mxu0 %v10559_v12  ;;  %4585 = vmatprep.subr.bf16.mxu1 %v10570_v16  ;;  %v10647_v12 = vld [vmem:[%s12541_s25 + $0x4e0] ss:$56 sps:$4 sm:$0xff]  }
 0x112   : > { %4544 = vmatprep.subr.bf16.mxu0 %v10567_v15  ;;  %v10655_v15 = vld [vmem:[%s12541_s25 + $0x554] ss:$56 sps:$4 sm:$0xff]   ;;  %v10650_v16 = vld [vmem:[%s12541_s25 + $0xc48] ss:$56 sps:$4 sm:$0xff]  }
 0x114   : > { %4586 = vmatpush1.bf16.msra.mxu1 %v10568_v18  ;;  %v10658_v18 = vld [vmem:[%s12541_s25 + $0xcbc] ss:$56 sps:$4 sm:$0xff]  }
 0x115   : > { %4545 = vmatpush1.bf16.msra.mxu0 %v10565_v17  ;;  %4587 = vmatprep.subr.bf16.mxu1 %v10576_v21  ;;  %v10653_v17 = vld [vmem:[%s12541_s25 + $0x550] ss:$56 sps:$4 sm:$0xff]  }
 0x116   : > { %4546 = vmatprep.subr.bf16.mxu0 %v10573_v20  ;;  %v10661_v20 = vld [vmem:[%s12541_s25 + $0x5c4] ss:$56 sps:$4 sm:$0xff]   ;;  %v10656_v21 = vld [vmem:[%s12541_s25 + $0xcb8] ss:$56 sps:$4 sm:$0xff]  }
 0x118   : > { %4588 = vmatpush1.bf16.msra.mxu1 %v10574_v24  ;;  %v10664_v24 = vld [vmem:[%s12541_s25 + $0xd2c] ss:$56 sps:$4 sm:$0xff]  }
 0x119   : > { %4547 = vmatpush1.bf16.msra.mxu0 %v10571_v22  ;;  %4598 = vmatprep.subr.bf16.mxu1 %v10580_v25  ;;  %v10659_v22 = vld [vmem:[%s12541_s25 + $0x5c0] ss:$56 sps:$4 sm:$0xff]   ;;  %v10667_v25 = vld [vmem:[%s12541_s25 + $0x634] ss:$56 sps:$4 sm:$0xff]  }
 0x11a   : > { %4680 = vmatprep.subr.bf16.mxu0 %v10583_v26  ;;  %v10662_v26 = vld [vmem:[%s12541_s25 + $0xd28] ss:$56 sps:$4 sm:$0xff]  }
 0x11b   : > { %4590 = vmatmul.mubr.bf16.vlgmr.msra.gmra.mrb[4].mxu1 %v12641_v13 }
 0x11c   : > { %4549 = vmatmul.mubr.bf16.vlgmr.msra.gmra.mrb[0].mxu0 %v12620_v63  ;;  %4599 = vmatpush1.bf16.msra.mxu1 %v10578_v27  ;;  %v10665_v27 = vld [vmem:[%s12541_s25 + $0x630] ss:$56 sps:$4 sm:$0xff]  }
 0x11d   : > { %4681 = vmatpush1.bf16.msra.mxu0 %v10581_v28  ;;  %4600 = vmatprep.subr.bf16.mxu1 %v10586_v29  ;;  %v10670_v28 = vld [vmem:[%s12541_s25 + $0xd9c] ss:$56 sps:$4 sm:$0xff]  }
 0x11e   : > { %4682 = vmatprep.subr.bf16.mxu0 %v10589_v30  ;;  %4630 = vmatprep.mubr.bf16.mxu1 %v12627_v3  ;;  %v10673_v29 = vld [vmem:[%s12541_s25 + $0x6a4] ss:$56 sps:$4 sm:$0xff]   ;;  %v10668_v30 = vld [vmem:[%s12541_s25 + $0xd98] ss:$56 sps:$4 sm:$0xff]  }
 0x11f   : > { %4712 = vmatprep.mubr.bf16.mxu0 %v12617_v62 }
 0x120   : > { %4601 = vmatpush1.bf16.msra.mxu1 %v10584_v31  ;;  %v10671_v31 = vld [vmem:[%s12541_s25 + $0x6a0] ss:$56 sps:$4 sm:$0xff]  }
 0x121   : > { %4683 = vmatpush1.bf16.msra.mxu0 %v10587_v32  ;;  %4602 = vmatprep.subr.bf16.mxu1 %v10592_v33  ;;  %v10676_v32 = vld [vmem:[%s12541_s25 + $0xe0c] ss:$56 sps:$4 sm:$0xff]  }
 0x122   : > { %4684 = vmatprep.subr.bf16.mxu0 %v10595_v34  ;;  %v10679_v33 = vld [vmem:[%s12541_s25 + $0x714] ss:$56 sps:$4 sm:$0xff]   ;;  %v10674_v34 = vld [vmem:[%s12541_s25 + $0xe08] ss:$56 sps:$4 sm:$0xff]  }
 0x124   : > { %4603 = vmatpush1.bf16.msra.mxu1 %v10590_v35  ;;  %v10677_v35 = vld [vmem:[%s12541_s25 + $0x710] ss:$56 sps:$4 sm:$0xff]  }
 0x125   : > { %4685 = vmatpush1.bf16.msra.mxu0 %v10593_v36  ;;  %4604 = vmatprep.subr.bf16.mxu1 %v10598_v37  ;;  %v10682_v36 = vld [vmem:[%s12541_s25 + $0xe7c] ss:$56 sps:$4 sm:$0xff]  }
 0x126   : > { %4686 = vmatprep.subr.bf16.mxu0 %v10601_v38  ;;  %v10685_v37 = vld [vmem:[%s12541_s25 + $0x784] ss:$56 sps:$4 sm:$0xff]   ;;  %v10680_v38 = vld [vmem:[%s12541_s25 + $0xe78] ss:$56 sps:$4 sm:$0xff]  }
 0x128   : > { %4605 = vmatpush1.bf16.msra.mxu1 %v10596_v39  ;;  %v10683_v39 = vld [vmem:[%s12541_s25 + $0x780] ss:$56 sps:$4 sm:$0xff]  }
 0x129   : > { %4687 = vmatpush1.bf16.msra.mxu0 %v10599_v40  ;;  %4606 = vmatprep.subr.bf16.mxu1 %v10604_v41  ;;  %v10688_v40 = vld [vmem:[%s12541_s25 + $0xeec] ss:$56 sps:$4 sm:$0xff]  }
 0x12a   : > { %4688 = vmatprep.subr.bf16.mxu0 %v10607_v42  ;;  %v10691_v41 = vld [vmem:[%s12541_s25 + $0x7f4] ss:$56 sps:$4 sm:$0xff]   ;;  %v10686_v42 = vld [vmem:[%s12541_s25 + $0xee8] ss:$56 sps:$4 sm:$0xff]  }
 0x12c   : > { %4607 = vmatpush1.bf16.msra.mxu1 %v10602_v44  ;;  %v10689_v44 = vld [vmem:[%s12541_s25 + $0x7f0] ss:$56 sps:$4 sm:$0xff]  }
 0x12d   : > { %4689 = vmatpush1.bf16.msra.mxu0 %v10605_v45  ;;  %4608 = vmatprep.subr.bf16.mxu1 %v10610_v46  ;;  %v10694_v45 = vld [vmem:[%s12541_s25 + $0xf5c] ss:$56 sps:$4 sm:$0xff]  }
 0x12e   : > { %4690 = vmatprep.subr.bf16.mxu0 %v10613_v47  ;;  %v10697_v46 = vld [vmem:[%s12541_s25 + $0x864] ss:$56 sps:$4 sm:$0xff]   ;;  %v10692_v47 = vld [vmem:[%s12541_s25 + $0xf58] ss:$56 sps:$4 sm:$0xff]  }
 0x130   : > { %4609 = vmatpush1.bf16.msra.mxu1 %v10608_v48  ;;  %v10695_v48 = vld [vmem:[%s12541_s25 + $0x860] ss:$56 sps:$4 sm:$0xff]  }
 0x131   : > { %4691 = vmatpush1.bf16.msra.mxu0 %v10611_v49  ;;  %4610 = vmatprep.subr.bf16.mxu1 %v10616_v50  ;;  %v10700_v49 = vld [vmem:[%s12541_s25 + $0xfcc] ss:$56 sps:$4 sm:$0xff]  }
 0x132   : > { %4692 = vmatprep.subr.bf16.mxu0 %v10619_v51  ;;  %v10703_v50 = vld [vmem:[%s12541_s25 + $0x8d4] ss:$56 sps:$4 sm:$0xff]   ;;  %v10698_v51 = vld [vmem:[%s12541_s25 + $0xfc8] ss:$56 sps:$4 sm:$0xff]  }
 0x134   : > { %4611 = vmatpush1.bf16.msra.mxu1 %v10614_v52  ;;  %v10701_v52 = vld [vmem:[%s12541_s25 + $0x8d0] ss:$56 sps:$4 sm:$0xff]  }
 0x135   : > { %4693 = vmatpush1.bf16.msra.mxu0 %v10617_v53  ;;  %4612 = vmatprep.subr.bf16.mxu1 %v10622_v54  ;;  %v10706_v53 = vld [vmem:[%s12541_s25 + $0x103c] ss:$56 sps:$4 sm:$0xff]  }
 0x136   : > { %4694 = vmatprep.subr.bf16.mxu0 %v10625_v55  ;;  %v10709_v54 = vld [vmem:[%s12541_s25 + $0x944] ss:$56 sps:$4 sm:$0xff]   ;;  %v10704_v55 = vld [vmem:[%s12541_s25 + $0x1038] ss:$56 sps:$4 sm:$0xff]  }
 0x138   : > { %4613 = vmatpush1.bf16.msra.mxu1 %v10620_v56  ;;  %v10707_v56 = vld [vmem:[%s12541_s25 + $0x940] ss:$56 sps:$4 sm:$0xff]  }
 0x139   : > { %4695 = vmatpush1.bf16.msra.mxu0 %v10623_v57  ;;  %4614 = vmatprep.subr.bf16.mxu1 %v10628_v58  ;;  %v10712_v57 = vld [vmem:[%s12541_s25 + $0x10ac] ss:$56 sps:$4 sm:$0xff]  }
 0x13a   : > { %4696 = vmatprep.subr.bf16.mxu0 %v10631_v59  ;;  %v10715_v58 = vld [vmem:[%s12541_s25 + $0x9b4] ss:$56 sps:$4 sm:$0xff]   ;;  %v10710_v59 = vld [vmem:[%s12541_s25 + $0x10a8] ss:$56 sps:$4 sm:$0xff]  }
 0x13c   : > { %4615 = vmatpush1.bf16.msra.mxu1 %v10626_v60  ;;  %v10713_v60 = vld [vmem:[%s12541_s25 + $0x9b0] ss:$56 sps:$4 sm:$0xff]  }
 0x13d   : > { %4697 = vmatpush1.bf16.msra.mxu0 %v10629_v61  ;;  %4616 = vmatprep.subr.bf16.mxu1 %v10634_v0  ;;  %v10718_v61 = vld [vmem:[%s12541_s25 + $0x111c] ss:$56 sps:$4 sm:$0xff]  }
 0x13e   : > { %4698 = vmatprep.subr.bf16.mxu0 %v10637_v1  ;;  %v10721_v0 = vld [vmem:[%s12541_s25 + $0xa24] ss:$56 sps:$4 sm:$0xff]   ;;  %v10716_v1 = vld [vmem:[%s12541_s25 + $0x1118] ss:$56 sps:$4 sm:$0xff]  }
 0x140   : > { %4617 = vmatpush1.bf16.msra.mxu1 %v10632_v2  ;;  %v10719_v2 = vld [vmem:[%s12541_s25 + $0xa20] ss:$56 sps:$4 sm:$0xff]  }
 0x141   : > { %4699 = vmatpush1.bf16.msra.mxu0 %v10635_v4  ;;  %4618 = vmatprep.subr.bf16.mxu1 %v10640_v5  ;;  %v10724_v4 = vld [vmem:[%s12541_s25 + $0x118c] ss:$56 sps:$4 sm:$0xff]  }
 0x142   : > { %4700 = vmatprep.subr.bf16.mxu0 %v10643_v6  ;;  %v10727_v5 = vld [vmem:[%s12541_s25 + $0xa94] ss:$56 sps:$4 sm:$0xff]   ;;  %v10722_v6 = vld [vmem:[%s12541_s25 + $0x1188] ss:$56 sps:$4 sm:$0xff]  }
 0x144   : > { %4619 = vmatpush1.bf16.msra.mxu1 %v10638_v7  ;;  %v10725_v7 = vld [vmem:[%s12541_s25 + $0xa90] ss:$56 sps:$4 sm:$0xff]  }
 0x145   : > { %4701 = vmatpush1.bf16.msra.mxu0 %v10641_v8  ;;  %4620 = vmatprep.subr.bf16.mxu1 %v10646_v9  ;;  %v10730_v8 = vld [vmem:[%s12541_s25 + $0x11fc] ss:$56 sps:$4 sm:$0xff]  }
 0x146   : > { %4702 = vmatprep.subr.bf16.mxu0 %v10649_v10  ;;  %v10733_v9 = vld [vmem:[%s12541_s25 + $0xb04] ss:$56 sps:$4 sm:$0xff]   ;;  %v10728_v10 = vld [vmem:[%s12541_s25 + $0x11f8] ss:$56 sps:$4 sm:$0xff]  }
 0x148   : > { %4621 = vmatpush1.bf16.msra.mxu1 %v10644_v11  ;;  %v10731_v11 = vld [vmem:[%s12541_s25 + $0xb00] ss:$56 sps:$4 sm:$0xff]  }
 0x149   : > { %4703 = vmatpush1.bf16.msra.mxu0 %v10647_v12  ;;  %4622 = vmatprep.subr.bf16.mxu1 %v10652_v14  ;;  %v10736_v12 = vld [vmem:[%s12541_s25 + $0x126c] ss:$56 sps:$4 sm:$0xff]  }
 0x14a   : > { %4704 = vmatprep.subr.bf16.mxu0 %v10655_v15  ;;  %v10739_v14 = vld [vmem:[%s12541_s25 + $0xb74] ss:$56 sps:$4 sm:$0xff]   ;;  %v10734_v15 = vld [vmem:[%s12541_s25 + $0x1268] ss:$56 sps:$4 sm:$0xff]  }
 0x14c   : > { %4623 = vmatpush1.bf16.msra.mxu1 %v10650_v16  ;;  %v10737_v16 = vld [vmem:[%s12541_s25 + $0xb70] ss:$56 sps:$4 sm:$0xff]  }
 0x14d   : > { %4705 = vmatpush1.bf16.msra.mxu0 %v10653_v17  ;;  %4624 = vmatprep.subr.bf16.mxu1 %v10658_v18  ;;  %v10742_v17 = vld [vmem:[%s12541_s25 + $0x12dc] ss:$56 sps:$4 sm:$0xff]  }
 0x14e   : > { %4706 = vmatprep.subr.bf16.mxu0 %v10661_v20  ;;  %v10745_v18 = vld [vmem:[%s12541_s25 + $0xbe4] ss:$56 sps:$4 sm:$0xff]   ;;  %v10740_v20 = vld [vmem:[%s12541_s25 + $0x12d8] ss:$56 sps:$4 sm:$0xff]  }
 0x150   : > { %4625 = vmatpush1.bf16.msra.mxu1 %v10656_v21  ;;  %v10743_v21 = vld [vmem:[%s12541_s25 + $0xbe0] ss:$56 sps:$4 sm:$0xff]  }
 0x151   : > { %4707 = vmatpush1.bf16.msra.mxu0 %v10659_v22  ;;  %4626 = vmatprep.subr.bf16.mxu1 %v10664_v24  ;;  %v10748_v22 = vld [vmem:[%s12541_s25 + $0x134c] ss:$56 sps:$4 sm:$0xff]  }
 0x152   : > { %4708 = vmatprep.subr.bf16.mxu0 %v10667_v25  ;;  %v10751_v24 = vld [vmem:[%s12541_s25 + $0xc54] ss:$56 sps:$4 sm:$0xff]   ;;  %v10746_v25 = vld [vmem:[%s12541_s25 + $0x1348] ss:$56 sps:$4 sm:$0xff]  }
 0x154   : > { %4627 = vmatpush1.bf16.msra.mxu1 %v10662_v26  ;;  %v10749_v26 = vld [vmem:[%s12541_s25 + $0xc50] ss:$56 sps:$4 sm:$0xff]  }
 0x155   : > { %4709 = vmatpush1.bf16.msra.mxu0 %v10665_v27  ;;  %4628 = vmatprep.subr.bf16.mxu1 %v10670_v28  ;;  %v10754_v27 = vld [vmem:[%s12541_s25 + $0x13bc] ss:$56 sps:$4 sm:$0xff]  }
 0x156   : > { %4710 = vmatprep.subr.bf16.mxu0 %v10673_v29  ;;  %v10757_v28 = vld [vmem:[%s12541_s25 + $0xcc4] ss:$56 sps:$4 sm:$0xff]   ;;  %v10752_v29 = vld [vmem:[%s12541_s25 + $0x13b8] ss:$56 sps:$4 sm:$0xff]  }
 0x158   : > { %4629 = vmatpush1.bf16.msra.mxu1 %v10668_v30  ;;  %v10755_v30 = vld [vmem:[%s12541_s25 + $0xcc0] ss:$56 sps:$4 sm:$0xff]  }
 0x159   : > { %4711 = vmatpush1.bf16.msra.mxu0 %v10671_v31  ;;  %4639 = vmatprep.subr.bf16.mxu1 %v10676_v32  ;;  %v10760_v31 = vld [vmem:[%s12541_s25 + $0x142c] ss:$56 sps:$4 sm:$0xff]  }
 0x15a   : > { %4721 = vmatprep.subr.bf16.mxu0 %v10679_v33  ;;  %v10763_v32 = vld [vmem:[%s12541_s25 + $0xd34] ss:$56 sps:$4 sm:$0xff]   ;;  %v10758_v33 = vld [vmem:[%s12541_s25 + $0x1428] ss:$56 sps:$4 sm:$0xff]  }
 0x15b   : > { %4631 = vmatmul.mubr.bf16.vlgmr.msra.gmra.mrb[4].mxu1 %v12649_v19 }
 0x15c   : > { %4713 = vmatmul.mubr.bf16.vlgmr.msra.gmra.mrb[4].mxu0 %v12641_v13  ;;  %4640 = vmatpush1.bf16.msra.mxu1 %v10674_v34  ;;  %v10761_v34 = vld [vmem:[%s12541_s25 + $0xd30] ss:$56 sps:$4 sm:$0xff]  }
 0x15d   : > { %4722 = vmatpush1.bf16.msra.mxu0 %v10677_v35  ;;  %4641 = vmatprep.subr.bf16.mxu1 %v10682_v36  ;;  %v10766_v35 = vld [vmem:[%s12541_s25 + $0x149c] ss:$56 sps:$4 sm:$0xff]  }
 0x15e   : > { %4723 = vmatprep.subr.bf16.mxu0 %v10685_v37  ;;  %4671 = vmatprep.mubr.bf16.mxu1 %v12655_v23  ;;  %v10769_v36 = vld [vmem:[%s12541_s25 + $0xda4] ss:$56 sps:$4 sm:$0xff]   ;;  %v10764_v37 = vld [vmem:[%s12541_s25 + $0x1498] ss:$56 sps:$4 sm:$0xff]  }
 0x15f   : > { %4753 = vmatprep.mubr.bf16.mxu0 %v12627_v3 }
 0x160   : > { %4642 = vmatpush1.bf16.msra.mxu1 %v10680_v38  ;;  %v10767_v38 = vld [vmem:[%s12541_s25 + $0xda0] ss:$56 sps:$4 sm:$0xff]  }
 0x161   : > { %4724 = vmatpush1.bf16.msra.mxu0 %v10683_v39  ;;  %4643 = vmatprep.subr.bf16.mxu1 %v10688_v40  ;;  %v10772_v39 = vld [vmem:[%s12541_s25 + $0xe14] ss:$56 sps:$4 sm:$0xff]  }
 0x162   : > { %4725 = vmatprep.subr.bf16.mxu0 %v10691_v41  ;;  %v10775_v40 = vld [vmem:[%s12541_s25 + $0x1c] ss:$56 sps:$4 sm:$0xff]   ;;  %v10770_v41 = vld [vmem:[%s12541_s25 + $0xe10] ss:$56 sps:$4 sm:$0xff]  }
 0x164   : > { %4644 = vmatpush1.bf16.msra.mxu1 %v10686_v42  ;;  %v10773_v42 = vld [vmem:[%s12541_s25 + $0x18] ss:$56 sps:$4 sm:$0xff]  }
 0x165   : > { %4726 = vmatpush1.bf16.msra.mxu0 %v10689_v44  ;;  %4645 = vmatprep.subr.bf16.mxu1 %v10694_v45  ;;  %v10778_v44 = vld [vmem:[%s12541_s25 + $0xe84] ss:$56 sps:$4 sm:$0xff]  }
 0x166   : > { %4727 = vmatprep.subr.bf16.mxu0 %v10697_v46  ;;  %v10781_v45 = vld [vmem:[%s12541_s25 + $0x8c] ss:$56 sps:$4 sm:$0xff]   ;;  %v10776_v46 = vld [vmem:[%s12541_s25 + $0xe80] ss:$56 sps:$4 sm:$0xff]  }
 0x168   : > { %4646 = vmatpush1.bf16.msra.mxu1 %v10692_v47  ;;  %v10779_v47 = vld [vmem:[%s12541_s25 + $0x88] ss:$56 sps:$4 sm:$0xff]  }
 0x169   : > { %4728 = vmatpush1.bf16.msra.mxu0 %v10695_v48  ;;  %4647 = vmatprep.subr.bf16.mxu1 %v10700_v49  ;;  %v10784_v48 = vld [vmem:[%s12541_s25 + $0xef4] ss:$56 sps:$4 sm:$0xff]  }
 0x16a   : > { %4729 = vmatprep.subr.bf16.mxu0 %v10703_v50  ;;  %v10787_v49 = vld [vmem:[%s12541_s25 + $0xfc] ss:$56 sps:$4 sm:$0xff]   ;;  %v10782_v50 = vld [vmem:[%s12541_s25 + $0xef0] ss:$56 sps:$4 sm:$0xff]  }
 0x16c   : > { %4648 = vmatpush1.bf16.msra.mxu1 %v10698_v51  ;;  %v10785_v51 = vld [vmem:[%s12541_s25 + $0xf8] ss:$56 sps:$4 sm:$0xff]  }
 0x16d   : > { %4730 = vmatpush1.bf16.msra.mxu0 %v10701_v52  ;;  %4649 = vmatprep.subr.bf16.mxu1 %v10706_v53  ;;  %v10790_v52 = vld [vmem:[%s12541_s25 + $0xf64] ss:$56 sps:$4 sm:$0xff]  }
 0x16e   : > { %4731 = vmatprep.subr.bf16.mxu0 %v10709_v54  ;;  %v10793_v53 = vld [vmem:[%s12541_s25 + $0x16c] ss:$56 sps:$4 sm:$0xff]   ;;  %v10788_v54 = vld [vmem:[%s12541_s25 + $0xf60] ss:$56 sps:$4 sm:$0xff]  }
 0x170   : > { %4650 = vmatpush1.bf16.msra.mxu1 %v10704_v55  ;;  %v10791_v55 = vld [vmem:[%s12541_s25 + $0x168] ss:$56 sps:$4 sm:$0xff]  }
 0x171   : > { %4732 = vmatpush1.bf16.msra.mxu0 %v10707_v56  ;;  %4651 = vmatprep.subr.bf16.mxu1 %v10712_v57  ;;  %v10796_v56 = vld [vmem:[%s12541_s25 + $0xfd4] ss:$56 sps:$4 sm:$0xff]  }
 0x172   : > { %4733 = vmatprep.subr.bf16.mxu0 %v10715_v58  ;;  %v10799_v57 = vld [vmem:[%s12541_s25 + $0x1dc] ss:$56 sps:$4 sm:$0xff]   ;;  %v10794_v58 = vld [vmem:[%s12541_s25 + $0xfd0] ss:$56 sps:$4 sm:$0xff]  }
 0x174   : > { %4652 = vmatpush1.bf16.msra.mxu1 %v10710_v59  ;;  %v10797_v59 = vld [vmem:[%s12541_s25 + $0x1d8] ss:$56 sps:$4 sm:$0xff]  }
 0x175   : > { %4734 = vmatpush1.bf16.msra.mxu0 %v10713_v60  ;;  %4653 = vmatprep.subr.bf16.mxu1 %v10718_v61  ;;  %v10802_v60 = vld [vmem:[%s12541_s25 + $0x1044] ss:$56 sps:$4 sm:$0xff]  }
 0x176   : > { %4735 = vmatprep.subr.bf16.mxu0 %v10721_v0  ;;  %v10805_v61 = vld [vmem:[%s12541_s25 + $0x24c] ss:$56 sps:$4 sm:$0xff]   ;;  %v10800_v0 = vld [vmem:[%s12541_s25 + $0x1040] ss:$56 sps:$4 sm:$0xff]  }
 0x178   : > { %4654 = vmatpush1.bf16.msra.mxu1 %v10716_v1  ;;  %v10803_v1 = vld [vmem:[%s12541_s25 + $0x248] ss:$56 sps:$4 sm:$0xff]  }
 0x179   : > { %4736 = vmatpush1.bf16.msra.mxu0 %v10719_v2  ;;  %4655 = vmatprep.subr.bf16.mxu1 %v10724_v4  ;;  %v10808_v2 = vld [vmem:[%s12541_s25 + $0x10b4] ss:$56 sps:$4 sm:$0xff]  }
 0x17a   : > { %4737 = vmatprep.subr.bf16.mxu0 %v10727_v5  ;;  %v10811_v4 = vld [vmem:[%s12541_s25 + $0x2bc] ss:$56 sps:$4 sm:$0xff]  }
 0x17c   : > { %4656 = vmatpush1.bf16.msra.mxu1 %v10722_v6 }
 0x17d   : > { %4738 = vmatpush1.bf16.msra.mxu0 %v10725_v7  ;;  %4657 = vmatprep.subr.bf16.mxu1 %v10730_v8  ;;  %v10806_v7 = vld [vmem:[%s12541_s25 + $0x10b0] ss:$56 sps:$4 sm:$0xff]  }
 0x17e   : > { %4739 = vmatprep.subr.bf16.mxu0 %v10733_v9  ;;  %v10809_v8 = vld [vmem:[%s12541_s25 + $0x2b8] ss:$56 sps:$4 sm:$0xff]  }
 0x180   : > { %4658 = vmatpush1.bf16.msra.mxu1 %v10728_v10  ;;  %v10814_v10 = vld [vmem:[%s12541_s25 + $0x1124] ss:$56 sps:$4 sm:$0xff]  }
 0x181   : > { %4740 = vmatpush1.bf16.msra.mxu0 %v10731_v11  ;;  %4659 = vmatprep.subr.bf16.mxu1 %v10736_v12  ;;  %v10817_v11 = vld [vmem:[%s12541_s25 + $0x32c] ss:$56 sps:$4 sm:$0xff]  }
 0x182   : > { %4741 = vmatprep.subr.bf16.mxu0 %v10739_v14  ;;  %v10812_v14 = vld [vmem:[%s12541_s25 + $0x1120] ss:$56 sps:$4 sm:$0xff]  }
 0x184   : > { %4660 = vmatpush1.bf16.msra.mxu1 %v10734_v15  ;;  %v10815_v15 = vld [vmem:[%s12541_s25 + $0x328] ss:$56 sps:$4 sm:$0xff]  }
 0x185   : > { %4742 = vmatpush1.bf16.msra.mxu0 %v10737_v16  ;;  %4661 = vmatprep.subr.bf16.mxu1 %v10742_v17  ;;  %v10820_v16 = vld [vmem:[%s12541_s25 + $0x1194] ss:$56 sps:$4 sm:$0xff]  }
 0x186   : > { %4743 = vmatprep.subr.bf16.mxu0 %v10745_v18  ;;  %v10823_v17 = vld [vmem:[%s12541_s25 + $0x39c] ss:$56 sps:$4 sm:$0xff]   ;;  %v10818_v18 = vld [vmem:[%s12541_s25 + $0x1190] ss:$56 sps:$4 sm:$0xff]  }
 0x188   : > { %4662 = vmatpush1.bf16.msra.mxu1 %v10740_v20  ;;  %v10821_v20 = vld [vmem:[%s12541_s25 + $0x398] ss:$56 sps:$4 sm:$0xff]  }
 0x189   : > { %4744 = vmatpush1.bf16.msra.mxu0 %v10743_v21  ;;  %4663 = vmatprep.subr.bf16.mxu1 %v10748_v22  ;;  %v10826_v21 = vld [vmem:[%s12541_s25 + $0x1204] ss:$56 sps:$4 sm:$0xff]  }
 0x18a   : > { %4745 = vmatprep.subr.bf16.mxu0 %v10751_v24  ;;  %v10829_v22 = vld [vmem:[%s12541_s25 + $0x40c] ss:$56 sps:$4 sm:$0xff]   ;;  %v10824_v24 = vld [vmem:[%s12541_s25 + $0x1200] ss:$56 sps:$4 sm:$0xff]  }
 0x18c   : > { %4664 = vmatpush1.bf16.msra.mxu1 %v10746_v25  ;;  %v10827_v25 = vld [vmem:[%s12541_s25 + $0x408] ss:$56 sps:$4 sm:$0xff]  }
 0x18d   : > { %4746 = vmatpush1.bf16.msra.mxu0 %v10749_v26  ;;  %4665 = vmatprep.subr.bf16.mxu1 %v10754_v27  ;;  %v10832_v26 = vld [vmem:[%s12541_s25 + $0x1274] ss:$56 sps:$4 sm:$0xff]  }
 0x18e   : > { %4747 = vmatprep.subr.bf16.mxu0 %v10757_v28  ;;  %v10835_v27 = vld [vmem:[%s12541_s25 + $0x47c] ss:$56 sps:$4 sm:$0xff]   ;;  %v10830_v28 = vld [vmem:[%s12541_s25 + $0x1270] ss:$56 sps:$4 sm:$0xff]  }
 0x190   : > { %4666 = vmatpush1.bf16.msra.mxu1 %v10752_v29  ;;  %v10833_v29 = vld [vmem:[%s12541_s25 + $0x478] ss:$56 sps:$4 sm:$0xff]  }
 0x191   : > { %4748 = vmatpush1.bf16.msra.mxu0 %v10755_v30  ;;  %4667 = vmatprep.subr.bf16.mxu1 %v10760_v31  ;;  %v10838_v30 = vld [vmem:[%s12541_s25 + $0x12e4] ss:$56 sps:$4 sm:$0xff]  }
 0x192   : > { %4749 = vmatprep.subr.bf16.mxu0 %v10763_v32  ;;  %v10841_v31 = vld [vmem:[%s12541_s25 + $0x4ec] ss:$56 sps:$4 sm:$0xff]   ;;  %v10836_v32 = vld [vmem:[%s12541_s25 + $0x12e0] ss:$56 sps:$4 sm:$0xff]  }
 0x194   : > { %4668 = vmatpush1.bf16.msra.mxu1 %v10758_v33  ;;  %v10839_v33 = vld [vmem:[%s12541_s25 + $0x4e8] ss:$56 sps:$4 sm:$0xff]  }
 0x195   : > { %4750 = vmatpush1.bf16.msra.mxu0 %v10761_v34  ;;  %4669 = vmatprep.subr.bf16.mxu1 %v10766_v35  ;;  %v10844_v34 = vld [vmem:[%s12541_s25 + $0x1354] ss:$56 sps:$4 sm:$0xff]  }
 0x196   : > { %4751 = vmatprep.subr.bf16.mxu0 %v10769_v36  ;;  %v10847_v35 = vld [vmem:[%s12541_s25 + $0x55c] ss:$56 sps:$4 sm:$0xff]   ;;  %v10842_v36 = vld [vmem:[%s12541_s25 + $0x1350] ss:$56 sps:$4 sm:$0xff]  }
 0x198   : > { %4670 = vmatpush1.bf16.msra.mxu1 %v10764_v37  ;;  %v10845_v37 = vld [vmem:[%s12541_s25 + $0x558] ss:$56 sps:$4 sm:$0xff]  }
 0x199   : > { %4752 = vmatpush1.bf16.msra.mxu0 %v10767_v38  ;;  %4803 = vmatprep.subr.bf16.mxu1 %v10775_v40  ;;  %v10850_v38 = vld [vmem:[%s12541_s25 + $0x13c4] ss:$56 sps:$4 sm:$0xff]   ;;  %v10848_v40 = vld [vmem:[%s12541_s25 + $0x13c0] ss:$56 sps:$4 sm:$0xff]  }
 0x19a   : > { %4762 = vmatprep.subr.bf16.mxu0 %v10772_v39  ;;  %v10853_v39 = vld [vmem:[%s12541_s25 + $0x5cc] ss:$56 sps:$4 sm:$0xff]  }
 0x19b   : > { %4672 = vmatmul.mubr.bf16.vlgmr.msra.gmra.mrb[4].mxu1 %v12620_v63 }
 0x19c   : > { %4754 = vmatmul.mubr.bf16.vlgmr.msra.gmra.mrb[4].mxu0 %v12649_v19  ;;  %4804 = vmatpush1.bf16.msra.mxu1 %v10773_v42  ;;  %v10856_v42 = vld [vmem:[%s12541_s25 + $0x1434] ss:$56 sps:$4 sm:$0xff]  }
 0x19d   : > { %4763 = vmatpush1.bf16.msra.mxu0 %v10770_v41  ;;  %4805 = vmatprep.subr.bf16.mxu1 %v10781_v45  ;;  %v10851_v41 = vld [vmem:[%s12541_s25 + $0x5c8] ss:$56 sps:$4 sm:$0xff]  }
 0x19e   : > { %4764 = vmatprep.subr.bf16.mxu0 %v10778_v44  ;;  %4794 = vmatprep.mubr.bf16.mxu0 %v12655_v23  ;;  %v10859_v44 = vld [vmem:[%s12541_s25 + $0x63c] ss:$56 sps:$4 sm:$0xff]   ;;  %v10854_v45 = vld [vmem:[%s12541_s25 + $0x1430] ss:$56 sps:$4 sm:$0xff]  }
 0x19f   : > { %4835 = vmatprep.mubr.bf16.mxu1 %v12617_v62 }
 0x1a0   : > { %4806 = vmatpush1.bf16.msra.mxu1 %v10779_v47  ;;  %v10862_v47 = vld [vmem:[%s12541_s25 + $0x14a4] ss:$56 sps:$4 sm:$0xff]  }
 0x1a1   : > { %4765 = vmatpush1.bf16.msra.mxu0 %v10776_v46  ;;  %4807 = vmatprep.subr.bf16.mxu1 %v10787_v49  ;;  %v10857_v46 = vld [vmem:[%s12541_s25 + $0x638] ss:$56 sps:$4 sm:$0xff]  }
 0x1a2   : > { %4766 = vmatprep.subr.bf16.mxu0 %v10784_v48  ;;  %v10865_v48 = vld [vmem:[%s12541_s25 + $0x6ac] ss:$56 sps:$4 sm:$0xff]   ;;  %v10860_v49 = vld [vmem:[%s12541_s25 + $0x14a0] ss:$56 sps:$4 sm:$0xff]  }
 0x1a4   : > { %4808 = vmatpush1.bf16.msra.mxu1 %v10785_v51  ;;  %v10868_v51 = vld [vmem:[%s12541_s25 + $0x71c] ss:$56 sps:$4 sm:$0xff]  }
 0x1a5   : > { %4767 = vmatpush1.bf16.msra.mxu0 %v10782_v50  ;;  %4809 = vmatprep.subr.bf16.mxu1 %v10793_v53  ;;  %v10863_v50 = vld [vmem:[%s12541_s25 + $0x6a8] ss:$56 sps:$4 sm:$0xff]   ;;  %v10866_v53 = vld [vmem:[%s12541_s25 + $0x718] ss:$56 sps:$4 sm:$0xff]  }
 0x1a6   : > { %4768 = vmatprep.subr.bf16.mxu0 %v10790_v52  ;;  %v10871_v52 = vld [vmem:[%s12541_s25 + $0x24] ss:$56 sps:$4 sm:$0xff]  }
 0x1a8   : > { %4810 = vmatpush1.bf16.msra.mxu1 %v10791_v55  ;;  %v10874_v55 = vld [vmem:[%s12541_s25 + $0x78c] ss:$56 sps:$4 sm:$0xff]  }
 0x1a9   : > { %4769 = vmatpush1.bf16.msra.mxu0 %v10788_v54  ;;  %4811 = vmatprep.subr.bf16.mxu1 %v10799_v57  ;;  %v10869_v54 = vld [vmem:[%s12541_s25 + $0x20] ss:$56 sps:$4 sm:$0xff]  }
 0x1aa   : > { %4770 = vmatprep.subr.bf16.mxu0 %v10796_v56  ;;  %v10877_v56 = vld [vmem:[%s12541_s25 + $0x94] ss:$56 sps:$4 sm:$0xff]   ;;  %v10872_v57 = vld [vmem:[%s12541_s25 + $0x788] ss:$56 sps:$4 sm:$0xff]  }
 0x1ac   : > { %4812 = vmatpush1.bf16.msra.mxu1 %v10797_v59  ;;  %v10880_v59 = vld [vmem:[%s12541_s25 + $0x7fc] ss:$56 sps:$4 sm:$0xff]  }
 0x1ad   : > { %4771 = vmatpush1.bf16.msra.mxu0 %v10794_v58  ;;  %4813 = vmatprep.subr.bf16.mxu1 %v10805_v61  ;;  %v10875_v58 = vld [vmem:[%s12541_s25 + $0x90] ss:$56 sps:$4 sm:$0xff]  }
 0x1ae   : > { %4772 = vmatprep.subr.bf16.mxu0 %v10802_v60  ;;  %v12885_v5 = vpop.f32.mrb[0].mxu1  ;;  %v10883_v60 = vld [vmem:[%s12541_s25 + $0x104] ss:$56 sps:$4 sm:$0xff]   ;;  %v10878_v61 = vld [vmem:[%s12541_s25 + $0x7f8] ss:$56 sps:$4 sm:$0xff]  }
 0x1af   : > { %v12887_v6 = vpop.f32.mrb[1].mxu1 }
 0x1b0   : > { %4814 = vmatpush1.bf16.msra.mxu1 %v10803_v1  ;;  %v4472_v9 = vpop.f32.mrb[2].mxu1  ;;  %v10886_v1 = vld [vmem:[%s12541_s25 + $0x86c] ss:$56 sps:$4 sm:$0xff]  }
 0x1b1   : > { %4773 = vmatpush1.bf16.msra.mxu0 %v10800_v0  ;;  %4815 = vmatprep.subr.bf16.mxu1 %v10811_v4  ;;  %v4473_v12 = vpop.f32.mrb[3].mxu1  ;;  %v10881_v0 = vld [vmem:[%s12541_s25 + $0x100] ss:$56 sps:$4 sm:$0xff]   ;;  %v10895_v9 = vld [vmem:[%s12541_s25 + $0x1e4] ss:$56 sps:$4 sm:$0xff]  }
 0x1b2   : > { %4774 = vmatprep.subr.bf16.mxu0 %v10808_v2  ;;  %v10889_v2 = vld [vmem:[%s12541_s25 + $0x174] ss:$56 sps:$4 sm:$0xff]   ;;  %v10884_v4 = vld [vmem:[%s12541_s25 + $0x868] ss:$56 sps:$4 sm:$0xff]  }
 0x1b3   : > { %v10898_v12 = vld [vmem:[%s12541_s25 + $0x94c] ss:$56 sps:$4 sm:$0xff]  }
 0x1b4   : > { %4816 = vmatpush1.bf16.msra.mxu1 %v10809_v8  ;;  %v10892_v8 = vld [vmem:[%s12541_s25 + $0x8dc] ss:$56 sps:$4 sm:$0xff]  }
 0x1b5   : > { %4775 = vmatpush1.bf16.msra.mxu0 %v10806_v7  ;;  %4817 = vmatprep.subr.bf16.mxu1 %v10817_v11  ;;  %v10887_v7 = vld [vmem:[%s12541_s25 + $0x170] ss:$56 sps:$4 sm:$0xff]   ;;  %v10893_v11 = vld [vmem:[%s12541_s25 + $0x1e0] ss:$56 sps:$4 sm:$0xff]  }
 0x1b6   : > { %4776 = vmatprep.subr.bf16.mxu0 %v10814_v10  ;;  %v10890_v10 = vld [vmem:[%s12541_s25 + $0x8d8] ss:$56 sps:$4 sm:$0xff]  }
 0x1b8   : > { %4818 = vmatpush1.bf16.msra.mxu1 %v10815_v15  ;;  %v10896_v15 = vld [vmem:[%s12541_s25 + $0x948] ss:$56 sps:$4 sm:$0xff]  }
 0x1b9   : > { %4777 = vmatpush1.bf16.msra.mxu0 %v10812_v14  ;;  %4819 = vmatprep.subr.bf16.mxu1 %v10823_v17  ;;  %v10901_v14 = vld [vmem:[%s12541_s25 + $0x254] ss:$56 sps:$4 sm:$0xff]  }
 0x1ba   : > { %4778 = vmatprep.subr.bf16.mxu0 %v10820_v16  ;;  %v10899_v16 = vld [vmem:[%s12541_s25 + $0x250] ss:$56 sps:$4 sm:$0xff]   ;;  %v10904_v17 = vld [vmem:[%s12541_s25 + $0x9bc] ss:$56 sps:$4 sm:$0xff]  }
 0x1bc   : > { %4820 = vmatpush1.bf16.msra.mxu1 %v10821_v20 }
 0x1bd   : > { %4779 = vmatpush1.bf16.msra.mxu0 %v10818_v18  ;;  %4821 = vmatprep.subr.bf16.mxu1 %v10829_v22  ;;  %v10907_v18 = vld [vmem:[%s12541_s25 + $0x2c4] ss:$56 sps:$4 sm:$0xff]   ;;  %v10905_v22 = vld [vmem:[%s12541_s25 + $0x2c0] ss:$56 sps:$4 sm:$0xff]  }
 0x1be   : > { %4780 = vmatprep.subr.bf16.mxu0 %v10826_v21  ;;  %v10902_v21 = vld [vmem:[%s12541_s25 + $0x9b8] ss:$56 sps:$4 sm:$0xff]  }
 0x1c0   : > { %4822 = vmatpush1.bf16.msra.mxu1 %v10827_v25 }
 0x1c1   : > { %4781 = vmatpush1.bf16.msra.mxu0 %v10824_v24  ;;  %4823 = vmatprep.subr.bf16.mxu1 %v10835_v27 }
 0x1c2   : > { %4782 = vmatprep.subr.bf16.mxu0 %v10832_v26  ;;  %v12286_v26 = vmov 0.0  }
 0x1c3   : > { %342 = vst [vmem:[#allocation2 + $0x18] sm:$0xf] %v12286_v26  ;;  %v10983_v26 = vld [vmem:[%s12541_s25 + $0x870] ss:$56 sps:$4 sm:$0xff]  }
 0x1c4   : > { %4824 = vmatpush1.bf16.msra.mxu1 %v10833_v29 }
 0x1c5   : > { %4783 = vmatpush1.bf16.msra.mxu0 %v10830_v28  ;;  %4825 = vmatprep.subr.bf16.mxu1 %v10841_v31  ;;  %v10913_v31 = vld [vmem:[%s12541_s25 + $0x334] ss:$56 sps:$4 sm:$0xff]  }
 0x1c6   : > { %4784 = vmatprep.subr.bf16.mxu0 %v10838_v30  ;;  %v10910_v30 = vld [vmem:[%s12541_s25 + $0xa2c] ss:$56 sps:$4 sm:$0xff]  }
 0x1c8   : > { %4826 = vmatpush1.bf16.msra.mxu1 %v10839_v33  ;;  %v10916_v33 = vld [vmem:[%s12541_s25 + $0xa9c] ss:$56 sps:$4 sm:$0xff]  }
 0x1c9   : > { %4785 = vmatpush1.bf16.msra.mxu0 %v10836_v32  ;;  %4827 = vmatprep.subr.bf16.mxu1 %v10847_v35  ;;  %v10908_v32 = vld [vmem:[%s12541_s25 + $0xa28] ss:$56 sps:$4 sm:$0xff]   ;;  %v10914_v35 = vld [vmem:[%s12541_s25 + $0xa98] ss:$56 sps:$4 sm:$0xff]  }
 0x1ca   : > { %4786 = vmatprep.subr.bf16.mxu0 %v10844_v34  ;;  %v10919_v34 = vld [vmem:[%s12541_s25 + $0x3a4] ss:$56 sps:$4 sm:$0xff]  }
 0x1cc   : > { %4828 = vmatpush1.bf16.msra.mxu1 %v10845_v37  ;;  %v10922_v37 = vld [vmem:[%s12541_s25 + $0xb0c] ss:$56 sps:$4 sm:$0xff]  }
 0x1cd   : > { %4787 = vmatpush1.bf16.msra.mxu0 %v10842_v36  ;;  %4829 = vmatprep.subr.bf16.mxu1 %v10853_v39  ;;  %v10917_v36 = vld [vmem:[%s12541_s25 + $0x3a0] ss:$56 sps:$4 sm:$0xff]  }
 0x1ce   : > { %4788 = vmatprep.subr.bf16.mxu0 %v10850_v38  ;;  %v10925_v38 = vld [vmem:[%s12541_s25 + $0x414] ss:$56 sps:$4 sm:$0xff]   ;;  %v10920_v39 = vld [vmem:[%s12541_s25 + $0xb08] ss:$56 sps:$4 sm:$0xff]  }
 0x1d0   : > { %4830 = vmatpush1.bf16.msra.mxu1 %v10851_v41  ;;  %v10928_v41 = vld [vmem:[%s12541_s25 + $0xb7c] ss:$56 sps:$4 sm:$0xff]  }
 0x1d1   : > { %4789 = vmatpush1.bf16.msra.mxu0 %v10848_v40  ;;  %4831 = vmatprep.subr.bf16.mxu1 %v10859_v44  ;;  %v10923_v40 = vld [vmem:[%s12541_s25 + $0x410] ss:$56 sps:$4 sm:$0xff]  }
 0x1d2   : > { %4790 = vmatprep.subr.bf16.mxu0 %v10856_v42  ;;  %v10931_v42 = vld [vmem:[%s12541_s25 + $0x484] ss:$56 sps:$4 sm:$0xff]   ;;  %v10926_v44 = vld [vmem:[%s12541_s25 + $0xb78] ss:$56 sps:$4 sm:$0xff]  }
 0x1d4   : > { %4832 = vmatpush1.bf16.msra.mxu1 %v10857_v46  ;;  %v10934_v46 = vld [vmem:[%s12541_s25 + $0xbec] ss:$56 sps:$4 sm:$0xff]  }
 0x1d5   : > { %4791 = vmatpush1.bf16.msra.mxu0 %v10854_v45  ;;  %4833 = vmatprep.subr.bf16.mxu1 %v10865_v48  ;;  %v10929_v45 = vld [vmem:[%s12541_s25 + $0x480] ss:$56 sps:$4 sm:$0xff]  }
 0x1d6   : > { %4792 = vmatprep.subr.bf16.mxu0 %v10862_v47  ;;  %v10937_v47 = vld [vmem:[%s12541_s25 + $0x4f4] ss:$56 sps:$4 sm:$0xff]   ;;  %v10932_v48 = vld [vmem:[%s12541_s25 + $0xbe8] ss:$56 sps:$4 sm:$0xff]  }
 0x1d8   : > { %4834 = vmatpush1.bf16.msra.mxu1 %v10863_v50  ;;  %v10940_v50 = vld [vmem:[%s12541_s25 + $0xc5c] ss:$56 sps:$4 sm:$0xff]  }
 0x1d9   : > { %4793 = vmatpush1.bf16.msra.mxu0 %v10860_v49  ;;  %4844 = vmatprep.subr.bf16.mxu1 %v10868_v51  ;;  %v10935_v49 = vld [vmem:[%s12541_s25 + $0x4f0] ss:$56 sps:$4 sm:$0xff]   ;;  %v10943_v51 = vld [vmem:[%s12541_s25 + $0x564] ss:$56 sps:$4 sm:$0xff]  }
 0x1da   : > { %4926 = vmatprep.subr.bf16.mxu0 %v10871_v52  ;;  %v10938_v52 = vld [vmem:[%s12541_s25 + $0xc58] ss:$56 sps:$4 sm:$0xff]  }
 0x1db   : > { %4836 = vmatmul.mubr.bf16.vlgmr.msra.gmra.mrb[8].mxu1 %v12641_v13 }
 0x1dc   : > { %4795 = vmatmul.mubr.bf16.vlgmr.msra.gmra.mrb[4].mxu0 %v12620_v63  ;;  %4845 = vmatpush1.bf16.msra.mxu1 %v10866_v53  ;;  %v10941_v53 = vld [vmem:[%s12541_s25 + $0x560] ss:$56 sps:$4 sm:$0xff]  }
 0x1dd   : > { %4927 = vmatpush1.bf16.msra.mxu0 %v10869_v54  ;;  %4846 = vmatprep.subr.bf16.mxu1 %v10874_v55  ;;  %v10946_v54 = vld [vmem:[%s12541_s25 + $0xccc] ss:$56 sps:$4 sm:$0xff]  }
 0x1de   : > { %4928 = vmatprep.subr.bf16.mxu0 %v10877_v56  ;;  %4876 = vmatprep.mubr.bf16.mxu1 %v12627_v3  ;;  %v10949_v55 = vld [vmem:[%s12541_s25 + $0x5d4] ss:$56 sps:$4 sm:$0xff]   ;;  %v10944_v56 = vld [vmem:[%s12541_s25 + $0xcc8] ss:$56 sps:$4 sm:$0xff]  }
 0x1df   : > { %4958 = vmatprep.mubr.bf16.mxu0 %v12617_v62 }
 0x1e0   : > { %4847 = vmatpush1.bf16.msra.mxu1 %v10872_v57  ;;  %v10947_v57 = vld [vmem:[%s12541_s25 + $0x5d0] ss:$56 sps:$4 sm:$0xff]  }
 0x1e1   : > { %4929 = vmatpush1.bf16.msra.mxu0 %v10875_v58  ;;  %4848 = vmatprep.subr.bf16.mxu1 %v10880_v59  ;;  %v10952_v58 = vld [vmem:[%s12541_s25 + $0xd3c] ss:$56 sps:$4 sm:$0xff]  }
 0x1e2   : > { %4930 = vmatprep.subr.bf16.mxu0 %v10883_v60  ;;  %v10955_v59 = vld [vmem:[%s12541_s25 + $0x644] ss:$56 sps:$4 sm:$0xff]   ;;  %v10950_v60 = vld [vmem:[%s12541_s25 + $0xd38] ss:$56 sps:$4 sm:$0xff]  }
 0x1e4   : > { %4849 = vmatpush1.bf16.msra.mxu1 %v10878_v61  ;;  %v10953_v61 = vld [vmem:[%s12541_s25 + $0x640] ss:$56 sps:$4 sm:$0xff]  }
 0x1e5   : > { %4931 = vmatpush1.bf16.msra.mxu0 %v10881_v0  ;;  %4850 = vmatprep.subr.bf16.mxu1 %v10886_v1  ;;  %v10958_v0 = vld [vmem:[%s12541_s25 + $0xdac] ss:$56 sps:$4 sm:$0xff]  }
 0x1e6   : > { %4932 = vmatprep.subr.bf16.mxu0 %v10889_v2  ;;  %v10961_v1 = vld [vmem:[%s12541_s25 + $0x6b4] ss:$56 sps:$4 sm:$0xff]   ;;  %v10956_v2 = vld [vmem:[%s12541_s25 + $0xda8] ss:$56 sps:$4 sm:$0xff]  }
 0x1e8   : > { %4851 = vmatpush1.bf16.msra.mxu1 %v10884_v4  ;;  %v10959_v4 = vld [vmem:[%s12541_s25 + $0x6b0] ss:$56 sps:$4 sm:$0xff]  }
 0x1e9   : > { %4933 = vmatpush1.bf16.msra.mxu0 %v10887_v7  ;;  %4852 = vmatprep.subr.bf16.mxu1 %v10892_v8  ;;  %v10964_v7 = vld [vmem:[%s12541_s25 + $0xe1c] ss:$56 sps:$4 sm:$0xff]  }
 0x1ea   : > { %4934 = vmatprep.subr.bf16.mxu0 %v10895_v9  ;;  %v10967_v8 = vld [vmem:[%s12541_s25 + $0x724] ss:$56 sps:$4 sm:$0xff]   ;;  %v10962_v9 = vld [vmem:[%s12541_s25 + $0xe18] ss:$56 sps:$4 sm:$0xff]  }
 0x1ec   : > { %4853 = vmatpush1.bf16.msra.mxu1 %v10890_v10  ;;  %v10965_v10 = vld [vmem:[%s12541_s25 + $0x720] ss:$56 sps:$4 sm:$0xff]  }
 0x1ed   : > { %4935 = vmatpush1.bf16.msra.mxu0 %v10893_v11  ;;  %4854 = vmatprep.subr.bf16.mxu1 %v10898_v12  ;;  %v10970_v11 = vld [vmem:[%s12541_s25 + $0xe8c] ss:$56 sps:$4 sm:$0xff]  }
 0x1ee   : > { %4936 = vmatprep.subr.bf16.mxu0 %v10901_v14  ;;  %v10973_v12 = vld [vmem:[%s12541_s25 + $0x794] ss:$56 sps:$4 sm:$0xff]   ;;  %v10968_v14 = vld [vmem:[%s12541_s25 + $0xe88] ss:$56 sps:$4 sm:$0xff]  }
 0x1ef   : > { %v4550_v20 = vpop.f32.mrb[0].mxu0 }
 0x1f0   : > { %v12960_v24 = vadd.f32 %v4550_v20, %v12885_v5  ;;  %v4552_v25 = vpop.f32.mrb[1].mxu0  ;;  %4855 = vmatpush1.bf16.msra.mxu1 %v10896_v15  ;;  %v10971_v15 = vld [vmem:[%s12541_s25 + $0x790] ss:$56 sps:$4 sm:$0xff]   ;;  %v10977_v20 = vld [vmem:[%s12541_s25 + $0x800] ss:$56 sps:$4 sm:$0xff]  }
 0x1f1   : > { %v12963_v27 = vadd.f32 %v4552_v25, %v12887_v6  ;;  %v4554_v28 = vpop.f32.mrb[2].mxu0  ;;  %4937 = vmatpush1.bf16.msra.mxu0 %v10899_v16  ;;  %4856 = vmatprep.subr.bf16.mxu1 %v10904_v17  ;;  %v10911_v6 = vld [vmem:[%s12541_s25 + $0x330] ss:$56 sps:$4 sm:$0xff]   ;;  %v10976_v16 = vld [vmem:[%s12541_s25 + $0xefc] ss:$56 sps:$4 sm:$0xff]  }
 0x1f2   : > { %v4555_v29 = vpop.f32.mrb[3].mxu0  ;;  %4938 = vmatprep.subr.bf16.mxu0 %v10907_v18  ;;  %v10979_v17 = vld [vmem:[%s12541_s25 + $0x804] ss:$56 sps:$4 sm:$0xff]   ;;  %v10974_v18 = vld [vmem:[%s12541_s25 + $0xef8] ss:$56 sps:$4 sm:$0xff]  }
 0x1f3   : > { %v5309_v5 = vcombine.low %v12960_v24, %v12963_v27  ;;  %v10980_v25 = vld [vmem:[%s12541_s25 + $0xf68] ss:$56 sps:$4 sm:$0xff]   ;;  %v10988_v28 = vld [vmem:[%s12541_s25 + $0xfdc] ss:$56 sps:$4 sm:$0xff]  }
 0x1f4   : > { %4857 = vmatpush1.bf16.msra.mxu1 %v10902_v21  ;;  %v10982_v21 = vld [vmem:[%s12541_s25 + $0xf6c] ss:$56 sps:$4 sm:$0xff]   ;;  %v11106_v24 = vld [vmem:[%s12541_s25 + $0x11a0] ss:$56 sps:$4 sm:$0xff]  }
 0x1f5   : > { %4939 = vmatpush1.bf16.msra.mxu0 %v10905_v22  ;;  %4858 = vmatprep.subr.bf16.mxu1 %v10910_v30  ;;  %v10985_v22 = vld [vmem:[%s12541_s25 + $0x874] ss:$56 sps:$4 sm:$0xff]   ;;  %v10991_v29 = vld [vmem:[%s12541_s25 + $0x8e4] ss:$56 sps:$4 sm:$0xff]   ;;  %v10986_v30 = vld [vmem:[%s12541_s25 + $0xfd8] ss:$56 sps:$4 sm:$0xff]  }
 0x1f6   : > { %4940 = vmatprep.subr.bf16.mxu0 %v10913_v31  ;;  %v10989_v31 = vld [vmem:[%s12541_s25 + $0x8e0] ss:$56 sps:$4 sm:$0xff]  }
 0x1f7   : > { %v11109_v27 = vld [vmem:[%s12541_s25 + $0x3a8] ss:$56 sps:$4 sm:$0xff]  }
 0x1f8   : > { %4859 = vmatpush1.bf16.msra.mxu1 %v10908_v32  ;;  %v10994_v32 = vld [vmem:[%s12541_s25 + $0x104c] ss:$56 sps:$4 sm:$0xff]  }
 0x1f9   : > { %4941 = vmatpush1.bf16.msra.mxu0 %v10911_v6  ;;  %4860 = vmatprep.subr.bf16.mxu1 %v10916_v33  ;;  %v10997_v6 = vld [vmem:[%s12541_s25 + $0x954] ss:$56 sps:$4 sm:$0xff]   ;;  %v10992_v33 = vld [vmem:[%s12541_s25 + $0x1048] ss:$56 sps:$4 sm:$0xff]  }
 0x1fa   : > { %4942 = vmatprep.subr.bf16.mxu0 %v10919_v34  ;;  %v10995_v34 = vld [vmem:[%s12541_s25 + $0x950] ss:$56 sps:$4 sm:$0xff]  }
 0x1fc   : > { %4861 = vmatpush1.bf16.msra.mxu1 %v10914_v35  ;;  %v11000_v35 = vld [vmem:[%s12541_s25 + $0x10bc] ss:$56 sps:$4 sm:$0xff]  }
 0x1fd   : > { %4943 = vmatpush1.bf16.msra.mxu0 %v10917_v36  ;;  %4862 = vmatprep.subr.bf16.mxu1 %v10922_v37  ;;  %v11003_v36 = vld [vmem:[%s12541_s25 + $0x9c4] ss:$56 sps:$4 sm:$0xff]   ;;  %v10998_v37 = vld [vmem:[%s12541_s25 + $0x10b8] ss:$56 sps:$4 sm:$0xff]  }
 0x1fe   : > { %4944 = vmatprep.subr.bf16.mxu0 %v10925_v38  ;;  %v11001_v38 = vld [vmem:[%s12541_s25 + $0x9c0] ss:$56 sps:$4 sm:$0xff]  }
 0x200   : > { %4863 = vmatpush1.bf16.msra.mxu1 %v10920_v39  ;;  %v11006_v39 = vld [vmem:[%s12541_s25 + $0x112c] ss:$56 sps:$4 sm:$0xff]  }
 0x201   : > { %4945 = vmatpush1.bf16.msra.mxu0 %v10923_v40  ;;  %4864 = vmatprep.subr.bf16.mxu1 %v10928_v41  ;;  %v11009_v40 = vld [vmem:[%s12541_s25 + $0xa34] ss:$56 sps:$4 sm:$0xff]   ;;  %v11004_v41 = vld [vmem:[%s12541_s25 + $0x1128] ss:$56 sps:$4 sm:$0xff]  }
 0x202   : > { %4946 = vmatprep.subr.bf16.mxu0 %v10931_v42  ;;  %v11007_v42 = vld [vmem:[%s12541_s25 + $0xa30] ss:$56 sps:$4 sm:$0xff]  }
 0x204   : > { %4865 = vmatpush1.bf16.msra.mxu1 %v10926_v44  ;;  %v11012_v44 = vld [vmem:[%s12541_s25 + $0x119c] ss:$56 sps:$4 sm:$0xff]  }
 0x205   : > { %4947 = vmatpush1.bf16.msra.mxu0 %v10929_v45  ;;  %4866 = vmatprep.subr.bf16.mxu1 %v10934_v46  ;;  %v11015_v45 = vld [vmem:[%s12541_s25 + $0xaa4] ss:$56 sps:$4 sm:$0xff]   ;;  %v11010_v46 = vld [vmem:[%s12541_s25 + $0x1198] ss:$56 sps:$4 sm:$0xff]  }
 0x206   : > { %4948 = vmatprep.subr.bf16.mxu0 %v10937_v47  ;;  %v11013_v47 = vld [vmem:[%s12541_s25 + $0xaa0] ss:$56 sps:$4 sm:$0xff]  }
 0x208   : > { %4867 = vmatpush1.bf16.msra.mxu1 %v10932_v48  ;;  %v11018_v48 = vld [vmem:[%s12541_s25 + $0x120c] ss:$56 sps:$4 sm:$0xff]  }
 0x209   : > { %4949 = vmatpush1.bf16.msra.mxu0 %v10935_v49  ;;  %4868 = vmatprep.subr.bf16.mxu1 %v10940_v50  ;;  %v11021_v49 = vld [vmem:[%s12541_s25 + $0xb14] ss:$56 sps:$4 sm:$0xff]   ;;  %v11016_v50 = vld [vmem:[%s12541_s25 + $0x1208] ss:$56 sps:$4 sm:$0xff]  }
 0x20a   : > { %4950 = vmatprep.subr.bf16.mxu0 %v10943_v51  ;;  %v11019_v51 = vld [vmem:[%s12541_s25 + $0xb10] ss:$56 sps:$4 sm:$0xff]  }
 0x20c   : > { %4869 = vmatpush1.bf16.msra.mxu1 %v10938_v52  ;;  %v11024_v52 = vld [vmem:[%s12541_s25 + $0x127c] ss:$56 sps:$4 sm:$0xff]  }
 0x20d   : > { %4951 = vmatpush1.bf16.msra.mxu0 %v10941_v53  ;;  %4870 = vmatprep.subr.bf16.mxu1 %v10946_v54  ;;  %v11027_v53 = vld [vmem:[%s12541_s25 + $0xb84] ss:$56 sps:$4 sm:$0xff]   ;;  %v11022_v54 = vld [vmem:[%s12541_s25 + $0x1278] ss:$56 sps:$4 sm:$0xff]  }
 0x20e   : > { %4952 = vmatprep.subr.bf16.mxu0 %v10949_v55  ;;  %v11025_v55 = vld [vmem:[%s12541_s25 + $0xb80] ss:$56 sps:$4 sm:$0xff]  }
 0x210   : > { %4871 = vmatpush1.bf16.msra.mxu1 %v10944_v56  ;;  %v11030_v56 = vld [vmem:[%s12541_s25 + $0x12ec] ss:$56 sps:$4 sm:$0xff]  }
 0x211   : > { %4953 = vmatpush1.bf16.msra.mxu0 %v10947_v57  ;;  %4872 = vmatprep.subr.bf16.mxu1 %v10952_v58  ;;  %v11033_v57 = vld [vmem:[%s12541_s25 + $0xbf4] ss:$56 sps:$4 sm:$0xff]   ;;  %v11028_v58 = vld [vmem:[%s12541_s25 + $0x12e8] ss:$56 sps:$4 sm:$0xff]  }
 0x212   : > { %4954 = vmatprep.subr.bf16.mxu0 %v10955_v59  ;;  %v11031_v59 = vld [vmem:[%s12541_s25 + $0xbf0] ss:$56 sps:$4 sm:$0xff]  }
 0x214   : > { %4873 = vmatpush1.bf16.msra.mxu1 %v10950_v60  ;;  %v11036_v60 = vld [vmem:[%s12541_s25 + $0x135c] ss:$56 sps:$4 sm:$0xff]  }
 0x215   : > { %4955 = vmatpush1.bf16.msra.mxu0 %v10953_v61  ;;  %4874 = vmatprep.subr.bf16.mxu1 %v10958_v0  ;;  %v11039_v61 = vld [vmem:[%s12541_s25 + $0xc64] ss:$56 sps:$4 sm:$0xff]   ;;  %v11034_v0 = vld [vmem:[%s12541_s25 + $0x1358] ss:$56 sps:$4 sm:$0xff]  }
 0x216   : > { %4956 = vmatprep.subr.bf16.mxu0 %v10961_v1  ;;  %v11037_v1 = vld [vmem:[%s12541_s25 + $0xc60] ss:$56 sps:$4 sm:$0xff]  }
 0x218   : > { %4875 = vmatpush1.bf16.msra.mxu1 %v10956_v2  ;;  %v11042_v2 = vld [vmem:[%s12541_s25 + $0x13cc] ss:$56 sps:$4 sm:$0xff]  }
 0x219   : > { %4957 = vmatpush1.bf16.msra.mxu0 %v10959_v4  ;;  %4885 = vmatprep.subr.bf16.mxu1 %v10964_v7  ;;  %v11045_v4 = vld [vmem:[%s12541_s25 + $0xcd4] ss:$56 sps:$4 sm:$0xff]   ;;  %v11040_v7 = vld [vmem:[%s12541_s25 + $0x13c8] ss:$56 sps:$4 sm:$0xff]  }
 0x21a   : > { %4967 = vmatprep.subr.bf16.mxu0 %v10967_v8  ;;  %v11043_v8 = vld [vmem:[%s12541_s25 + $0xcd0] ss:$56 sps:$4 sm:$0xff]  }
 0x21b   : > { %4877 = vmatmul.mubr.bf16.vlgmr.msra.gmra.mrb[8].mxu1 %v12649_v19 }
 0x21c   : > { %4959 = vmatmul.mubr.bf16.vlgmr.msra.gmra.mrb[8].mxu0 %v12641_v13  ;;  %4886 = vmatpush1.bf16.msra.mxu1 %v10962_v9  ;;  %v11048_v9 = vld [vmem:[%s12541_s25 + $0x143c] ss:$56 sps:$4 sm:$0xff]  }
 0x21d   : > { %4968 = vmatpush1.bf16.msra.mxu0 %v10965_v10  ;;  %4887 = vmatprep.subr.bf16.mxu1 %v10970_v11  ;;  %v11051_v10 = vld [vmem:[%s12541_s25 + $0xd44] ss:$56 sps:$4 sm:$0xff]   ;;  %v11046_v11 = vld [vmem:[%s12541_s25 + $0x1438] ss:$56 sps:$4 sm:$0xff]  }
 0x21e   : > { %4969 = vmatprep.subr.bf16.mxu0 %v10973_v12  ;;  %4917 = vmatprep.mubr.bf16.mxu1 %v12655_v23  ;;  %v11049_v12 = vld [vmem:[%s12541_s25 + $0xd40] ss:$56 sps:$4 sm:$0xff]  }
 0x21f   : > { %4999 = vmatprep.mubr.bf16.mxu0 %v12627_v3 }
 0x220   : > { %4888 = vmatpush1.bf16.msra.mxu1 %v10968_v14  ;;  %v11054_v14 = vld [vmem:[%s12541_s25 + $0x14ac] ss:$56 sps:$4 sm:$0xff]  }
 0x221   : > { %4970 = vmatpush1.bf16.msra.mxu0 %v10971_v15  ;;  %4889 = vmatprep.subr.bf16.mxu1 %v10976_v16  ;;  %v11057_v15 = vld [vmem:[%s12541_s25 + $0xdb4] ss:$56 sps:$4 sm:$0xff]   ;;  %v11052_v16 = vld [vmem:[%s12541_s25 + $0x14a8] ss:$56 sps:$4 sm:$0xff]  }
 0x222   : > { %4971 = vmatprep.subr.bf16.mxu0 %v10979_v17  ;;  %v11055_v17 = vld [vmem:[%s12541_s25 + $0xdb0] ss:$56 sps:$4 sm:$0xff]  }
 0x224   : > { %4890 = vmatpush1.bf16.msra.mxu1 %v10974_v18  ;;  %v11060_v18 = vld [vmem:[%s12541_s25 + $0xe24] ss:$56 sps:$4 sm:$0xff]  }
 0x225   : > { %4972 = vmatpush1.bf16.msra.mxu0 %v10977_v20  ;;  %4891 = vmatprep.subr.bf16.mxu1 %v10982_v21  ;;  %v11063_v20 = vld [vmem:[%s12541_s25 + $0x2c] ss:$56 sps:$4 sm:$0xff]   ;;  %v11058_v21 = vld [vmem:[%s12541_s25 + $0xe20] ss:$56 sps:$4 sm:$0xff]  }
 0x226   : > { %4973 = vmatprep.subr.bf16.mxu0 %v10985_v22  ;;  %v11061_v22 = vld [vmem:[%s12541_s25 + $0x28] ss:$56 sps:$4 sm:$0xff]  }
 0x228   : > { %4892 = vmatpush1.bf16.msra.mxu1 %v10980_v25  ;;  %v11066_v25 = vld [vmem:[%s12541_s25 + $0xe94] ss:$56 sps:$4 sm:$0xff]  }
 0x229   : > { %4974 = vmatpush1.bf16.msra.mxu0 %v10983_v26  ;;  %4893 = vmatprep.subr.bf16.mxu1 %v10988_v28  ;;  %v11069_v26 = vld [vmem:[%s12541_s25 + $0x9c] ss:$56 sps:$4 sm:$0xff]   ;;  %v11064_v28 = vld [vmem:[%s12541_s25 + $0xe90] ss:$56 sps:$4 sm:$0xff]  }
 0x22a   : > { %4975 = vmatprep.subr.bf16.mxu0 %v10991_v29  ;;  %v11067_v29 = vld [vmem:[%s12541_s25 + $0x98] ss:$56 sps:$4 sm:$0xff]  }
 0x22c   : > { %4894 = vmatpush1.bf16.msra.mxu1 %v10986_v30  ;;  %v11072_v30 = vld [vmem:[%s12541_s25 + $0xf04] ss:$56 sps:$4 sm:$0xff]  }
 0x22d   : > { %4976 = vmatpush1.bf16.msra.mxu0 %v10989_v31  ;;  %4895 = vmatprep.subr.bf16.mxu1 %v10994_v32  ;;  %v11075_v31 = vld [vmem:[%s12541_s25 + $0x10c] ss:$56 sps:$4 sm:$0xff]   ;;  %v11070_v32 = vld [vmem:[%s12541_s25 + $0xf00] ss:$56 sps:$4 sm:$0xff]  }
 0x22e   : > { %4977 = vmatprep.subr.bf16.mxu0 %v10997_v6  ;;  %v11073_v6 = vld [vmem:[%s12541_s25 + $0x108] ss:$56 sps:$4 sm:$0xff]  }
 0x230   : > { %4896 = vmatpush1.bf16.msra.mxu1 %v10992_v33  ;;  %v11078_v33 = vld [vmem:[%s12541_s25 + $0xf74] ss:$56 sps:$4 sm:$0xff]  }
 0x231   : > { %4978 = vmatpush1.bf16.msra.mxu0 %v10995_v34  ;;  %4897 = vmatprep.subr.bf16.mxu1 %v11000_v35  ;;  %v11081_v34 = vld [vmem:[%s12541_s25 + $0x17c] ss:$56 sps:$4 sm:$0xff]   ;;  %v11076_v35 = vld [vmem:[%s12541_s25 + $0xf70] ss:$56 sps:$4 sm:$0xff]  }
 0x232   : > { %4979 = vmatprep.subr.bf16.mxu0 %v11003_v36  ;;  %v11079_v36 = vld [vmem:[%s12541_s25 + $0x178] ss:$56 sps:$4 sm:$0xff]  }
 0x234   : > { %4898 = vmatpush1.bf16.msra.mxu1 %v10998_v37  ;;  %v11084_v37 = vld [vmem:[%s12541_s25 + $0xfe4] ss:$56 sps:$4 sm:$0xff]  }
 0x235   : > { %4980 = vmatpush1.bf16.msra.mxu0 %v11001_v38  ;;  %4899 = vmatprep.subr.bf16.mxu1 %v11006_v39  ;;  %v11087_v38 = vld [vmem:[%s12541_s25 + $0x1ec] ss:$56 sps:$4 sm:$0xff]   ;;  %v12287_v39 = vmov 1983009808  }
 0x236   : > { %4981 = vmatprep.subr.bf16.mxu0 %v11009_v40  ;;  %v5312_v40 = vunpack.c.l.s4 %v12287_v39  ;;  %v11151_v39 = vld [vmem:[%s12541_s25 + $0x6b8] ss:$56 sps:$4 sm:$0xff]  }
 0x238   : > { %4900 = vmatpush1.bf16.msra.mxu1 %v11004_v41  ;;  %v11082_v41 = vld [vmem:[%s12541_s25 + $0xfe0] ss:$56 sps:$4 sm:$0xff]  }
 0x239   : > { %4982 = vmatpush1.bf16.msra.mxu0 %v11007_v42  ;;  %4901 = vmatprep.subr.bf16.mxu1 %v11012_v44  ;;  %v11085_v42 = vld [vmem:[%s12541_s25 + $0x1e8] ss:$56 sps:$4 sm:$0xff]   ;;  %v11090_v44 = vld [vmem:[%s12541_s25 + $0x1054] ss:$56 sps:$4 sm:$0xff]  }
 0x23a   : > { %4983 = vmatprep.subr.bf16.mxu0 %v11015_v45  ;;  %v11093_v45 = vld [vmem:[%s12541_s25 + $0x25c] ss:$56 sps:$4 sm:$0xff]  }
 0x23c   : > { %4902 = vmatpush1.bf16.msra.mxu1 %v11010_v46  ;;  %v5313_v46 = vunpack.c.0.s8 %v5312_v40  ;;  %v11156_v40 = vld [vmem:[%s12541_s25 + $0x72c] ss:$56 sps:$4 sm:$0xff]  }
 0x23d   : > { %4984 = vmatpush1.bf16.msra.mxu0 %v11013_v47  ;;  %4903 = vmatprep.subr.bf16.mxu1 %v11018_v48  ;;  %v11088_v47 = vld [vmem:[%s12541_s25 + $0x1050] ss:$56 sps:$4 sm:$0xff]  }
 0x23e   : > { %4985 = vmatprep.subr.bf16.mxu0 %v11021_v49  ;;  %v11091_v48 = vld [vmem:[%s12541_s25 + $0x258] ss:$56 sps:$4 sm:$0xff]   ;;  %v11096_v49 = vld [vmem:[%s12541_s25 + $0x10c4] ss:$56 sps:$4 sm:$0xff]  }
 0x240   : > { %4904 = vmatpush1.bf16.msra.mxu1 %v11016_v50  ;;  %v11099_v50 = vld [vmem:[%s12541_s25 + $0x2cc] ss:$56 sps:$4 sm:$0xff]  }
 0x241   : > { %4986 = vmatpush1.bf16.msra.mxu0 %v11019_v51  ;;  %4905 = vmatprep.subr.bf16.mxu1 %v11024_v52  ;;  %v13102_v51 = vsub.s32 %v5313_v46, %v12597_v43  ;;  %v11165_v46 = vld [vmem:[%s12541_s25 + $0xa4] ss:$56 sps:$4 sm:$0xff]  }
 0x242   : > { %4987 = vmatprep.subr.bf16.mxu0 %v11027_v53 }
 0x244   : > { %4906 = vmatpush1.bf16.msra.mxu1 %v11022_v54 }
 0x245   : > { %4988 = vmatpush1.bf16.msra.mxu0 %v11025_v55  ;;  %4907 = vmatprep.subr.bf16.mxu1 %v11030_v56  ;;  %v11094_v56 = vld [vmem:[%s12541_s25 + $0x10c0] ss:$56 sps:$4 sm:$0xff]  }
 0x246   : > { %4989 = vmatprep.subr.bf16.mxu0 %v11033_v57  ;;  %v11097_v57 = vld [vmem:[%s12541_s25 + $0x2c8] ss:$56 sps:$4 sm:$0xff]  }
 0x248   : > { %4908 = vmatpush1.bf16.msra.mxu1 %v11028_v58 }
 0x249   : > { %4990 = vmatpush1.bf16.msra.mxu0 %v11031_v59  ;;  %4909 = vmatprep.subr.bf16.mxu1 %v11036_v60  ;;  %v11102_v59 = vld [vmem:[%s12541_s25 + $0x1134] ss:$56 sps:$4 sm:$0xff]  }
 0x24a   : > { %4991 = vmatprep.subr.bf16.mxu0 %v11039_v61  ;;  %v11105_v60 = vld [vmem:[%s12541_s25 + $0x33c] ss:$56 sps:$4 sm:$0xff]   ;;  %v5317_v61 = vrot.slane %v5309_v5, %v13102_v51 }
 0x24b   : > { %v11114_v5 = vld [vmem:[%s12541_s25 + $0x1214] ss:$56 sps:$4 sm:$0xff]  }
 0x24c   : > { %4910 = vmatpush1.bf16.msra.mxu1 %v11034_v0 }
 0x24d   : > { %4992 = vmatpush1.bf16.msra.mxu0 %v11037_v1  ;;  %4911 = vmatprep.subr.bf16.mxu1 %v11042_v2  ;;  %v11100_v2 = vld [vmem:[%s12541_s25 + $0x1130] ss:$56 sps:$4 sm:$0xff]  }
 0x24e   : > { %4993 = vmatprep.subr.bf16.mxu0 %v11045_v4  ;;  %v11103_v4 = vld [vmem:[%s12541_s25 + $0x338] ss:$56 sps:$4 sm:$0xff]  }
 0x250   : > { %4912 = vmatpush1.bf16.msra.mxu1 %v11040_v7  ;;  %v11108_v7 = vld [vmem:[%s12541_s25 + $0x11a4] ss:$56 sps:$4 sm:$0xff]  }
 0x251   : > { %4994 = vmatpush1.bf16.msra.mxu0 %v11043_v8  ;;  %4913 = vmatprep.subr.bf16.mxu1 %v11048_v9  ;;  %v11111_v8 = vld [vmem:[%s12541_s25 + $0x3ac] ss:$56 sps:$4 sm:$0xff]   ;;  %v11117_v9 = vld [vmem:[%s12541_s25 + $0x41c] ss:$56 sps:$4 sm:$0xff]  }
 0x252   : > { %4995 = vmatprep.subr.bf16.mxu0 %v11051_v10  ;;  %v11112_v10 = vld [vmem:[%s12541_s25 + $0x1210] ss:$56 sps:$4 sm:$0xff]  }
 0x254   : > { %4914 = vmatpush1.bf16.msra.mxu1 %v11046_v11  ;;  %v11115_v11 = vld [vmem:[%s12541_s25 + $0x418] ss:$56 sps:$4 sm:$0xff]  }
 0x255   : > { %4996 = vmatpush1.bf16.msra.mxu0 %v11049_v12  ;;  %4915 = vmatprep.subr.bf16.mxu1 %v11054_v14  ;;  %v11120_v12 = vld [vmem:[%s12541_s25 + $0x1284] ss:$56 sps:$4 sm:$0xff]  }
 0x256   : > { %4997 = vmatprep.subr.bf16.mxu0 %v11057_v15  ;;  %v11123_v14 = vld [vmem:[%s12541_s25 + $0x48c] ss:$56 sps:$4 sm:$0xff]   ;;  %v11118_v15 = vld [vmem:[%s12541_s25 + $0x1280] ss:$56 sps:$4 sm:$0xff]  }
 0x258   : > { %4916 = vmatpush1.bf16.msra.mxu1 %v11052_v16  ;;  %v11121_v16 = vld [vmem:[%s12541_s25 + $0x488] ss:$56 sps:$4 sm:$0xff]  }
 0x259   : > { %4998 = vmatpush1.bf16.msra.mxu0 %v11055_v17  ;;  %5049 = vmatprep.subr.bf16.mxu1 %v11063_v20  ;;  %v11126_v17 = vld [vmem:[%s12541_s25 + $0x12f4] ss:$56 sps:$4 sm:$0xff]   ;;  %v11124_v20 = vld [vmem:[%s12541_s25 + $0x12f0] ss:$56 sps:$4 sm:$0xff]  }
 0x25a   : > { %5008 = vmatprep.subr.bf16.mxu0 %v11060_v18  ;;  %v11129_v18 = vld [vmem:[%s12541_s25 + $0x4fc] ss:$56 sps:$4 sm:$0xff]  }
 0x25b   : > { %4918 = vmatmul.mubr.bf16.vlgmr.msra.gmra.mrb[8].mxu1 %v12620_v63 }
 0x25c   : > { %5000 = vmatmul.mubr.bf16.vlgmr.msra.gmra.mrb[8].mxu0 %v12649_v19  ;;  %5050 = vmatpush1.bf16.msra.mxu1 %v11061_v22  ;;  %v11132_v22 = vld [vmem:[%s12541_s25 + $0x1364] ss:$56 sps:$4 sm:$0xff]  }
 0x25d   : > { %5009 = vmatpush1.bf16.msra.mxu0 %v11058_v21  ;;  %5051 = vmatprep.subr.bf16.mxu1 %v11069_v26  ;;  %v11127_v21 = vld [vmem:[%s12541_s25 + $0x4f8] ss:$56 sps:$4 sm:$0xff]  }
 0x25e   : > { %5010 = vmatprep.subr.bf16.mxu0 %v11066_v25  ;;  %5040 = vmatprep.mubr.bf16.mxu0 %v12655_v23  ;;  %v11135_v25 = vld [vmem:[%s12541_s25 + $0x56c] ss:$56 sps:$4 sm:$0xff]   ;;  %v11130_v26 = vld [vmem:[%s12541_s25 + $0x1360] ss:$56 sps:$4 sm:$0xff]  }
 0x25f   : > { %5081 = vmatprep.mubr.bf16.mxu1 %v12617_v62 }
 0x260   : > { %5052 = vmatpush1.bf16.msra.mxu1 %v11067_v29  ;;  %v11138_v29 = vld [vmem:[%s12541_s25 + $0x13d4] ss:$56 sps:$4 sm:$0xff]  }
 0x261   : > { %5011 = vmatpush1.bf16.msra.mxu0 %v11064_v28  ;;  %5053 = vmatprep.subr.bf16.mxu1 %v11075_v31  ;;  %v11133_v28 = vld [vmem:[%s12541_s25 + $0x568] ss:$56 sps:$4 sm:$0xff]  }
 0x262   : > { %5012 = vmatprep.subr.bf16.mxu0 %v11072_v30  ;;  %v11141_v30 = vld [vmem:[%s12541_s25 + $0x5dc] ss:$56 sps:$4 sm:$0xff]   ;;  %v11136_v31 = vld [vmem:[%s12541_s25 + $0x13d0] ss:$56 sps:$4 sm:$0xff]  }
 0x264   : > { %5054 = vmatpush1.bf16.msra.mxu1 %v11073_v6  ;;  %v11144_v6 = vld [vmem:[%s12541_s25 + $0x1444] ss:$56 sps:$4 sm:$0xff]  }
 0x265   : > { %5013 = vmatpush1.bf16.msra.mxu0 %v11070_v32  ;;  %5055 = vmatprep.subr.bf16.mxu1 %v11081_v34  ;;  %v11139_v32 = vld [vmem:[%s12541_s25 + $0x5d8] ss:$56 sps:$4 sm:$0xff]  }
 0x266   : > { %5014 = vmatprep.subr.bf16.mxu0 %v11078_v33  ;;  %v11147_v33 = vld [vmem:[%s12541_s25 + $0x64c] ss:$56 sps:$4 sm:$0xff]   ;;  %v11142_v34 = vld [vmem:[%s12541_s25 + $0x1440] ss:$56 sps:$4 sm:$0xff]  }
 0x268   : > { %5056 = vmatpush1.bf16.msra.mxu1 %v11079_v36  ;;  %v11150_v36 = vld [vmem:[%s12541_s25 + $0x14b4] ss:$56 sps:$4 sm:$0xff]  }
 0x269   : > { %5015 = vmatpush1.bf16.msra.mxu0 %v11076_v35  ;;  %5057 = vmatprep.subr.bf16.mxu1 %v11087_v38  ;;  %v11145_v35 = vld [vmem:[%s12541_s25 + $0x648] ss:$56 sps:$4 sm:$0xff]  }
 0x26a   : > { %5016 = vmatprep.subr.bf16.mxu0 %v11084_v37  ;;  %v11153_v37 = vld [vmem:[%s12541_s25 + $0x6bc] ss:$56 sps:$4 sm:$0xff]   ;;  %v11148_v38 = vld [vmem:[%s12541_s25 + $0x14b0] ss:$56 sps:$4 sm:$0xff]  }
 0x26c   : > { %5058 = vmatpush1.bf16.msra.mxu1 %v11085_v42  ;;  %v11154_v42 = vld [vmem:[%s12541_s25 + $0x728] ss:$56 sps:$4 sm:$0xff]  }
 0x26d   : > { %5017 = vmatpush1.bf16.msra.mxu0 %v11082_v41  ;;  %5059 = vmatprep.subr.bf16.mxu1 %v11093_v45  ;;  %v11159_v41 = vld [vmem:[%s12541_s25 + $0x34] ss:$56 sps:$4 sm:$0xff]  }
 0x26e   : > { %5018 = vmatprep.subr.bf16.mxu0 %v11090_v44  ;;  %v4673_v52 = vpop.f32.mrb[4].mxu1  ;;  %v11157_v44 = vld [vmem:[%s12541_s25 + $0x30] ss:$56 sps:$4 sm:$0xff]   ;;  %v11162_v45 = vld [vmem:[%s12541_s25 + $0x79c] ss:$56 sps:$4 sm:$0xff]  }
 0x26f   : > { %v4675_v53 = vpop.f32.mrb[5].mxu1 }
 0x270   : > { %v5310_v54 = vcombine.low %v4673_v52, %v4675_v53  ;;  %v4677_v55 = vpop.f32.mrb[6].mxu1  ;;  %5060 = vmatpush1.bf16.msra.mxu1 %v11091_v48  ;;  %v11163_v48 = vld [vmem:[%s12541_s25 + $0xa0] ss:$56 sps:$4 sm:$0xff]   ;;  %v11169_v53 = vld [vmem:[%s12541_s25 + $0x110] ss:$56 sps:$4 sm:$0xff]  }
 0x271   : > { %5019 = vmatpush1.bf16.msra.mxu0 %v11088_v47  ;;  %v4678_v58 = vpop.f32.mrb[7].mxu1  ;;  %5061 = vmatprep.subr.bf16.mxu1 %v11099_v50  ;;  %v11160_v47 = vld [vmem:[%s12541_s25 + $0x798] ss:$56 sps:$4 sm:$0xff]   ;;  %v11171_v50 = vld [vmem:[%s12541_s25 + $0x114] ss:$56 sps:$4 sm:$0xff]  }
 0x272   : > { %5020 = vmatprep.subr.bf16.mxu0 %v11096_v49  ;;  %v5324_v0 = vrot.slane %v5310_v54, %v13102_v51  ;;  %v11168_v49 = vld [vmem:[%s12541_s25 + $0x80c] ss:$56 sps:$4 sm:$0xff]   ;;  %v11166_v52 = vld [vmem:[%s12541_s25 + $0x808] ss:$56 sps:$4 sm:$0xff]   ;;  %v11174_v54 = vld [vmem:[%s12541_s25 + $0x87c] ss:$56 sps:$4 sm:$0xff]  }
 0x273   : > { %v11177_v55 = vld [vmem:[%s12541_s25 + $0x184] ss:$56 sps:$4 sm:$0xff]   ;;  %v11183_v58 = vld [vmem:[%s12541_s25 + $0x1f4] ss:$56 sps:$4 sm:$0xff]  }
 0x274   : > { %v5325_v1 = vcombine.low %v5317_v61, %v5324_v0  ;;  %5062 = vmatpush1.bf16.msra.mxu1 %v11097_v57  ;;  %v11180_v57 = vld [vmem:[%s12541_s25 + $0x8ec] ss:$56 sps:$4 sm:$0xff]   ;;  %v11186_v61 = vld [vmem:[%s12541_s25 + $0x95c] ss:$56 sps:$4 sm:$0xff]  }
 0x275   : > { %5021 = vmatpush1.bf16.msra.mxu0 %v11094_v56  ;;  %5063 = vmatprep.subr.bf16.mxu1 %v11105_v60  ;;  %v11172_v56 = vld [vmem:[%s12541_s25 + $0x878] ss:$56 sps:$4 sm:$0xff]   ;;  %v11189_v0 = vld [vmem:[%s12541_s25 + $0x264] ss:$56 sps:$4 sm:$0xff]  }
 0x276   : > { %5022 = vmatprep.subr.bf16.mxu0 %v11102_v59  ;;  %5376 = vst [vmem:[#allocation2] sm:$0xff] %v5325_v1  ;;  %v11178_v59 = vld [vmem:[%s12541_s25 + $0x8e8] ss:$56 sps:$4 sm:$0xff]   ;;  %v11184_v1 = vld [vmem:[%s12541_s25 + $0x958] ss:$56 sps:$4 sm:$0xff]  }
 0x277   : > { %v11181_v60 = vld [vmem:[%s12541_s25 + $0x1f0] ss:$56 sps:$4 sm:$0xff]  }
 0x278   : > { %5064 = vmatpush1.bf16.msra.mxu1 %v11103_v4  ;;  %v11192_v4 = vld [vmem:[%s12541_s25 + $0x9cc] ss:$56 sps:$4 sm:$0xff]  }
 0x279   : > { %5023 = vmatpush1.bf16.msra.mxu0 %v11100_v2  ;;  %5065 = vmatprep.subr.bf16.mxu1 %v11111_v8  ;;  %v11187_v2 = vld [vmem:[%s12541_s25 + $0x260] ss:$56 sps:$4 sm:$0xff]  }
 0x27a   : > { %5024 = vmatprep.subr.bf16.mxu0 %v11108_v7  ;;  %v11195_v7 = vld [vmem:[%s12541_s25 + $0x2d4] ss:$56 sps:$4 sm:$0xff]  }
 0x27c   : > { %5066 = vmatpush1.bf16.msra.mxu1 %v11109_v27 }
 0x27d   : > { %5025 = vmatpush1.bf16.msra.mxu0 %v11106_v24  ;;  %5067 = vmatprep.subr.bf16.mxu1 %v11117_v9  ;;  %v11190_v24 = vld [vmem:[%s12541_s25 + $0x9c8] ss:$56 sps:$4 sm:$0xff]   ;;  %v11198_v9 = vld [vmem:[%s12541_s25 + $0xa3c] ss:$56 sps:$4 sm:$0xff]  }
 0x27e   : > { %5026 = vmatprep.subr.bf16.mxu0 %v11114_v5  ;;  %v11193_v5 = vld [vmem:[%s12541_s25 + $0x2d0] ss:$56 sps:$4 sm:$0xff]  }
 0x280   : > { %5068 = vmatpush1.bf16.msra.mxu1 %v11115_v11 }
 0x281   : > { %5027 = vmatpush1.bf16.msra.mxu0 %v11112_v10  ;;  %5069 = vmatprep.subr.bf16.mxu1 %v11123_v14 }
 0x282   : > { %5028 = vmatprep.subr.bf16.mxu0 %v11120_v12  ;;  %v11201_v12 = vld [vmem:[%s12541_s25 + $0x344] ss:$56 sps:$4 sm:$0xff]  }
 0x284   : > { %5070 = vmatpush1.bf16.msra.mxu1 %v11121_v16  ;;  %v11199_v16 = vld [vmem:[%s12541_s25 + $0x340] ss:$56 sps:$4 sm:$0xff]  }
 0x285   : > { %5029 = vmatpush1.bf16.msra.mxu0 %v11118_v15  ;;  %5071 = vmatprep.subr.bf16.mxu1 %v11129_v18  ;;  %v11196_v15 = vld [vmem:[%s12541_s25 + $0xa38] ss:$56 sps:$4 sm:$0xff]   ;;  %v11207_v18 = vld [vmem:[%s12541_s25 + $0x3b4] ss:$56 sps:$4 sm:$0xff]  }
 0x286   : > { %5030 = vmatprep.subr.bf16.mxu0 %v11126_v17  ;;  %v11204_v17 = vld [vmem:[%s12541_s25 + $0xaac] ss:$56 sps:$4 sm:$0xff]  }
 0x288   : > { %5072 = vmatpush1.bf16.msra.mxu1 %v11127_v21  ;;  %v11205_v21 = vld [vmem:[%s12541_s25 + $0x3b0] ss:$56 sps:$4 sm:$0xff]  }
 0x289   : > { %5031 = vmatpush1.bf16.msra.mxu0 %v11124_v20  ;;  %5073 = vmatprep.subr.bf16.mxu1 %v11135_v25  ;;  %v11202_v20 = vld [vmem:[%s12541_s25 + $0xaa8] ss:$56 sps:$4 sm:$0xff]   ;;  %v11213_v25 = vld [vmem:[%s12541_s25 + $0x424] ss:$56 sps:$4 sm:$0xff]  }
 0x28a   : > { %5032 = vmatprep.subr.bf16.mxu0 %v11132_v22  ;;  %v11210_v22 = vld [vmem:[%s12541_s25 + $0xb1c] ss:$56 sps:$4 sm:$0xff]  }
 0x28c   : > { %5074 = vmatpush1.bf16.msra.mxu1 %v11133_v28  ;;  %v11211_v28 = vld [vmem:[%s12541_s25 + $0x420] ss:$56 sps:$4 sm:$0xff]  }
 0x28d   : > { %5033 = vmatpush1.bf16.msra.mxu0 %v11130_v26  ;;  %5075 = vmatprep.subr.bf16.mxu1 %v11141_v30  ;;  %v11208_v26 = vld [vmem:[%s12541_s25 + $0xb18] ss:$56 sps:$4 sm:$0xff]   ;;  %v11219_v30 = vld [vmem:[%s12541_s25 + $0x494] ss:$56 sps:$4 sm:$0xff]  }
 0x28e   : > { %5034 = vmatprep.subr.bf16.mxu0 %v11138_v29  ;;  %v11216_v29 = vld [vmem:[%s12541_s25 + $0xb8c] ss:$56 sps:$4 sm:$0xff]  }
 0x290   : > { %5076 = vmatpush1.bf16.msra.mxu1 %v11139_v32  ;;  %v11217_v32 = vld [vmem:[%s12541_s25 + $0x490] ss:$56 sps:$4 sm:$0xff]  }
 0x291   : > { %5035 = vmatpush1.bf16.msra.mxu0 %v11136_v31  ;;  %5077 = vmatprep.subr.bf16.mxu1 %v11147_v33  ;;  %v11214_v31 = vld [vmem:[%s12541_s25 + $0xb88] ss:$56 sps:$4 sm:$0xff]   ;;  %v11225_v33 = vld [vmem:[%s12541_s25 + $0x504] ss:$56 sps:$4 sm:$0xff]  }
 0x292   : > { %5036 = vmatprep.subr.bf16.mxu0 %v11144_v6  ;;  %v11222_v6 = vld [vmem:[%s12541_s25 + $0xbfc] ss:$56 sps:$4 sm:$0xff]  }
 0x294   : > { %5078 = vmatpush1.bf16.msra.mxu1 %v11145_v35  ;;  %v11223_v35 = vld [vmem:[%s12541_s25 + $0x500] ss:$56 sps:$4 sm:$0xff]  }
 0x295   : > { %5037 = vmatpush1.bf16.msra.mxu0 %v11142_v34  ;;  %5079 = vmatprep.subr.bf16.mxu1 %v11153_v37  ;;  %v11220_v34 = vld [vmem:[%s12541_s25 + $0xbf8] ss:$56 sps:$4 sm:$0xff]   ;;  %v11231_v37 = vld [vmem:[%s12541_s25 + $0x574] ss:$56 sps:$4 sm:$0xff]  }
 0x296   : > { %5038 = vmatprep.subr.bf16.mxu0 %v11150_v36  ;;  %v11228_v36 = vld [vmem:[%s12541_s25 + $0xc6c] ss:$56 sps:$4 sm:$0xff]  }
 0x298   : > { %5080 = vmatpush1.bf16.msra.mxu1 %v11151_v39  ;;  %v11229_v39 = vld [vmem:[%s12541_s25 + $0x570] ss:$56 sps:$4 sm:$0xff]  }
 0x299   : > { %5039 = vmatpush1.bf16.msra.mxu0 %v11148_v38  ;;  %5090 = vmatprep.subr.bf16.mxu1 %v11156_v40  ;;  %v11226_v38 = vld [vmem:[%s12541_s25 + $0xc68] ss:$56 sps:$4 sm:$0xff]   ;;  %v11234_v40 = vld [vmem:[%s12541_s25 + $0xcdc] ss:$56 sps:$4 sm:$0xff]  }
 0x29a   : > { %5172 = vmatprep.subr.bf16.mxu0 %v11159_v41  ;;  %v11237_v41 = vld [vmem:[%s12541_s25 + $0x5e4] ss:$56 sps:$4 sm:$0xff]  }
 0x29b   : > { %5082 = vmatmul.mubr.bf16.vlgmr.msra.gmra.mrb[12].mxu1 %v12641_v13 }
 0x29c   : > { %5041 = vmatmul.mubr.bf16.vlgmr.msra.gmra.mrb[8].mxu0 %v12620_v63  ;;  %5091 = vmatpush1.bf16.msra.mxu1 %v11154_v42  ;;  %v11232_v42 = vld [vmem:[%s12541_s25 + $0xcd8] ss:$56 sps:$4 sm:$0xff]  }
 0x29d   : > { %5173 = vmatpush1.bf16.msra.mxu0 %v11157_v44  ;;  %5092 = vmatprep.subr.bf16.mxu1 %v11162_v45  ;;  %v11235_v44 = vld [vmem:[%s12541_s25 + $0x5e0] ss:$56 sps:$4 sm:$0xff]   ;;  %v11240_v45 = vld [vmem:[%s12541_s25 + $0xd4c] ss:$56 sps:$4 sm:$0xff]  }
 0x29e   : > { %5174 = vmatprep.subr.bf16.mxu0 %v11165_v46  ;;  %5122 = vmatprep.mubr.bf16.mxu1 %v12627_v3  ;;  %v11243_v46 = vld [vmem:[%s12541_s25 + $0x654] ss:$56 sps:$4 sm:$0xff]  }
 0x29f   : > { %5204 = vmatprep.mubr.bf16.mxu0 %v12617_v62  ;;  %v11175_v62 = vld [vmem:[%s12541_s25 + $0x180] ss:$56 sps:$4 sm:$0xff]  }
 0x2a0   : > { %5093 = vmatpush1.bf16.msra.mxu1 %v11160_v47  ;;  %v11238_v47 = vld [vmem:[%s12541_s25 + $0xd48] ss:$56 sps:$4 sm:$0xff]  }
 0x2a1   : > { %5175 = vmatpush1.bf16.msra.mxu0 %v11163_v48  ;;  %5094 = vmatprep.subr.bf16.mxu1 %v11168_v49  ;;  %v11241_v48 = vld [vmem:[%s12541_s25 + $0x650] ss:$56 sps:$4 sm:$0xff]   ;;  %v11246_v49 = vld [vmem:[%s12541_s25 + $0xdbc] ss:$56 sps:$4 sm:$0xff]  }
 0x2a2   : > { %5176 = vmatprep.subr.bf16.mxu0 %v11171_v50  ;;  %v11249_v50 = vld [vmem:[%s12541_s25 + $0x6c4] ss:$56 sps:$4 sm:$0xff]  }
 0x2a4   : > { %5095 = vmatpush1.bf16.msra.mxu1 %v11166_v52  ;;  %v11244_v52 = vld [vmem:[%s12541_s25 + $0xdb8] ss:$56 sps:$4 sm:$0xff]  }
 0x2a5   : > { %5177 = vmatpush1.bf16.msra.mxu0 %v11169_v53  ;;  %5096 = vmatprep.subr.bf16.mxu1 %v11174_v54  ;;  %v11247_v53 = vld [vmem:[%s12541_s25 + $0x6c0] ss:$56 sps:$4 sm:$0xff]   ;;  %v11252_v54 = vld [vmem:[%s12541_s25 + $0xe2c] ss:$56 sps:$4 sm:$0xff]  }
 0x2a6   : > { %5178 = vmatprep.subr.bf16.mxu0 %v11177_v55  ;;  %v11255_v55 = vld [vmem:[%s12541_s25 + $0x734] ss:$56 sps:$4 sm:$0xff]  }
 0x2a8   : > { %5097 = vmatpush1.bf16.msra.mxu1 %v11172_v56  ;;  %v11250_v56 = vld [vmem:[%s12541_s25 + $0xe28] ss:$56 sps:$4 sm:$0xff]  }
 0x2a9   : > { %5179 = vmatpush1.bf16.msra.mxu0 %v11175_v62  ;;  %5098 = vmatprep.subr.bf16.mxu1 %v11180_v57  ;;  %v11253_v62 = vld [vmem:[%s12541_s25 + $0x730] ss:$56 sps:$4 sm:$0xff]   ;;  %v11258_v57 = vld [vmem:[%s12541_s25 + $0xe9c] ss:$56 sps:$4 sm:$0xff]  }
 0x2aa   : > { %5180 = vmatprep.subr.bf16.mxu0 %v11183_v58  ;;  %v11261_v58 = vld [vmem:[%s12541_s25 + $0x7a4] ss:$56 sps:$4 sm:$0xff]  }
 0x2ac   : > { %5099 = vmatpush1.bf16.msra.mxu1 %v11178_v59  ;;  %v11256_v59 = vld [vmem:[%s12541_s25 + $0xe98] ss:$56 sps:$4 sm:$0xff]  }
 0x2ad   : > { %5181 = vmatpush1.bf16.msra.mxu0 %v11181_v60  ;;  %5100 = vmatprep.subr.bf16.mxu1 %v11186_v61  ;;  %v11259_v60 = vld [vmem:[%s12541_s25 + $0x7a0] ss:$56 sps:$4 sm:$0xff]   ;;  %v11264_v61 = vld [vmem:[%s12541_s25 + $0xf0c] ss:$56 sps:$4 sm:$0xff]  }
 0x2ae   : > { %5182 = vmatprep.subr.bf16.mxu0 %v11189_v0  ;;  %v11267_v0 = vld [vmem:[%s12541_s25 + $0x814] ss:$56 sps:$4 sm:$0xff]  }
 0x2af   : > { %v13177_v8 = vpop.f32.mrb[4].mxu0 }
 0x2b0   : > { %v13180_v27 = vpop.f32.mrb[5].mxu0  ;;  %5101 = vmatpush1.bf16.msra.mxu1 %v11184_v1  ;;  %v11262_v1 = vld [vmem:[%s12541_s25 + $0xf08] ss:$56 sps:$4 sm:$0xff]  }
 0x2b1   : > { %v5326_v10 = vcombine.low %v13177_v8, %v13180_v27  ;;  %v4800_v11 = vpop.f32.mrb[6].mxu0  ;;  %5183 = vmatpush1.bf16.msra.mxu0 %v11187_v2  ;;  %5102 = vmatprep.subr.bf16.mxu1 %v11192_v4  ;;  %v11265_v2 = vld [vmem:[%s12541_s25 + $0x810] ss:$56 sps:$4 sm:$0xff]   ;;  %v11273_v4 = vld [vmem:[%s12541_s25 + $0x884] ss:$56 sps:$4 sm:$0xff]  }
 0x2b2   : > { %v4801_v14 = vpop.f32.mrb[7].mxu0  ;;  %5184 = vmatprep.subr.bf16.mxu0 %v11195_v7  ;;  %v11268_v7 = vld [vmem:[%s12541_s25 + $0xf78] ss:$56 sps:$4 sm:$0xff]  }
 0x2b3   : > { %v11277_v11 = vld [vmem:[%s12541_s25 + $0x8f0] ss:$56 sps:$4 sm:$0xff]   ;;  %v11285_v14 = vld [vmem:[%s12541_s25 + $0x964] ss:$56 sps:$4 sm:$0xff]  }
 0x2b4   : > { %5103 = vmatpush1.bf16.msra.mxu1 %v11190_v24  ;;  %v11271_v24 = vld [vmem:[%s12541_s25 + $0x880] ss:$56 sps:$4 sm:$0xff]   ;;  %v11394_v27 = vld [vmem:[%s12541_s25 + $0x11b0] ss:$56 sps:$4 sm:$0xff]  }
 0x2b5   : > { %5185 = vmatpush1.bf16.msra.mxu0 %v11193_v5  ;;  %5104 = vmatprep.subr.bf16.mxu1 %v11198_v9  ;;  %v11279_v5 = vld [vmem:[%s12541_s25 + $0x8f4] ss:$56 sps:$4 sm:$0xff]   ;;  %v11274_v9 = vld [vmem:[%s12541_s25 + $0xfe8] ss:$56 sps:$4 sm:$0xff]  }
 0x2b6   : > { %5186 = vmatprep.subr.bf16.mxu0 %v11201_v12  ;;  %v11282_v12 = vld [vmem:[%s12541_s25 + $0x105c] ss:$56 sps:$4 sm:$0xff]   ;;  %v11399_v8 = vld [vmem:[%s12552_s7 + $0x104] ss:$16 sps:$4 sm:$0xff]  }
 0x2b8   : > { %5105 = vmatpush1.bf16.msra.mxu1 %v11196_v15  ;;  %v11280_v15 = vld [vmem:[%s12541_s25 + $0x1058] ss:$56 sps:$4 sm:$0xff]  }
 0x2b9   : > { %5187 = vmatpush1.bf16.msra.mxu0 %v11199_v16  ;;  %5106 = vmatprep.subr.bf16.mxu1 %v11204_v17  ;;  %v11283_v16 = vld [vmem:[%s12541_s25 + $0x960] ss:$56 sps:$4 sm:$0xff]   ;;  %v11288_v17 = vld [vmem:[%s12541_s25 + $0x10cc] ss:$56 sps:$4 sm:$0xff]  }
 0x2ba   : > { %5188 = vmatprep.subr.bf16.mxu0 %v11207_v18  ;;  %v11291_v18 = vld [vmem:[%s12541_s25 + $0x9d4] ss:$56 sps:$4 sm:$0xff]  }
 0x2bc   : > { %5107 = vmatpush1.bf16.msra.mxu1 %v11202_v20  ;;  %v11286_v20 = vld [vmem:[%s12541_s25 + $0x10c8] ss:$56 sps:$4 sm:$0xff]  }
 0x2bd   : > { %5189 = vmatpush1.bf16.msra.mxu0 %v11205_v21  ;;  %5108 = vmatprep.subr.bf16.mxu1 %v11210_v22  ;;  %v11289_v21 = vld [vmem:[%s12541_s25 + $0x9d0] ss:$56 sps:$4 sm:$0xff]   ;;  %v11294_v22 = vld [vmem:[%s12541_s25 + $0x113c] ss:$56 sps:$4 sm:$0xff]  }
 0x2be   : > { %5190 = vmatprep.subr.bf16.mxu0 %v11213_v25  ;;  %v11297_v25 = vld [vmem:[%s12541_s25 + $0xa44] ss:$56 sps:$4 sm:$0xff]  }
 0x2c0   : > { %5109 = vmatpush1.bf16.msra.mxu1 %v11208_v26  ;;  %v11292_v26 = vld [vmem:[%s12541_s25 + $0x1138] ss:$56 sps:$4 sm:$0xff]  }
 0x2c1   : > { %5191 = vmatpush1.bf16.msra.mxu0 %v11211_v28  ;;  %5110 = vmatprep.subr.bf16.mxu1 %v11216_v29  ;;  %v11295_v28 = vld [vmem:[%s12541_s25 + $0xa40] ss:$56 sps:$4 sm:$0xff]   ;;  %v11300_v29 = vld [vmem:[%s12541_s25 + $0x11ac] ss:$56 sps:$4 sm:$0xff]  }
 0x2c2   : > { %5192 = vmatprep.subr.bf16.mxu0 %v11219_v30  ;;  %v11303_v30 = vld [vmem:[%s12541_s25 + $0xab4] ss:$56 sps:$4 sm:$0xff]  }
 0x2c4   : > { %5111 = vmatpush1.bf16.msra.mxu1 %v11214_v31  ;;  %v11298_v31 = vld [vmem:[%s12541_s25 + $0x11a8] ss:$56 sps:$4 sm:$0xff]  }
 0x2c5   : > { %5193 = vmatpush1.bf16.msra.mxu0 %v11217_v32  ;;  %5112 = vmatprep.subr.bf16.mxu1 %v11222_v6  ;;  %v11301_v32 = vld [vmem:[%s12541_s25 + $0xab0] ss:$56 sps:$4 sm:$0xff]   ;;  %v11306_v6 = vld [vmem:[%s12541_s25 + $0x121c] ss:$56 sps:$4 sm:$0xff]  }
 0x2c6   : > { %5194 = vmatprep.subr.bf16.mxu0 %v11225_v33  ;;  %v11309_v33 = vld [vmem:[%s12541_s25 + $0xb24] ss:$56 sps:$4 sm:$0xff]  }
 0x2c8   : > { %5113 = vmatpush1.bf16.msra.mxu1 %v11220_v34  ;;  %v11304_v34 = vld [vmem:[%s12541_s25 + $0x1218] ss:$56 sps:$4 sm:$0xff]  }
 0x2c9   : > { %5195 = vmatpush1.bf16.msra.mxu0 %v11223_v35  ;;  %5114 = vmatprep.subr.bf16.mxu1 %v11228_v36  ;;  %v11307_v35 = vld [vmem:[%s12541_s25 + $0xb20] ss:$56 sps:$4 sm:$0xff]  }
 0x2ca   : > { %5196 = vmatprep.subr.bf16.mxu0 %v11231_v37  ;;  %v13266_v36 = vld [vmem:[%s12549_s13] sm:$0xff]  ;;  %v5393_v37 = vsub.s32 0, %v12597_v43 }
 0x2cc   : > { %5115 = vmatpush1.bf16.msra.mxu1 %v11226_v38  ;;  %v5397_v38 = vsub.s32 1, %v12597_v43 }
 0x2cd   : > { %5197 = vmatpush1.bf16.msra.mxu0 %v11229_v39  ;;  %5116 = vmatprep.subr.bf16.mxu1 %v11234_v40  ;;  %v5401_v39 = vsub.s32 2, %v12597_v43  ;;  %v5405_v40 = vsub.s32 3, %v12597_v43 }
 0x2ce   : > { %5198 = vmatprep.subr.bf16.mxu0 %v11237_v41  ;;  %v11312_v41 = vld [vmem:[%s12541_s25 + $0x128c] ss:$56 sps:$4 sm:$0xff]  }
 0x2d0   : > { %5117 = vmatpush1.bf16.msra.mxu1 %v11232_v42  ;;  %v11315_v42 = vld [vmem:[%s12541_s25 + $0xb94] ss:$56 sps:$4 sm:$0xff]  }
 0x2d1   : > { %5199 = vmatpush1.bf16.msra.mxu0 %v11235_v44  ;;  %5118 = vmatprep.subr.bf16.mxu1 %v11240_v45  ;;  %v11310_v44 = vld [vmem:[%s12541_s25 + $0x1288] ss:$56 sps:$4 sm:$0xff]  }
 0x2d2   : > { %5200 = vmatprep.subr.bf16.mxu0 %v11243_v46  ;;  %v11313_v45 = vld [vmem:[%s12541_s25 + $0xb90] ss:$56 sps:$4 sm:$0xff]   ;;  %v5394_v46 = vrot.slane %v13266_v36, %v5393_v37 }
 0x2d4   : > { %5119 = vmatpush1.bf16.msra.mxu1 %v11238_v47  ;;  %v5398_v47 = vrot.slane %v13266_v36, %v5397_v38 }
 0x2d5   : > { %5201 = vmatpush1.bf16.msra.mxu0 %v11241_v48  ;;  %5120 = vmatprep.subr.bf16.mxu1 %v11246_v49  ;;  %v5402_v48 = vrot.slane %v13266_v36, %v5401_v39  ;;  %v5406_v49 = vrot.slane %v13266_v36, %v5405_v40 }
 0x2d6   : > { %5202 = vmatprep.subr.bf16.mxu0 %v11249_v50  ;;  %v11318_v50 = vld [vmem:[%s12541_s25 + $0x12fc] ss:$56 sps:$4 sm:$0xff]  }
 0x2d8   : > { %5121 = vmatpush1.bf16.msra.mxu1 %v11244_v52  ;;  %v11321_v52 = vld [vmem:[%s12541_s25 + $0xc04] ss:$56 sps:$4 sm:$0xff]  }
 0x2d9   : > { %5203 = vmatpush1.bf16.msra.mxu0 %v11247_v53  ;;  %5131 = vmatprep.subr.bf16.mxu1 %v11252_v54  ;;  %v11316_v53 = vld [vmem:[%s12541_s25 + $0x12f8] ss:$56 sps:$4 sm:$0xff]  }
 0x2da   : > { %5213 = vmatprep.subr.bf16.mxu0 %v11255_v55  ;;  %v11319_v54 = vld [vmem:[%s12541_s25 + $0xc00] ss:$56 sps:$4 sm:$0xff]   ;;  %v5447_v55 = vcombine.low %v5394_v46, %v5398_v47  ;;  %v11373_v46 = vld [vmem:[%s12552_s7 + $0x80] ss:$16 sps:$4 sm:$0xff]  }
 0x2db   : > { %5123 = vmatmul.mubr.bf16.vlgmr.msra.gmra.mrb[12].mxu1 %v12649_v19  ;;  %v11378_v47 = vld [vmem:[%s12541_s25 + $0x1064] ss:$56 sps:$4 sm:$0xff]  }
 0x2dc   : > { %5205 = vmatmul.mubr.bf16.vlgmr.msra.gmra.mrb[12].mxu0 %v12641_v13  ;;  %5132 = vmatpush1.bf16.msra.mxu1 %v11250_v56  ;;  %v11270_v13 = vld [vmem:[%s12541_s25 + $0xf7c] ss:$56 sps:$4 sm:$0xff]   ;;  %v5448_v56 = vcombine.low %v5402_v48, %v5406_v49  ;;  %v11381_v48 = vld [vmem:[%s12552_s7 + $0xa4] ss:$16 sps:$4 sm:$0xff]  }
 0x2dd   : > { %5214 = vmatpush1.bf16.msra.mxu0 %v11253_v62  ;;  %5133 = vmatprep.subr.bf16.mxu1 %v11258_v57  ;;  %v11324_v62 = vld [vmem:[%s12541_s25 + $0x136c] ss:$56 sps:$4 sm:$0xff]   ;;  %v11376_v49 = vld [vmem:[%s12541_s25 + $0x1060] ss:$56 sps:$4 sm:$0xff]  }
 0x2de   : > { %5215 = vmatprep.subr.bf16.mxu0 %v11261_v58  ;;  %5163 = vmatprep.mubr.bf16.mxu1 %v12655_v23  ;;  %v11327_v57 = vld [vmem:[%s12541_s25 + $0xc74] ss:$56 sps:$4 sm:$0xff]   ;;  %v11322_v58 = vld [vmem:[%s12541_s25 + $0x1368] ss:$56 sps:$4 sm:$0xff]  }
 0x2df   : > { %5245 = vmatprep.mubr.bf16.mxu0 %v12627_v3  ;;  %v11276_v3 = vld [vmem:[%s12541_s25 + $0xfec] ss:$56 sps:$4 sm:$0xff]  }
 0x2e0   : > { %5134 = vmatpush1.bf16.msra.mxu1 %v11256_v59  ;;  %v11325_v59 = vld [vmem:[%s12541_s25 + $0xc70] ss:$56 sps:$4 sm:$0xff]  }
 0x2e1   : > { %5216 = vmatpush1.bf16.msra.mxu0 %v11259_v60  ;;  %5135 = vmatprep.subr.bf16.mxu1 %v11264_v61  ;;  %v5455_v60 = vrot.slane %v5447_v55, %v13102_v51  ;;  %v5462_v61 = vrot.slane %v5448_v56, %v13102_v51 }
 0x2e2   : > { %5217 = vmatprep.subr.bf16.mxu0 %v11267_v0  ;;  %v11330_v0 = vld [vmem:[%s12541_s25 + $0x13dc] ss:$56 sps:$4 sm:$0xff]  }
 0x2e4   : > { %5136 = vmatpush1.bf16.msra.mxu1 %v11262_v1  ;;  %v11333_v1 = vld [vmem:[%s12541_s25 + $0xce4] ss:$56 sps:$4 sm:$0xff]  }
 0x2e5   : > { %5218 = vmatpush1.bf16.msra.mxu0 %v11265_v2  ;;  %5137 = vmatprep.subr.bf16.mxu1 %v11270_v13  ;;  %v5463_v2 = vcombine.low %v5455_v60, %v5462_v61  ;;  %v11328_v13 = vld [vmem:[%s12541_s25 + $0x13d8] ss:$56 sps:$4 sm:$0xff]   ;;  %v11390_v60 = vld [vmem:[%s12541_s25 + $0x1144] ss:$56 sps:$4 sm:$0xff]  }
 0x2e6   : > { %5219 = vmatprep.subr.bf16.mxu0 %v11273_v4  ;;  %v11331_v4 = vld [vmem:[%s12541_s25 + $0xce0] ss:$56 sps:$4 sm:$0xff]  }
 0x2e7   : > { %v11393_v61 = vld [vmem:[%s12552_s7 + $0xe4] ss:$16 sps:$4 sm:$0xff]  }
 0x2e8   : > { %5138 = vmatpush1.bf16.msra.mxu1 %v11268_v7  ;;  %v5383_v7 = vld [vmem:[#allocation2] sm:$0xff] }
 0x2e9   : > { %5220 = vmatpush1.bf16.msra.mxu0 %v11271_v24  ;;  %5139 = vmatprep.subr.bf16.mxu1 %v11276_v3  ;;  %v11336_v24 = vld [vmem:[%s12541_s25 + $0x144c] ss:$56 sps:$4 sm:$0xff]  }
 0x2ea   : > { %5221 = vmatprep.subr.bf16.mxu0 %v11279_v5  ;;  %v11339_v3 = vld [vmem:[%s12541_s25 + $0xd54] ss:$56 sps:$4 sm:$0xff]   ;;  %v13304_v5 = vadd.f32 %v5463_v2, %v5383_v7 }
 0x2eb   : > { %v11396_v7 = vld [vmem:[%s12541_s25 + $0x11b4] ss:$56 sps:$4 sm:$0xff]  }
 0x2ec   : > { %5140 = vmatpush1.bf16.msra.mxu1 %v11274_v9  ;;  %v11334_v9 = vld [vmem:[%s12541_s25 + $0x1448] ss:$56 sps:$4 sm:$0xff]  }
 0x2ed   : > { %5222 = vmatpush1.bf16.msra.mxu0 %v11277_v11  ;;  %5141 = vmatprep.subr.bf16.mxu1 %v11282_v12  ;;  %v11337_v11 = vld [vmem:[%s12541_s25 + $0xd50] ss:$56 sps:$4 sm:$0xff]   ;;  %v11342_v12 = vld [vmem:[%s12541_s25 + $0x14bc] ss:$56 sps:$4 sm:$0xff]  }
 0x2ee   : > { %5223 = vmatprep.subr.bf16.mxu0 %v11285_v14  ;;  %v11345_v14 = vld [vmem:[%s12541_s25 + $0xdc4] ss:$56 sps:$4 sm:$0xff]  }
 0x2f0   : > { %5142 = vmatpush1.bf16.msra.mxu1 %v11280_v15  ;;  %v13312_v15 = vrot.slane %v13304_v5, %v13102_v51 }
 0x2f1   : > { %5224 = vmatpush1.bf16.msra.mxu0 %v11283_v16  ;;  %5143 = vmatprep.subr.bf16.mxu1 %v11288_v17  ;;  %v11340_v16 = vld [vmem:[%s12541_s25 + $0x14b8] ss:$56 sps:$4 sm:$0xff]  }
 0x2f2   : > { %5225 = vmatprep.subr.bf16.mxu0 %v11291_v18  ;;  %v11343_v17 = vld [vmem:[%s12541_s25 + $0xdc0] ss:$56 sps:$4 sm:$0xff]   ;;  %v11348_v18 = vld [vmem:[%s12541_s25 + $0xe34] ss:$56 sps:$4 sm:$0xff]  }
 0x2f4   : > { %5144 = vmatpush1.bf16.msra.mxu1 %v11286_v20  ;;  %v11351_v20 = vld [vmem:[%s12552_s7 + $0x4] ss:$16 sps:$4 sm:$0xff]  }
 0x2f5   : > { %5226 = vmatpush1.bf16.msra.mxu0 %v11289_v21  ;;  %5145 = vmatprep.subr.bf16.mxu1 %v11294_v22  ;;  %v5533_v21 = vcombine.high %v13312_v15, %v13312_v15  ;;  %v11346_v22 = vld [vmem:[%s12541_s25 + $0xe30] ss:$56 sps:$4 sm:$0xff]  }
 0x2f6   : > { %5227 = vmatprep.subr.bf16.mxu0 %v11297_v25  ;;  %v11349_v25 = vld [vmem:[%s12552_s7] ss:$16 sps:$4 sm:$0xff]  }
 0x2f8   : > { %5146 = vmatpush1.bf16.msra.mxu1 %v11292_v26  ;;  %v11354_v26 = vld [vmem:[%s12541_s25 + $0xea4] ss:$56 sps:$4 sm:$0xff]  }
 0x2f9   : > { %5228 = vmatpush1.bf16.msra.mxu0 %v11295_v28  ;;  %5147 = vmatprep.subr.bf16.mxu1 %v11300_v29  ;;  %v11357_v28 = vld [vmem:[%s12552_s7 + $0x24] ss:$16 sps:$4 sm:$0xff]   ;;  %v13326_v29 = vpack.c.bf16 %v5533_v21, %v5533_v21 }
 0x2fa   : > { %5229 = vmatprep.subr.bf16.mxu0 %v11303_v30  ;;  %v11352_v30 = vld [vmem:[%s12541_s25 + $0xea0] ss:$56 sps:$4 sm:$0xff]  }
 0x2fb   : > { %v11412_v21 = vld [vmem:[%s12541_s25 + $0x1300] ss:$56 sps:$4 sm:$0xff]  }
 0x2fc   : > { %5148 = vmatpush1.bf16.msra.mxu1 %v11298_v31  ;;  %v11355_v31 = vld [vmem:[%s12552_s7 + $0x20] ss:$16 sps:$4 sm:$0xff]  }
 0x2fd   : > { %5230 = vmatpush1.bf16.msra.mxu0 %v11301_v32  ;;  %5149 = vmatprep.subr.bf16.mxu1 %v11306_v6  ;;  %v11360_v32 = vld [vmem:[%s12541_s25 + $0xf14] ss:$56 sps:$4 sm:$0xff]   ;;  %v11363_v6 = vld [vmem:[%s12552_s7 + $0x44] ss:$16 sps:$4 sm:$0xff]  }
 0x2fe   : > { %5231 = vmatprep.subr.bf16.mxu0 %v11309_v33  ;;  %v11361_v33 = vld [vmem:[%s12552_s7 + $0x40] ss:$16 sps:$4 sm:$0xff]  }
 0x300   : > { %5150 = vmatpush1.bf16.msra.mxu1 %v11304_v34  ;;  %v11366_v34 = vld [vmem:[%s12541_s25 + $0xf84] ss:$56 sps:$4 sm:$0xff]  }
 0x301   : > { %5232 = vmatpush1.bf16.msra.mxu0 %v11307_v35  ;;  %5151 = vmatprep.subr.bf16.mxu1 %v11312_v41  ;;  %v11369_v35 = vld [vmem:[%s12552_s7 + $0x64] ss:$16 sps:$4 sm:$0xff]  }
 0x302   : > { %5233 = vmatprep.subr.bf16.mxu0 %v11315_v42  ;;  %v11364_v41 = vld [vmem:[%s12541_s25 + $0xf80] ss:$56 sps:$4 sm:$0xff]   ;;  %v11367_v42 = vld [vmem:[%s12552_s7 + $0x60] ss:$16 sps:$4 sm:$0xff]  }
 0x304   : > { %5152 = vmatpush1.bf16.msra.mxu1 %v11310_v44  ;;  %v11375_v44 = vld [vmem:[%s12552_s7 + $0x84] ss:$16 sps:$4 sm:$0xff]  }
 0x305   : > { %5234 = vmatpush1.bf16.msra.mxu0 %v11313_v45  ;;  %5153 = vmatprep.subr.bf16.mxu1 %v11318_v50  ;;  %v11370_v45 = vld [vmem:[%s12541_s25 + $0xff0] ss:$56 sps:$4 sm:$0xff]   ;;  %v11379_v50 = vld [vmem:[%s12552_s7 + $0xa0] ss:$16 sps:$4 sm:$0xff]  }
 0x306   : > { %5235 = vmatprep.subr.bf16.mxu0 %v11321_v52  ;;  %v11384_v52 = vld [vmem:[%s12541_s25 + $0x10d4] ss:$56 sps:$4 sm:$0xff]  }
 0x308   : > { %5154 = vmatpush1.bf16.msra.mxu1 %v11316_v53  ;;  %v11387_v53 = vld [vmem:[%s12552_s7 + $0xc4] ss:$16 sps:$4 sm:$0xff]  }
 0x309   : > { %5236 = vmatpush1.bf16.msra.mxu0 %v11319_v54  ;;  %5155 = vmatprep.subr.bf16.mxu1 %v11324_v62 }
 0x30a   : > { %5237 = vmatprep.subr.bf16.mxu0 %v11327_v57  ;;  %v11382_v57 = vld [vmem:[%s12541_s25 + $0x10d0] ss:$56 sps:$4 sm:$0xff]  }
 0x30c   : > { %5156 = vmatpush1.bf16.msra.mxu1 %v11322_v58  ;;  %v11385_v58 = vld [vmem:[%s12552_s7 + $0xc0] ss:$16 sps:$4 sm:$0xff]  }
 0x30d   : > { %5238 = vmatpush1.bf16.msra.mxu0 %v11325_v59  ;;  %5157 = vmatprep.subr.bf16.mxu1 %v11330_v0  ;;  %v13358_v0 = vrot.slane %v5326_v10, %v13102_v51  ;;  %v11397_v10 = vld [vmem:[%s12552_s7 + $0x100] ss:$16 sps:$4 sm:$0xff]  }
 0x30e   : > { %5239 = vmatprep.subr.bf16.mxu0 %v11333_v1 }
 0x310   : > { %5158 = vmatpush1.bf16.msra.mxu1 %v11328_v13  ;;  %v11388_v13 = vld [vmem:[%s12541_s25 + $0x1140] ss:$56 sps:$4 sm:$0xff]  }
 0x311   : > { %5240 = vmatpush1.bf16.msra.mxu0 %v11331_v4  ;;  %5159 = vmatprep.subr.bf16.mxu1 %v11336_v24  ;;  %v11391_v4 = vld [vmem:[%s12552_s7 + $0xe0] ss:$16 sps:$4 sm:$0xff]  }
 0x312   : > { %5241 = vmatprep.subr.bf16.mxu0 %v11339_v3  ;;  %v11402_v24 = vld [vmem:[%s12541_s25 + $0x1224] ss:$56 sps:$4 sm:$0xff]   ;;  %v11405_v3 = vld [vmem:[%s12552_s7 + $0x124] ss:$16 sps:$4 sm:$0xff]  }
 0x314   : > { %5160 = vmatpush1.bf16.msra.mxu1 %v11334_v9  ;;  %v11400_v9 = vld [vmem:[%s12541_s25 + $0x1220] ss:$56 sps:$4 sm:$0xff]  }
 0x315   : > { %5242 = vmatpush1.bf16.msra.mxu0 %v11337_v11  ;;  %5161 = vmatprep.subr.bf16.mxu1 %v11342_v12  ;;  %v11403_v11 = vld [vmem:[%s12552_s7 + $0x120] ss:$16 sps:$4 sm:$0xff]  }
 0x316   : > { %5243 = vmatprep.subr.bf16.mxu0 %v11345_v14  ;;  %v11408_v12 = vld [vmem:[%s12541_s25 + $0x1294] ss:$56 sps:$4 sm:$0xff]   ;;  %v11411_v14 = vld [vmem:[%s12552_s7 + $0x144] ss:$16 sps:$4 sm:$0xff]  }
 0x318   : > { %5162 = vmatpush1.bf16.msra.mxu1 %v11340_v16  ;;  %v11406_v16 = vld [vmem:[%s12541_s25 + $0x1290] ss:$56 sps:$4 sm:$0xff]  }
 0x319   : > { %5244 = vmatpush1.bf16.msra.mxu0 %v11343_v17  ;;  %8293 = vmatprep.subr.bf16.mxu1 %v11351_v20  ;;  %v11409_v17 = vld [vmem:[%s12552_s7 + $0x140] ss:$16 sps:$4 sm:$0xff]   ;;  %v11417_v20 = vld [vmem:[%s12552_s7 + $0x164] ss:$16 sps:$4 sm:$0xff]  }
 0x31a   : > { %5254 = vmatprep.subr.bf16.mxu0 %v11348_v18  ;;  %v11414_v18 = vld [vmem:[%s12541_s25 + $0x1304] ss:$56 sps:$4 sm:$0xff]  }
 0x31b   : > { %5164 = vmatmul.mubr.bf16.vlgmr.msra.gmra.mrb[12].mxu1 %v12620_v63 }
 0x31c   : > { %5246 = vmatmul.mubr.bf16.vlgmr.msra.gmra.mrb[12].mxu0 %v12649_v19  ;;  %8294 = vmatpush1.bf16.msra.mxu1 %v11349_v25  ;;  %v11358_v19 = vld [vmem:[%s12541_s25 + $0xf10] ss:$56 sps:$4 sm:$0xff]   ;;  %v11420_v25 = vld [vmem:[%s12541_s25 + $0x1374] ss:$56 sps:$4 sm:$0xff]  }
 0x31d   : > { %5255 = vmatpush1.bf16.msra.mxu0 %v11346_v22  ;;  %8325 = vmatprep.mubr.bf16.mxu1 %v13326_v29  ;;  %v11415_v22 = vld [vmem:[%s12552_s7 + $0x160] ss:$16 sps:$4 sm:$0xff]  }
 0x31e   : > { %5256 = vmatprep.subr.bf16.mxu0 %v11354_v26  ;;  %8295 = vmatprep.subr.bf16.mxu1 %v11357_v28  ;;  %v11423_v26 = vld [vmem:[%s12552_s7 + $0x184] ss:$16 sps:$4 sm:$0xff]  }
 0x31f   : > { %5286 = vmatprep.mubr.bf16.mxu0 %v12655_v23  ;;  %v11372_v23 = vld [vmem:[%s12541_s25 + $0xff4] ss:$56 sps:$4 sm:$0xff]   ;;  %v11418_v28 = vld [vmem:[%s12541_s25 + $0x1370] ss:$56 sps:$4 sm:$0xff]  }
 0x320   : > { %8296 = vmatpush1.bf16.msra.mxu1 %v11355_v31  ;;  %v11426_v31 = vld [vmem:[%s12541_s25 + $0x13e4] ss:$56 sps:$4 sm:$0xff]  }
 0x321   : > { %5257 = vmatpush1.bf16.msra.mxu0 %v11352_v30  ;;  %8297 = vmatprep.subr.bf16.mxu1 %v11363_v6  ;;  %v11421_v30 = vld [vmem:[%s12552_s7 + $0x180] ss:$16 sps:$4 sm:$0xff]   ;;  %v11424_v6 = vld [vmem:[%s12541_s25 + $0x13e0] ss:$56 sps:$4 sm:$0xff]  }
 0x322   : > { %5258 = vmatprep.subr.bf16.mxu0 %v11360_v32  ;;  %v11429_v32 = vld [vmem:[%s12552_s7 + $0x1a4] ss:$16 sps:$4 sm:$0xff]  }
 0x324   : > { %8298 = vmatpush1.bf16.msra.mxu1 %v11361_v33  ;;  %v11432_v33 = vld [vmem:[%s12541_s25 + $0x1454] ss:$56 sps:$4 sm:$0xff]  }
 0x325   : > { %5259 = vmatpush1.bf16.msra.mxu0 %v11358_v19  ;;  %8299 = vmatprep.subr.bf16.mxu1 %v11369_v35  ;;  %v11427_v19 = vld [vmem:[%s12552_s7 + $0x1a0] ss:$16 sps:$4 sm:$0xff]   ;;  %v5518_v35 = vcombine.high %v13304_v5, %v13304_v5 }
 0x326   : > { %5260 = vmatprep.subr.bf16.mxu0 %v11366_v34  ;;  %v11435_v34 = vld [vmem:[%s12552_s7 + $0x1c4] ss:$16 sps:$4 sm:$0xff]   ;;  %v11439_v5 = vld [vmem:[%s12552_s7 + $0x1e0] ss:$16 sps:$4 sm:$0xff]  }
 0x328   : > { %8300 = vmatpush1.bf16.msra.mxu1 %v11367_v42  ;;  %v11433_v42 = vld [vmem:[%s12552_s7 + $0x1c0] ss:$16 sps:$4 sm:$0xff]  }
 0x329   : > { %5261 = vmatpush1.bf16.msra.mxu0 %v11364_v41  ;;  %8301 = vmatprep.subr.bf16.mxu1 %v11375_v44  ;;  %v11430_v41 = vld [vmem:[%s12541_s25 + $0x1450] ss:$56 sps:$4 sm:$0xff]  }
 0x32a   : > { %5262 = vmatprep.subr.bf16.mxu0 %v11372_v23  ;;  %v11438_v23 = vld [vmem:[%s12541_s25 + $0x14c4] ss:$56 sps:$4 sm:$0xff]   ;;  %v11441_v44 = vld [vmem:[%s12552_s7 + $0x1e4] ss:$16 sps:$4 sm:$0xff]  }
 0x32c   : > { %8302 = vmatpush1.bf16.msra.mxu1 %v11373_v46  ;;  %v11436_v46 = vld [vmem:[%s12541_s25 + $0x14c0] ss:$56 sps:$4 sm:$0xff]  }
 0x32d   : > { %5263 = vmatpush1.bf16.msra.mxu0 %v11370_v45  ;;  %8303 = vmatprep.subr.bf16.mxu1 %v11381_v48  ;;  %v13400_v45 = vrot.slane %v5518_v35, %v13102_v51  ;;  %v11447_v48 = vld [vmem:[%s12552_s7 + $0xc] ss:$16 sps:$4 sm:$0xff]   ;;  %v5409_v35 = vsub.s32 4, %v12597_v43 }
 0x32e   : > { %5264 = vmatprep.subr.bf16.mxu0 %v11378_v47  ;;  %v4919_v54 = vpop.f32.mrb[8].mxu1  ;;  %v11444_v47 = vld [vmem:[%s12552_s7 + $0x204] ss:$16 sps:$4 sm:$0xff]  }
 0x32f   : > { %v4921_v55 = vpop.f32.mrb[9].mxu1 }
 0x330   : > { %v5327_v56 = vcombine.low %v4919_v54, %v4921_v55  ;;  %v4923_v62 = vpop.f32.mrb[10].mxu1  ;;  %8304 = vmatpush1.bf16.msra.mxu1 %v11379_v50  ;;  %v11442_v50 = vld [vmem:[%s12552_s7 + $0x200] ss:$16 sps:$4 sm:$0xff]   ;;  %v11450_v55 = vld [vmem:[%s12552_s7 + $0x224] ss:$16 sps:$4 sm:$0xff]  }
 0x331   : > { %5265 = vmatpush1.bf16.msra.mxu0 %v11376_v49  ;;  %v4924_v59 = vpop.f32.mrb[11].mxu1  ;;  %8305 = vmatprep.subr.bf16.mxu1 %v11387_v53  ;;  %v5534_v49 = vcombine.high %v13400_v45, %v13400_v45  ;;  %v11445_v53 = vld [vmem:[%s12552_s7 + $0x8] ss:$16 sps:$4 sm:$0xff]  }
 0x332   : > { %5266 = vmatprep.subr.bf16.mxu0 %v11384_v52  ;;  %v13361_v1 = vrot.slane %v5327_v56, %v13102_v51  ;;  %v13411_v52 = vpack.c.bf16 %v13312_v15, %v13312_v15  ;;  %v11453_v56 = vld [vmem:[%s12552_s7 + $0x2c] ss:$16 sps:$4 sm:$0xff]   ;;  %v11448_v15 = vld [vmem:[%s12552_s7 + $0x220] ss:$16 sps:$4 sm:$0xff]   ;;  %v11451_v62 = vld [vmem:[%s12552_s7 + $0x28] ss:$16 sps:$4 sm:$0xff]  }
 0x333   : > { %v13414_v54 = vpack.c.bf16 %v5534_v49, %v5534_v49  ;;  %v11457_v59 = vld [vmem:[%s12552_s7 + $0x48] ss:$16 sps:$4 sm:$0xff]  }
 0x334   : > { %v5342_v2 = vcombine.low %v13358_v0, %v13361_v1  ;;  %8306 = vmatpush1.bf16.msra.mxu1 %v11385_v58  ;;  %v11454_v58 = vld [vmem:[%s12552_s7 + $0x240] ss:$16 sps:$4 sm:$0xff]   ;;  %v11535_v1 = vld [vmem:[%s12552_s7 + $0x1e8] ss:$16 sps:$4 sm:$0xff]  }
 0x335   : > { %5267 = vmatpush1.bf16.msra.mxu0 %v11382_v57  ;;  %8307 = vmatprep.subr.bf16.mxu1 %v11393_v61  ;;  %v11456_v57 = vld [vmem:[%s12552_s7 + $0x244] ss:$16 sps:$4 sm:$0xff]   ;;  %v11465_v61 = vld [vmem:[%s12552_s7 + $0x6c] ss:$16 sps:$4 sm:$0xff]   ;;  %v11532_v0 = vld [vmem:[%s12552_s7 + $0x3e0] ss:$16 sps:$4 sm:$0xff]  }
 0x336   : > { %5268 = vmatprep.subr.bf16.mxu0 %v11390_v60  ;;  %v11462_v60 = vld [vmem:[%s12552_s7 + $0x264] ss:$16 sps:$4 sm:$0xff]  }
 0x338   : > { %8308 = vmatpush1.bf16.msra.mxu1 %v11391_v4  ;;  %v11468_v4 = vld [vmem:[%s12552_s7 + $0x284] ss:$16 sps:$4 sm:$0xff]  }
 0x339   : > { %5269 = vmatpush1.bf16.msra.mxu0 %v11388_v13  ;;  %8309 = vmatprep.subr.bf16.mxu1 %v11399_v8  ;;  %v11463_v13 = vld [vmem:[%s12552_s7 + $0x68] ss:$16 sps:$4 sm:$0xff]   ;;  %v11466_v8 = vld [vmem:[%s12552_s7 + $0x280] ss:$16 sps:$4 sm:$0xff]  }
 0x33a   : > { %5270 = vmatprep.subr.bf16.mxu0 %v11396_v7  ;;  %v11471_v7 = vld [vmem:[%s12552_s7 + $0x8c] ss:$16 sps:$4 sm:$0xff]  }
 0x33c   : > { %8310 = vmatpush1.bf16.msra.mxu1 %v11397_v10  ;;  %v11474_v10 = vld [vmem:[%s12552_s7 + $0x2a4] ss:$16 sps:$4 sm:$0xff]  }
 0x33d   : > { %5271 = vmatpush1.bf16.msra.mxu0 %v11394_v27  ;;  %8311 = vmatprep.subr.bf16.mxu1 %v11405_v3  ;;  %v11469_v27 = vld [vmem:[%s12552_s7 + $0x88] ss:$16 sps:$4 sm:$0xff]   ;;  %v11472_v3 = vld [vmem:[%s12552_s7 + $0x2a0] ss:$16 sps:$4 sm:$0xff]  }
 0x33e   : > { %5272 = vmatprep.subr.bf16.mxu0 %v11402_v24  ;;  %v11477_v24 = vld [vmem:[%s12552_s7 + $0xac] ss:$16 sps:$4 sm:$0xff]  }
 0x340   : > { %8312 = vmatpush1.bf16.msra.mxu1 %v11403_v11  ;;  %v11480_v11 = vld [vmem:[%s12552_s7 + $0x2c4] ss:$16 sps:$4 sm:$0xff]  }
 0x341   : > { %5273 = vmatpush1.bf16.msra.mxu0 %v11400_v9  ;;  %8313 = vmatprep.subr.bf16.mxu1 %v11411_v14  ;;  %v11475_v9 = vld [vmem:[%s12552_s7 + $0xa8] ss:$16 sps:$4 sm:$0xff]   ;;  %v11483_v14 = vld [vmem:[%s12552_s7 + $0xcc] ss:$16 sps:$4 sm:$0xff]  }
 0x342   : > { %5274 = vmatprep.subr.bf16.mxu0 %v11408_v12 }
 0x344   : > { %8314 = vmatpush1.bf16.msra.mxu1 %v11409_v17 }
 0x345   : > { %5275 = vmatpush1.bf16.msra.mxu0 %v11406_v16  ;;  %8315 = vmatprep.subr.bf16.mxu1 %v11417_v20  ;;  %v11478_v20 = vld [vmem:[%s12552_s7 + $0x2c0] ss:$16 sps:$4 sm:$0xff]  }
 0x346   : > { %5276 = vmatprep.subr.bf16.mxu0 %v11414_v18 }
 0x348   : > { %8316 = vmatpush1.bf16.msra.mxu1 %v11415_v22  ;;  %v11481_v22 = vld [vmem:[%s12552_s7 + $0xc8] ss:$16 sps:$4 sm:$0xff]  }
 0x349   : > { %5277 = vmatpush1.bf16.msra.mxu0 %v11412_v21  ;;  %8317 = vmatprep.subr.bf16.mxu1 %v11423_v26  ;;  %v11489_v26 = vld [vmem:[%s12552_s7 + $0xec] ss:$16 sps:$4 sm:$0xff]  }
 0x34a   : > { %5278 = vmatprep.subr.bf16.mxu0 %v11420_v25  ;;  %v11486_v25 = vld [vmem:[%s12552_s7 + $0x2e4] ss:$16 sps:$4 sm:$0xff]  }
 0x34c   : > { %8318 = vmatpush1.bf16.msra.mxu1 %v11421_v30  ;;  %v11487_v30 = vld [vmem:[%s12552_s7 + $0xe8] ss:$16 sps:$4 sm:$0xff]  }
 0x34d   : > { %5279 = vmatpush1.bf16.msra.mxu0 %v11418_v28  ;;  %8319 = vmatprep.subr.bf16.mxu1 %v11429_v32  ;;  %v11484_v28 = vld [vmem:[%s12552_s7 + $0x2e0] ss:$16 sps:$4 sm:$0xff]   ;;  %v11495_v32 = vld [vmem:[%s12552_s7 + $0x10c] ss:$16 sps:$4 sm:$0xff]  }
 0x34e   : > { %5280 = vmatprep.subr.bf16.mxu0 %v11426_v31  ;;  %v11492_v31 = vld [vmem:[%s12552_s7 + $0x304] ss:$16 sps:$4 sm:$0xff]  }
 0x350   : > { %8320 = vmatpush1.bf16.msra.mxu1 %v11427_v19  ;;  %v11493_v19 = vld [vmem:[%s12552_s7 + $0x108] ss:$16 sps:$4 sm:$0xff]  }
 0x351   : > { %5281 = vmatpush1.bf16.msra.mxu0 %v11424_v6  ;;  %8321 = vmatprep.subr.bf16.mxu1 %v11435_v34  ;;  %v11490_v6 = vld [vmem:[%s12552_s7 + $0x300] ss:$16 sps:$4 sm:$0xff]   ;;  %v11501_v34 = vld [vmem:[%s12552_s7 + $0x12c] ss:$16 sps:$4 sm:$0xff]  }
 0x352   : > { %5282 = vmatprep.subr.bf16.mxu0 %v11432_v33  ;;  %v11498_v33 = vld [vmem:[%s12552_s7 + $0x324] ss:$16 sps:$4 sm:$0xff]  }
 0x354   : > { %8322 = vmatpush1.bf16.msra.mxu1 %v11433_v42  ;;  %v5417_v42 = vsub.s32 6, %v12597_v43 }
 0x355   : > { %5283 = vmatpush1.bf16.msra.mxu0 %v11430_v41  ;;  %8323 = vmatprep.subr.bf16.mxu1 %v11441_v44  ;;  %v5413_v41 = vsub.s32 5, %v12597_v43  ;;  %v11496_v44 = vld [vmem:[%s12552_s7 + $0x320] ss:$16 sps:$4 sm:$0xff]  }
 0x356   : > { %5284 = vmatprep.subr.bf16.mxu0 %v11438_v23  ;;  %v5421_v23 = vsub.s32 7, %v12597_v43  ;;  %v11901_v43 = vld [vmem:[%s12552_s7 + $0x988] ss:$16 sps:$4 sm:$0xff]  }
 0x357   : > { %v5414_v49 = vrot.slane %v13266_v36, %v5413_v41 }
 0x358   : > { %8324 = vmatpush1.bf16.msra.mxu1 %v11439_v5  ;;  %v11504_v5 = vld [vmem:[%s12552_s7 + $0x344] ss:$16 sps:$4 sm:$0xff]  }
 0x359   : > { %5285 = vmatpush1.bf16.msra.mxu0 %v11436_v46  ;;  %8334 = vmatprep.subr.bf16.mxu1 %v11444_v47  ;;  %v11499_v46 = vld [vmem:[%s12552_s7 + $0x128] ss:$16 sps:$4 sm:$0xff]   ;;  %v11507_v47 = vld [vmem:[%s12552_s7 + $0x14c] ss:$16 sps:$4 sm:$0xff]  }
 0x35a   : > { %8580 = vmatprep.subr.bf16.mxu0 %v11447_v48  ;;  %v5410_v48 = vrot.slane %v13266_v36, %v5409_v35 }
 0x35b   : > { %8326 = vmatmul.mubr.bf16.vlgmr.msra.gmra.mrb[16].mxu1 %v13411_v52 }
 0x35c   : > { %5287 = vmatmul.mubr.bf16.vlgmr.msra.gmra.mrb[12].mxu0 %v12620_v63  ;;  %8335 = vmatpush1.bf16.msra.mxu1 %v11442_v50  ;;  %v11459_v63 = vld [vmem:[%s12552_s7 + $0x4c] ss:$16 sps:$4 sm:$0xff]   ;;  %v5418_v50 = vrot.slane %v13266_v36, %v5417_v42 }
 0x35d   : > { %8366 = vmatprep.mubr.bf16.mxu1 %v13414_v54  ;;  %8581 = vmatpush1.bf16.msra.mxu0 %v11445_v53  ;;  %v5422_v53 = vrot.slane %v13266_v36, %v5421_v23  ;;  %v11511_v36 = vld [vmem:[%s12552_s7 + $0x168] ss:$16 sps:$4 sm:$0xff]   ;;  %v11555_v42 = vld [vmem:[%s12552_s7 + $0x24c] ss:$16 sps:$4 sm:$0xff]  }
 0x35e   : > { %8612 = vmatprep.mubr.bf16.mxu0 %v13326_v29  ;;  %8336 = vmatprep.subr.bf16.mxu1 %v11450_v55  ;;  %v11460_v29 = vld [vmem:[%s12552_s7 + $0x260] ss:$16 sps:$4 sm:$0xff]   ;;  %v11553_v23 = vld [vmem:[%s12552_s7 + $0x248] ss:$16 sps:$4 sm:$0xff]  }
 0x35f   : > { %8582 = vmatprep.subr.bf16.mxu0 %v11453_v56  ;;  %v11502_v55 = vld [vmem:[%s12552_s7 + $0x340] ss:$16 sps:$4 sm:$0xff]   ;;  %v11505_v56 = vld [vmem:[%s12552_s7 + $0x148] ss:$16 sps:$4 sm:$0xff]  }
 0x360   : > { %8337 = vmatpush1.bf16.msra.mxu1 %v11448_v15  ;;  %v11510_v15 = vld [vmem:[%s12552_s7 + $0x364] ss:$16 sps:$4 sm:$0xff]  }
 0x361   : > { %8583 = vmatpush1.bf16.msra.mxu0 %v11451_v62  ;;  %8338 = vmatprep.subr.bf16.mxu1 %v11456_v57  ;;  %v11513_v62 = vld [vmem:[%s12552_s7 + $0x16c] ss:$16 sps:$4 sm:$0xff]   ;;  %v5464_v57 = vcombine.low %v5410_v48, %v5414_v49  ;;  %v11562_v49 = vld [vmem:[%s12552_s7 + $0x480] ss:$16 sps:$4 sm:$0xff]  }
 0x362   : > { %8584 = vmatprep.subr.bf16.mxu0 %v11459_v63  ;;  %v5465_v63 = vcombine.low %v5418_v50, %v5422_v53  ;;  %v11567_v48 = vld [vmem:[%s12552_s7 + $0x28c] ss:$16 sps:$4 sm:$0xff]   ;;  %v11565_v50 = vld [vmem:[%s12552_s7 + $0x288] ss:$16 sps:$4 sm:$0xff]   ;;  %v11570_v53 = vld [vmem:[%s12552_s7 + $0x4a4] ss:$16 sps:$4 sm:$0xff]  }
 0x364   : > { %8339 = vmatpush1.bf16.msra.mxu1 %v11454_v58  ;;  %v11508_v58 = vld [vmem:[%s12552_s7 + $0x360] ss:$16 sps:$4 sm:$0xff]  }
 0x365   : > { %8585 = vmatpush1.bf16.msra.mxu0 %v11457_v59  ;;  %8340 = vmatprep.subr.bf16.mxu1 %v11462_v60  ;;  %v11516_v59 = vld [vmem:[%s12552_s7 + $0x384] ss:$16 sps:$4 sm:$0xff]   ;;  %v11519_v60 = vld [vmem:[%s12552_s7 + $0x18c] ss:$16 sps:$4 sm:$0xff]  }
 0x366   : > { %8586 = vmatprep.subr.bf16.mxu0 %v11465_v61  ;;  %v5472_v61 = vrot.slane %v5464_v57, %v13102_v51  ;;  %v11579_v57 = vld [vmem:[%s12552_s7 + $0x2cc] ss:$16 sps:$4 sm:$0xff]  }
 0x368   : > { %8341 = vmatpush1.bf16.msra.mxu1 %v11460_v29  ;;  %v5479_v29 = vrot.slane %v5465_v63, %v13102_v51  ;;  %v11574_v63 = vld [vmem:[%s12552_s7 + $0x4c0] ss:$16 sps:$4 sm:$0xff]  }
 0x369   : > { %8587 = vmatpush1.bf16.msra.mxu0 %v11463_v13  ;;  %8342 = vmatprep.subr.bf16.mxu1 %v11468_v4  ;;  %v11514_v13 = vld [vmem:[%s12552_s7 + $0x380] ss:$16 sps:$4 sm:$0xff]   ;;  %v11517_v4 = vld [vmem:[%s12552_s7 + $0x188] ss:$16 sps:$4 sm:$0xff]  }
 0x36a   : > { %8588 = vmatprep.subr.bf16.mxu0 %v11471_v7  ;;  %v11522_v7 = vld [vmem:[%s12552_s7 + $0x3a4] ss:$16 sps:$4 sm:$0xff]  }
 0x36c   : > { %8343 = vmatpush1.bf16.msra.mxu1 %v11466_v8  ;;  %v11525_v8 = vld [vmem:[%s12552_s7 + $0x1ac] ss:$16 sps:$4 sm:$0xff]  }
 0x36d   : > { %8589 = vmatpush1.bf16.msra.mxu0 %v11469_v27  ;;  %8344 = vmatprep.subr.bf16.mxu1 %v11474_v10  ;;  %v5480_v27 = vcombine.low %v5472_v61, %v5479_v29  ;;  %v11520_v10 = vld [vmem:[%s12552_s7 + $0x3a0] ss:$16 sps:$4 sm:$0xff]   ;;  %v11583_v61 = vld [vmem:[%s12552_s7 + $0x2e8] ss:$16 sps:$4 sm:$0xff]   ;;  %v11588_v29 = vld [vmem:[%s12552_s7 + $0x504] ss:$16 sps:$4 sm:$0xff]  }
 0x36e   : > { %8590 = vmatprep.subr.bf16.mxu0 %v11477_v24  ;;  %v11523_v24 = vld [vmem:[%s12552_s7 + $0x1a8] ss:$16 sps:$4 sm:$0xff]  }
 0x36f   : > { %v13441_v12 = vpop.f32.mrb[8].mxu0 }
 0x370   : > { %v13444_v16 = vpop.f32.mrb[9].mxu0  ;;  %8345 = vmatpush1.bf16.msra.mxu1 %v11472_v3  ;;  %v11528_v3 = vld [vmem:[%s12552_s7 + $0x3c4] ss:$16 sps:$4 sm:$0xff]  }
 0x371   : > { %v5343_v17 = vcombine.low %v13441_v12, %v13444_v16  ;;  %v5046_v18 = vpop.f32.mrb[10].mxu0  ;;  %8591 = vmatpush1.bf16.msra.mxu0 %v11475_v9  ;;  %8346 = vmatprep.subr.bf16.mxu1 %v11480_v11  ;;  %v11531_v9 = vld [vmem:[%s12552_s7 + $0x1cc] ss:$16 sps:$4 sm:$0xff]   ;;  %v13497_v11 = vadd.f32 %v5480_v27, %v5342_v2  ;;  %v11540_v2 = vld [vmem:[%s12552_s7 + $0x404] ss:$16 sps:$4 sm:$0xff]  }
 0x372   : > { %v5047_v21 = vpop.f32.mrb[11].mxu0  ;;  %8592 = vmatprep.subr.bf16.mxu0 %v11483_v14  ;;  %v11526_v14 = vld [vmem:[%s12552_s7 + $0x3c0] ss:$16 sps:$4 sm:$0xff]   ;;  %v11529_v18 = vld [vmem:[%s12552_s7 + $0x1c8] ss:$16 sps:$4 sm:$0xff]  }
 0x373   : > { %v11537_v21 = vld [vmem:[%s12552_s7 + $0x1ec] ss:$16 sps:$4 sm:$0xff]   ;;  %v11679_v12 = vld [vmem:[%s12552_s7 + $0x4e8] ss:$16 sps:$4 sm:$0xff]   ;;  %v11684_v16 = vld [vmem:[%s12552_s7 + $0x704] ss:$16 sps:$4 sm:$0xff]  }
 0x374   : > { %8347 = vmatpush1.bf16.msra.mxu1 %v11478_v20  ;;  %v11534_v20 = vld [vmem:[%s12552_s7 + $0x3e4] ss:$16 sps:$4 sm:$0xff]   ;;  %v11597_v27 = vld [vmem:[%s12552_s7 + $0x32c] ss:$16 sps:$4 sm:$0xff]  }
 0x375   : > { %8593 = vmatpush1.bf16.msra.mxu0 %v11481_v22  ;;  %8348 = vmatprep.subr.bf16.mxu1 %v11486_v25  ;;  %v13505_v22 = vrot.slane %v13497_v11, %v13102_v51  ;;  %v11543_v25 = vld [vmem:[%s12552_s7 + $0x20c] ss:$16 sps:$4 sm:$0xff]  }
 0x376   : > { %8594 = vmatprep.subr.bf16.mxu0 %v11489_v26 }
 0x377   : > { %v5550_v26 = vcombine.high %v13505_v22, %v13505_v22 }
 0x378   : > { %8349 = vmatpush1.bf16.msra.mxu1 %v11484_v28  ;;  %v11538_v28 = vld [vmem:[%s12552_s7 + $0x400] ss:$16 sps:$4 sm:$0xff]  }
 0x379   : > { %8595 = vmatpush1.bf16.msra.mxu0 %v11487_v30  ;;  %8350 = vmatprep.subr.bf16.mxu1 %v11492_v31  ;;  %v13516_v30 = vpack.c.bf16 %v13400_v45, %v13400_v45  ;;  %v11541_v31 = vld [vmem:[%s12552_s7 + $0x208] ss:$16 sps:$4 sm:$0xff]  }
 0x37a   : > { %8596 = vmatprep.subr.bf16.mxu0 %v11495_v32  ;;  %v11546_v32 = vld [vmem:[%s12552_s7 + $0x424] ss:$16 sps:$4 sm:$0xff]   ;;  %v11547_v45 = vld [vmem:[%s12552_s7 + $0x228] ss:$16 sps:$4 sm:$0xff]  }
 0x37c   : > { %8351 = vmatpush1.bf16.msra.mxu1 %v11490_v6  ;;  %v13521_v6 = vpack.c.bf16 %v5550_v26, %v5550_v26  ;;  %v11610_v26 = vld [vmem:[%s12552_s7 + $0x580] ss:$16 sps:$4 sm:$0xff]  }
 0x37d   : > { %8597 = vmatpush1.bf16.msra.mxu0 %v11493_v19  ;;  %8352 = vmatprep.subr.bf16.mxu1 %v11498_v33  ;;  %v11549_v19 = vld [vmem:[%s12552_s7 + $0x22c] ss:$16 sps:$4 sm:$0xff]   ;;  %v11544_v33 = vld [vmem:[%s12552_s7 + $0x420] ss:$16 sps:$4 sm:$0xff]  }
 0x37e   : > { %8598 = vmatprep.subr.bf16.mxu0 %v11501_v34  ;;  %v11552_v34 = vld [vmem:[%s12552_s7 + $0x444] ss:$16 sps:$4 sm:$0xff]  }
 0x380   : > { %8353 = vmatpush1.bf16.msra.mxu1 %v11496_v44  ;;  %v11558_v44 = vld [vmem:[%s12552_s7 + $0x464] ss:$16 sps:$4 sm:$0xff]  }
 0x381   : > { %8599 = vmatpush1.bf16.msra.mxu0 %v11499_v46  ;;  %8354 = vmatprep.subr.bf16.mxu1 %v11504_v5  ;;  %v11561_v46 = vld [vmem:[%s12552_s7 + $0x26c] ss:$16 sps:$4 sm:$0xff]   ;;  %v11559_v5 = vld [vmem:[%s12552_s7 + $0x268] ss:$16 sps:$4 sm:$0xff]  }
 0x382   : > { %8600 = vmatprep.subr.bf16.mxu0 %v11507_v47  ;;  %v11564_v47 = vld [vmem:[%s12552_s7 + $0x484] ss:$16 sps:$4 sm:$0xff]  }
 0x384   : > { %8355 = vmatpush1.bf16.msra.mxu1 %v11502_v55  ;;  %v11573_v55 = vld [vmem:[%s12552_s7 + $0x2ac] ss:$16 sps:$4 sm:$0xff]  }
 0x385   : > { %8601 = vmatpush1.bf16.msra.mxu0 %v11505_v56  ;;  %8356 = vmatprep.subr.bf16.mxu1 %v11510_v15  ;;  %v11568_v56 = vld [vmem:[%s12552_s7 + $0x4a0] ss:$16 sps:$4 sm:$0xff]   ;;  %v11571_v15 = vld [vmem:[%s12552_s7 + $0x2a8] ss:$16 sps:$4 sm:$0xff]  }
 0x386   : > { %8602 = vmatprep.subr.bf16.mxu0 %v11513_v62  ;;  %v11576_v62 = vld [vmem:[%s12552_s7 + $0x4c4] ss:$16 sps:$4 sm:$0xff]  }
 0x388   : > { %8357 = vmatpush1.bf16.msra.mxu1 %v11508_v58  ;;  %v11577_v58 = vld [vmem:[%s12552_s7 + $0x2c8] ss:$16 sps:$4 sm:$0xff]  }
 0x389   : > { %8603 = vmatpush1.bf16.msra.mxu0 %v11511_v36  ;;  %8358 = vmatprep.subr.bf16.mxu1 %v11516_v59  ;;  %v11582_v36 = vld [vmem:[%s12552_s7 + $0x4e4] ss:$16 sps:$4 sm:$0xff]   ;;  %v11585_v59 = vld [vmem:[%s12552_s7 + $0x2ec] ss:$16 sps:$4 sm:$0xff]  }
 0x38a   : > { %8604 = vmatprep.subr.bf16.mxu0 %v11519_v60  ;;  %v11580_v60 = vld [vmem:[%s12552_s7 + $0x4e0] ss:$16 sps:$4 sm:$0xff]  }
 0x38c   : > { %8359 = vmatpush1.bf16.msra.mxu1 %v11514_v13  ;;  %v11591_v13 = vld [vmem:[%s12552_s7 + $0x30c] ss:$16 sps:$4 sm:$0xff]  }
 0x38d   : > { %8605 = vmatpush1.bf16.msra.mxu0 %v11517_v4  ;;  %8360 = vmatprep.subr.bf16.mxu1 %v11522_v7  ;;  %v11586_v4 = vld [vmem:[%s12552_s7 + $0x500] ss:$16 sps:$4 sm:$0xff]   ;;  %v11589_v7 = vld [vmem:[%s12552_s7 + $0x308] ss:$16 sps:$4 sm:$0xff]  }
 0x38e   : > { %8606 = vmatprep.subr.bf16.mxu0 %v11525_v8  ;;  %v11594_v8 = vld [vmem:[%s12552_s7 + $0x524] ss:$16 sps:$4 sm:$0xff]  }
 0x390   : > { %8361 = vmatpush1.bf16.msra.mxu1 %v11520_v10  ;;  %v11592_v10 = vld [vmem:[%s12552_s7 + $0x520] ss:$16 sps:$4 sm:$0xff]  }
 0x391   : > { %8607 = vmatpush1.bf16.msra.mxu0 %v11523_v24  ;;  %8362 = vmatprep.subr.bf16.mxu1 %v11528_v3  ;;  %v11595_v24 = vld [vmem:[%s12552_s7 + $0x328] ss:$16 sps:$4 sm:$0xff]   ;;  %v11600_v3 = vld [vmem:[%s12552_s7 + $0x544] ss:$16 sps:$4 sm:$0xff]  }
 0x392   : > { %8608 = vmatprep.subr.bf16.mxu0 %v11531_v9  ;;  %v11603_v9 = vld [vmem:[%s12552_s7 + $0x34c] ss:$16 sps:$4 sm:$0xff]  }
 0x394   : > { %8363 = vmatpush1.bf16.msra.mxu1 %v11526_v14  ;;  %v11598_v14 = vld [vmem:[%s12552_s7 + $0x540] ss:$16 sps:$4 sm:$0xff]  }
 0x395   : > { %8609 = vmatpush1.bf16.msra.mxu0 %v11529_v18  ;;  %8364 = vmatprep.subr.bf16.mxu1 %v11534_v20  ;;  %v11601_v18 = vld [vmem:[%s12552_s7 + $0x348] ss:$16 sps:$4 sm:$0xff]   ;;  %v11606_v20 = vld [vmem:[%s12552_s7 + $0x564] ss:$16 sps:$4 sm:$0xff]  }
 0x396   : > { %8610 = vmatprep.subr.bf16.mxu0 %v11537_v21  ;;  %v11609_v21 = vld [vmem:[%s12552_s7 + $0x36c] ss:$16 sps:$4 sm:$0xff]  }
 0x398   : > { %8365 = vmatpush1.bf16.msra.mxu1 %v11532_v0  ;;  %v11604_v0 = vld [vmem:[%s12552_s7 + $0x560] ss:$16 sps:$4 sm:$0xff]  }
 0x399   : > { %8611 = vmatpush1.bf16.msra.mxu0 %v11535_v1  ;;  %8375 = vmatprep.subr.bf16.mxu1 %v11540_v2  ;;  %v11607_v1 = vld [vmem:[%s12552_s7 + $0x368] ss:$16 sps:$4 sm:$0xff]   ;;  %v11612_v2 = vld [vmem:[%s12552_s7 + $0x584] ss:$16 sps:$4 sm:$0xff]  }
 0x39a   : > { %8621 = vmatprep.subr.bf16.mxu0 %v11543_v25  ;;  %v11615_v25 = vld [vmem:[%s12552_s7 + $0x38c] ss:$16 sps:$4 sm:$0xff]  }
 0x39b   : > { %8367 = vmatmul.mubr.bf16.vlgmr.msra.gmra.mrb[16].mxu1 %v13516_v30 }
 0x39c   : > { %8613 = vmatmul.mubr.bf16.vlgmr.msra.gmra.mrb[16].mxu0 %v13411_v52  ;;  %8376 = vmatpush1.bf16.msra.mxu1 %v11538_v28  ;;  %v11550_v52 = vld [vmem:[%s12552_s7 + $0x440] ss:$16 sps:$4 sm:$0xff]   ;;  %v11613_v28 = vld [vmem:[%s12552_s7 + $0x388] ss:$16 sps:$4 sm:$0xff]  }
 0x39d   : > { %8407 = vmatprep.mubr.bf16.mxu1 %v13521_v6  ;;  %8622 = vmatpush1.bf16.msra.mxu0 %v11541_v31  ;;  %v11618_v31 = vld [vmem:[%s12552_s7 + $0x5a4] ss:$16 sps:$4 sm:$0xff]  }
 0x39e   : > { %8653 = vmatprep.mubr.bf16.mxu0 %v13414_v54  ;;  %8377 = vmatprep.subr.bf16.mxu1 %v11546_v32  ;;  %v11556_v54 = vld [vmem:[%s12552_s7 + $0x460] ss:$16 sps:$4 sm:$0xff]   ;;  %v11621_v32 = vld [vmem:[%s12552_s7 + $0x3ac] ss:$16 sps:$4 sm:$0xff]  }
 0x39f   : > { %8623 = vmatprep.subr.bf16.mxu0 %v11549_v19  ;;  %v11616_v19 = vld [vmem:[%s12552_s7 + $0x5a0] ss:$16 sps:$4 sm:$0xff]  }
 0x3a0   : > { %8378 = vmatpush1.bf16.msra.mxu1 %v11544_v33  ;;  %v11619_v33 = vld [vmem:[%s12552_s7 + $0x3a8] ss:$16 sps:$4 sm:$0xff]  }
 0x3a1   : > { %8624 = vmatpush1.bf16.msra.mxu0 %v11547_v45  ;;  %8379 = vmatprep.subr.bf16.mxu1 %v11552_v34  ;;  %v11624_v45 = vld [vmem:[%s12552_s7 + $0x5c4] ss:$16 sps:$4 sm:$0xff]   ;;  %v11627_v34 = vld [vmem:[%s12552_s7 + $0x3cc] ss:$16 sps:$4 sm:$0xff]  }
 0x3a2   : > { %8625 = vmatprep.subr.bf16.mxu0 %v11555_v42  ;;  %v5535_v42 = vcombine.high %v13497_v11, %v13497_v11  ;;  %v11631_v11 = vld [vmem:[%s12552_s7 + $0x3e8] ss:$16 sps:$4 sm:$0xff]  }
 0x3a4   : > { %8380 = vmatpush1.bf16.msra.mxu1 %v11550_v52  ;;  %v11622_v52 = vld [vmem:[%s12552_s7 + $0x5c0] ss:$16 sps:$4 sm:$0xff]  }
 0x3a5   : > { %8626 = vmatpush1.bf16.msra.mxu0 %v11553_v23  ;;  %8381 = vmatprep.subr.bf16.mxu1 %v11558_v44  ;;  %v11625_v23 = vld [vmem:[%s12552_s7 + $0x3c8] ss:$16 sps:$4 sm:$0xff]   ;;  %v11630_v44 = vld [vmem:[%s12552_s7 + $0x5e4] ss:$16 sps:$4 sm:$0xff]  }
 0x3a6   : > { %8627 = vmatprep.subr.bf16.mxu0 %v11561_v46  ;;  %v11633_v46 = vld [vmem:[%s12552_s7 + $0x3ec] ss:$16 sps:$4 sm:$0xff]  }
 0x3a8   : > { %8382 = vmatpush1.bf16.msra.mxu1 %v11556_v54  ;;  %v13586_v54 = vrot.slane %v5535_v42, %v13102_v51  ;;  %v11693_v42 = vld [vmem:[%s12552_s7 + $0x52c] ss:$16 sps:$4 sm:$0xff]  }
 0x3a9   : > { %8628 = vmatpush1.bf16.msra.mxu0 %v11559_v5  ;;  %8383 = vmatprep.subr.bf16.mxu1 %v11564_v47  ;;  %v11628_v5 = vld [vmem:[%s12552_s7 + $0x5e0] ss:$16 sps:$4 sm:$0xff]   ;;  %v11636_v47 = vld [vmem:[%s12552_s7 + $0x604] ss:$16 sps:$4 sm:$0xff]  }
 0x3aa   : > { %8629 = vmatprep.subr.bf16.mxu0 %v11567_v48  ;;  %v11639_v48 = vld [vmem:[%s12552_s7 + $0x40c] ss:$16 sps:$4 sm:$0xff]  }
 0x3ac   : > { %8384 = vmatpush1.bf16.msra.mxu1 %v11562_v49  ;;  %v5551_v49 = vcombine.high %v13586_v54, %v13586_v54 }
 0x3ad   : > { %8630 = vmatpush1.bf16.msra.mxu0 %v11565_v50  ;;  %8385 = vmatprep.subr.bf16.mxu1 %v11570_v53  ;;  %v11634_v50 = vld [vmem:[%s12552_s7 + $0x600] ss:$16 sps:$4 sm:$0xff]   ;;  %v13597_v53 = vpack.c.bf16 %v13505_v22, %v13505_v22  ;;  %v11643_v22 = vld [vmem:[%s12552_s7 + $0x428] ss:$16 sps:$4 sm:$0xff]  }
 0x3ae   : > { %8631 = vmatprep.subr.bf16.mxu0 %v11573_v55  ;;  %v11637_v55 = vld [vmem:[%s12552_s7 + $0x408] ss:$16 sps:$4 sm:$0xff]  }
 0x3b0   : > { %8386 = vmatpush1.bf16.msra.mxu1 %v11568_v56  ;;  %v11642_v56 = vld [vmem:[%s12552_s7 + $0x624] ss:$16 sps:$4 sm:$0xff]  }
 0x3b1   : > { %8632 = vmatpush1.bf16.msra.mxu0 %v11571_v15  ;;  %8387 = vmatprep.subr.bf16.mxu1 %v11576_v62  ;;  %v13602_v15 = vpack.c.bf16 %v5551_v49, %v5551_v49  ;;  %v11645_v62 = vld [vmem:[%s12552_s7 + $0x42c] ss:$16 sps:$4 sm:$0xff]  }
 0x3b2   : > { %8633 = vmatprep.subr.bf16.mxu0 %v11579_v57  ;;  %v11640_v57 = vld [vmem:[%s12552_s7 + $0x620] ss:$16 sps:$4 sm:$0xff]  }
 0x3b4   : > { %8388 = vmatpush1.bf16.msra.mxu1 %v11574_v63  ;;  %v11648_v63 = vld [vmem:[%s12552_s7 + $0x644] ss:$16 sps:$4 sm:$0xff]  }
 0x3b5   : > { %8634 = vmatpush1.bf16.msra.mxu0 %v11577_v58  ;;  %8389 = vmatprep.subr.bf16.mxu1 %v11582_v36  ;;  %v11651_v58 = vld [vmem:[%s12552_s7 + $0x44c] ss:$16 sps:$4 sm:$0xff]   ;;  %v11649_v36 = vld [vmem:[%s12552_s7 + $0x448] ss:$16 sps:$4 sm:$0xff]  }
 0x3b6   : > { %8635 = vmatprep.subr.bf16.mxu0 %v11585_v59  ;;  %v11654_v59 = vld [vmem:[%s12552_s7 + $0x664] ss:$16 sps:$4 sm:$0xff]  }
 0x3b8   : > { %8390 = vmatpush1.bf16.msra.mxu1 %v11580_v60  ;;  %v11657_v60 = vld [vmem:[%s12552_s7 + $0x46c] ss:$16 sps:$4 sm:$0xff]  }
 0x3b9   : > { %8636 = vmatpush1.bf16.msra.mxu0 %v11583_v61  ;;  %8391 = vmatprep.subr.bf16.mxu1 %v11588_v29  ;;  %v11655_v61 = vld [vmem:[%s12552_s7 + $0x468] ss:$16 sps:$4 sm:$0xff]   ;;  %v11660_v29 = vld [vmem:[%s12552_s7 + $0x684] ss:$16 sps:$4 sm:$0xff]  }
 0x3ba   : > { %8637 = vmatprep.subr.bf16.mxu0 %v11591_v13  ;;  %v11663_v13 = vld [vmem:[%s12552_s7 + $0x48c] ss:$16 sps:$4 sm:$0xff]  }
 0x3bc   : > { %8392 = vmatpush1.bf16.msra.mxu1 %v11586_v4  ;;  %v11658_v4 = vld [vmem:[%s12552_s7 + $0x680] ss:$16 sps:$4 sm:$0xff]  }
 0x3bd   : > { %8638 = vmatpush1.bf16.msra.mxu0 %v11589_v7  ;;  %8393 = vmatprep.subr.bf16.mxu1 %v11594_v8  ;;  %v11661_v7 = vld [vmem:[%s12552_s7 + $0x488] ss:$16 sps:$4 sm:$0xff]   ;;  %v11666_v8 = vld [vmem:[%s12552_s7 + $0x6a4] ss:$16 sps:$4 sm:$0xff]  }
 0x3be   : > { %8639 = vmatprep.subr.bf16.mxu0 %v11597_v27  ;;  %v11669_v27 = vld [vmem:[%s12552_s7 + $0x4ac] ss:$16 sps:$4 sm:$0xff]  }
 0x3c0   : > { %8394 = vmatpush1.bf16.msra.mxu1 %v11592_v10  ;;  %v11664_v10 = vld [vmem:[%s12552_s7 + $0x6a0] ss:$16 sps:$4 sm:$0xff]  }
 0x3c1   : > { %8640 = vmatpush1.bf16.msra.mxu0 %v11595_v24  ;;  %8395 = vmatprep.subr.bf16.mxu1 %v11600_v3  ;;  %v11667_v24 = vld [vmem:[%s12552_s7 + $0x4a8] ss:$16 sps:$4 sm:$0xff]   ;;  %v11672_v3 = vld [vmem:[%s12552_s7 + $0x6c4] ss:$16 sps:$4 sm:$0xff]  }
 0x3c2   : > { %8641 = vmatprep.subr.bf16.mxu0 %v11603_v9 }
 0x3c4   : > { %8396 = vmatpush1.bf16.msra.mxu1 %v11598_v14  ;;  %v11675_v14 = vld [vmem:[%s12552_s7 + $0x4cc] ss:$16 sps:$4 sm:$0xff]  }
 0x3c5   : > { %8642 = vmatpush1.bf16.msra.mxu0 %v11601_v18  ;;  %8397 = vmatprep.subr.bf16.mxu1 %v11606_v20 }
 0x3c6   : > { %8643 = vmatprep.subr.bf16.mxu0 %v11609_v21 }
 0x3c8   : > { %8398 = vmatpush1.bf16.msra.mxu1 %v11604_v0  ;;  %v11670_v0 = vld [vmem:[%s12552_s7 + $0x6c0] ss:$16 sps:$4 sm:$0xff]  }
 0x3c9   : > { %8644 = vmatpush1.bf16.msra.mxu0 %v11607_v1  ;;  %8399 = vmatprep.subr.bf16.mxu1 %v11612_v2  ;;  %v11673_v2 = vld [vmem:[%s12552_s7 + $0x4c8] ss:$16 sps:$4 sm:$0xff]  }
 0x3ca   : > { %8645 = vmatprep.subr.bf16.mxu0 %v11615_v25  ;;  %v11678_v25 = vld [vmem:[%s12552_s7 + $0x6e4] ss:$16 sps:$4 sm:$0xff]  }
 0x3cc   : > { %8400 = vmatpush1.bf16.msra.mxu1 %v11610_v26  ;;  %v13635_v26 = vrot.slane %v5343_v17, %v13102_v51  ;;  %v11687_v17 = vld [vmem:[%s12552_s7 + $0x50c] ss:$16 sps:$4 sm:$0xff]  }
 0x3cd   : > { %8646 = vmatpush1.bf16.msra.mxu0 %v11613_v28  ;;  %8401 = vmatprep.subr.bf16.mxu1 %v11618_v31  ;;  %v11681_v31 = vld [vmem:[%s12552_s7 + $0x4ec] ss:$16 sps:$4 sm:$0xff]  }
 0x3ce   : > { %8647 = vmatprep.subr.bf16.mxu0 %v11621_v32 }
 0x3d0   : > { %8402 = vmatpush1.bf16.msra.mxu1 %v11616_v19  ;;  %v11676_v19 = vld [vmem:[%s12552_s7 + $0x6e0] ss:$16 sps:$4 sm:$0xff]  }
 0x3d1   : > { %8648 = vmatpush1.bf16.msra.mxu0 %v11619_v33  ;;  %8403 = vmatprep.subr.bf16.mxu1 %v11624_v45  ;;  %v11682_v33 = vld [vmem:[%s12552_s7 + $0x700] ss:$16 sps:$4 sm:$0xff]   ;;  %v11685_v45 = vld [vmem:[%s12552_s7 + $0x508] ss:$16 sps:$4 sm:$0xff]  }
 0x3d2   : > { %8649 = vmatprep.subr.bf16.mxu0 %v11627_v34  ;;  %v11690_v34 = vld [vmem:[%s12552_s7 + $0x724] ss:$16 sps:$4 sm:$0xff]  }
 0x3d4   : > { %8404 = vmatpush1.bf16.msra.mxu1 %v11622_v52  ;;  %v11688_v52 = vld [vmem:[%s12552_s7 + $0x720] ss:$16 sps:$4 sm:$0xff]  }
 0x3d5   : > { %8650 = vmatpush1.bf16.msra.mxu0 %v11625_v23  ;;  %8405 = vmatprep.subr.bf16.mxu1 %v11630_v44  ;;  %v13653_v23 = vld [vmem:[%s12549_s13 + $0x8] sm:$0x3f] }
 0x3d6   : > { %8651 = vmatprep.subr.bf16.mxu0 %v11633_v46  ;;  %v11691_v44 = vld [vmem:[%s12552_s7 + $0x528] ss:$16 sps:$4 sm:$0xff]   ;;  %v11696_v46 = vld [vmem:[%s12552_s7 + $0x744] ss:$16 sps:$4 sm:$0xff]   ;;  %v5438_v49 = vrot.slane %v13653_v23, %v5405_v40 }
 0x3d7   : > { %v11703_v40 = vld [vmem:[%s12552_s7 + $0x568] ss:$16 sps:$4 sm:$0xff]  }
 0x3d8   : > { %8406 = vmatpush1.bf16.msra.mxu1 %v11628_v5  ;;  %v11699_v5 = vld [vmem:[%s12552_s7 + $0x54c] ss:$16 sps:$4 sm:$0xff]  }
 0x3d9   : > { %8652 = vmatpush1.bf16.msra.mxu0 %v11631_v11  ;;  %8416 = vmatprep.subr.bf16.mxu1 %v11636_v47  ;;  %v5426_v11 = vrot.slane %v13653_v23, %v5393_v37  ;;  %v5430_v47 = vrot.slane %v13653_v23, %v5397_v38  ;;  %v11697_v37 = vld [vmem:[%s12552_s7 + $0x548] ss:$16 sps:$4 sm:$0xff]   ;;  %v11705_v38 = vld [vmem:[%s12552_s7 + $0x56c] ss:$16 sps:$4 sm:$0xff]  }
 0x3da   : > { %8662 = vmatprep.subr.bf16.mxu0 %v11639_v48  ;;  %v5434_v48 = vrot.slane %v13653_v23, %v5401_v39  ;;  %v11700_v39 = vld [vmem:[%s12552_s7 + $0x760] ss:$16 sps:$4 sm:$0xff]  }
 0x3db   : > { %8408 = vmatmul.mubr.bf16.vlgmr.msra.gmra.mrb[16].mxu1 %v13597_v53 }
 0x3dc   : > { %8654 = vmatmul.mubr.bf16.vlgmr.msra.gmra.mrb[16].mxu0 %v13516_v30  ;;  %8417 = vmatpush1.bf16.msra.mxu1 %v11634_v50  ;;  %v11646_v30 = vld [vmem:[%s12552_s7 + $0x640] ss:$16 sps:$4 sm:$0xff]  }
 0x3dd   : > { %8448 = vmatprep.mubr.bf16.mxu1 %v13602_v15  ;;  %8663 = vmatpush1.bf16.msra.mxu0 %v11637_v55  ;;  %v11694_v50 = vld [vmem:[%s12552_s7 + $0x740] ss:$16 sps:$4 sm:$0xff]   ;;  %v11702_v55 = vld [vmem:[%s12552_s7 + $0x764] ss:$16 sps:$4 sm:$0xff]  }
 0x3de   : > { %8694 = vmatprep.mubr.bf16.mxu0 %v13521_v6  ;;  %8418 = vmatprep.subr.bf16.mxu1 %v11642_v56  ;;  %v11652_v6 = vld [vmem:[%s12552_s7 + $0x660] ss:$16 sps:$4 sm:$0xff]   ;;  %v5481_v56 = vcombine.low %v5426_v11, %v5430_v47  ;;  %v11763_v11 = vld [vmem:[%s12552_s7 + $0x6a8] ss:$16 sps:$4 sm:$0xff]   ;;  %v11768_v47 = vld [vmem:[%s12552_s7 + $0x8c4] ss:$16 sps:$4 sm:$0xff]  }
 0x3df   : > { %8664 = vmatprep.subr.bf16.mxu0 %v11645_v62  ;;  %v5482_v62 = vcombine.low %v5434_v48, %v5438_v49  ;;  %v11771_v49 = vld [vmem:[%s12552_s7 + $0x6cc] ss:$16 sps:$4 sm:$0xff]  }
 0x3e0   : > { %8419 = vmatpush1.bf16.msra.mxu1 %v11640_v57  ;;  %v11708_v57 = vld [vmem:[%s12552_s7 + $0x784] ss:$16 sps:$4 sm:$0xff]  }
 0x3e1   : > { %8665 = vmatpush1.bf16.msra.mxu0 %v11643_v22  ;;  %8420 = vmatprep.subr.bf16.mxu1 %v11648_v63  ;;  %v11711_v22 = vld [vmem:[%s12552_s7 + $0x58c] ss:$16 sps:$4 sm:$0xff]   ;;  %v5489_v63 = vrot.slane %v5481_v56, %v13102_v51  ;;  %v11766_v56 = vld [vmem:[%s12552_s7 + $0x8c0] ss:$16 sps:$4 sm:$0xff]  }
 0x3e2   : > { %8666 = vmatprep.subr.bf16.mxu0 %v11651_v58  ;;  %v5496_v58 = vrot.slane %v5482_v62, %v13102_v51 }
 0x3e4   : > { %8421 = vmatpush1.bf16.msra.mxu1 %v11646_v30  ;;  %v11706_v30 = vld [vmem:[%s12552_s7 + $0x780] ss:$16 sps:$4 sm:$0xff]  }
 0x3e5   : > { %8667 = vmatpush1.bf16.msra.mxu0 %v11649_v36  ;;  %8422 = vmatprep.subr.bf16.mxu1 %v11654_v59  ;;  %v11709_v36 = vld [vmem:[%s12552_s7 + $0x588] ss:$16 sps:$4 sm:$0xff]   ;;  %v11714_v59 = vld [vmem:[%s12552_s7 + $0x7a4] ss:$16 sps:$4 sm:$0xff]  }
 0x3e6   : > { %8668 = vmatprep.subr.bf16.mxu0 %v11657_v60  ;;  %v11717_v60 = vld [vmem:[%s12552_s7 + $0x5ac] ss:$16 sps:$4 sm:$0xff]  }
 0x3e8   : > { %8423 = vmatpush1.bf16.msra.mxu1 %v11652_v6  ;;  %v5497_v6 = vcombine.low %v5489_v63, %v5496_v58  ;;  %v11772_v58 = vld [vmem:[%s12552_s7 + $0x8e0] ss:$16 sps:$4 sm:$0xff]  }
 0x3e9   : > { %8669 = vmatpush1.bf16.msra.mxu0 %v11655_v61  ;;  %8424 = vmatprep.subr.bf16.mxu1 %v11660_v29  ;;  %v11712_v61 = vld [vmem:[%s12552_s7 + $0x7a0] ss:$16 sps:$4 sm:$0xff]   ;;  %v11715_v29 = vld [vmem:[%s12552_s7 + $0x5a8] ss:$16 sps:$4 sm:$0xff]  }
 0x3ea   : > { %8670 = vmatprep.subr.bf16.mxu0 %v11663_v13  ;;  %v11720_v13 = vld [vmem:[%s12552_s7 + $0x7c4] ss:$16 sps:$4 sm:$0xff]  }
 0x3ec   : > { %8425 = vmatpush1.bf16.msra.mxu1 %v11658_v4  ;;  %v11723_v4 = vld [vmem:[%s12552_s7 + $0x5cc] ss:$16 sps:$4 sm:$0xff]  }
 0x3ed   : > { %8671 = vmatpush1.bf16.msra.mxu0 %v11661_v7  ;;  %8426 = vmatprep.subr.bf16.mxu1 %v11666_v8  ;;  %v11718_v8 = vld [vmem:[%s12552_s7 + $0x7c0] ss:$16 sps:$4 sm:$0xff]  }
 0x3ee   : > { %v5165_v9 = vpop.f32.mrb[12].mxu1  ;;  %8672 = vmatprep.subr.bf16.mxu0 %v11669_v27  ;;  %v11721_v27 = vld [vmem:[%s12552_s7 + $0x5c8] ss:$16 sps:$4 sm:$0xff]  }
 0x3ef   : > { %v5167_v18 = vpop.f32.mrb[13].mxu1 }
 0x3f0   : > { %v5344_v20 = vcombine.low %v5165_v9, %v5167_v18  ;;  %v5169_v21 = vpop.f32.mrb[14].mxu1  ;;  %8427 = vmatpush1.bf16.msra.mxu1 %v11664_v10  ;;  %v11726_v10 = vld [vmem:[%s12552_s7 + $0x7e4] ss:$16 sps:$4 sm:$0xff]   ;;  %v11724_v9 = vld [vmem:[%s12552_s7 + $0x7e0] ss:$16 sps:$4 sm:$0xff]  }
 0x3f1   : > { %8673 = vmatpush1.bf16.msra.mxu0 %v11667_v24  ;;  %v5170_v1 = vpop.f32.mrb[15].mxu1  ;;  %8428 = vmatprep.subr.bf16.mxu1 %v11672_v3  ;;  %v11729_v24 = vld [vmem:[%s12552_s7 + $0x5ec] ss:$16 sps:$4 sm:$0xff]   ;;  %v11732_v18 = vld [vmem:[%s12552_s7 + $0x804] ss:$16 sps:$4 sm:$0xff]  }
 0x3f2   : > { %v13638_v28 = vrot.slane %v5344_v20, %v13102_v51  ;;  %8674 = vmatprep.subr.bf16.mxu0 %v11675_v14  ;;  %v11727_v14 = vld [vmem:[%s12552_s7 + $0x5e8] ss:$16 sps:$4 sm:$0xff]   ;;  %v11735_v20 = vld [vmem:[%s12552_s7 + $0x60c] ss:$16 sps:$4 sm:$0xff]   ;;  %v13710_v1 = vpack.c.bf16 %v13586_v54, %v13586_v54 }
 0x3f3   : > { %v11739_v54 = vld [vmem:[%s12552_s7 + $0x628] ss:$16 sps:$4 sm:$0xff]  }
 0x3f4   : > { %v5359_v32 = vcombine.low %v13635_v26, %v13638_v28  ;;  %8429 = vmatpush1.bf16.msra.mxu1 %v11670_v0  ;;  %v11730_v0 = vld [vmem:[%s12552_s7 + $0x800] ss:$16 sps:$4 sm:$0xff]   ;;  %v11741_v28 = vld [vmem:[%s12552_s7 + $0x62c] ss:$16 sps:$4 sm:$0xff]  }
 0x3f5   : > { %8675 = vmatpush1.bf16.msra.mxu0 %v11673_v2  ;;  %8430 = vmatprep.subr.bf16.mxu1 %v11678_v25  ;;  %v11733_v2 = vld [vmem:[%s12552_s7 + $0x608] ss:$16 sps:$4 sm:$0xff]   ;;  %v11738_v25 = vld [vmem:[%s12552_s7 + $0x824] ss:$16 sps:$4 sm:$0xff]  }
 0x3f6   : > { %8676 = vmatprep.subr.bf16.mxu0 %v11681_v31  ;;  %v13691_v7 = vadd.f32 %v5497_v6, %v5359_v32  ;;  %v11736_v31 = vld [vmem:[%s12552_s7 + $0x820] ss:$16 sps:$4 sm:$0xff]   ;;  %v11744_v32 = vld [vmem:[%s12552_s7 + $0x844] ss:$16 sps:$4 sm:$0xff]   ;;  %v11781_v6 = vld [vmem:[%s12552_s7 + $0x708] ss:$16 sps:$4 sm:$0xff]  }
 0x3f8   : > { %8431 = vmatpush1.bf16.msra.mxu1 %v11676_v19  ;;  %v13699_v3 = vrot.slane %v13691_v7, %v13102_v51  ;;  %v11747_v19 = vld [vmem:[%s12552_s7 + $0x64c] ss:$16 sps:$4 sm:$0xff]  }
 0x3f9   : > { %8677 = vmatpush1.bf16.msra.mxu0 %v11679_v12  ;;  %8432 = vmatprep.subr.bf16.mxu1 %v11684_v16  ;;  %v11745_v12 = vld [vmem:[%s12552_s7 + $0x648] ss:$16 sps:$4 sm:$0xff]   ;;  %v11750_v16 = vld [vmem:[%s12552_s7 + $0x864] ss:$16 sps:$4 sm:$0xff]  }
 0x3fa   : > { %8678 = vmatprep.subr.bf16.mxu0 %v11687_v17  ;;  %v5567_v21 = vcombine.high %v13699_v3, %v13699_v3  ;;  %v11753_v17 = vld [vmem:[%s12552_s7 + $0x66c] ss:$16 sps:$4 sm:$0xff]  }
 0x3fc   : > { %8433 = vmatpush1.bf16.msra.mxu1 %v11682_v33  ;;  %v13715_v26 = vpack.c.bf16 %v5567_v21, %v5567_v21  ;;  %v11751_v33 = vld [vmem:[%s12552_s7 + $0x668] ss:$16 sps:$4 sm:$0xff]   ;;  %v11804_v21 = vld [vmem:[%s12552_s7 + $0x984] ss:$16 sps:$4 sm:$0xff]  }
 0x3fd   : > { %8679 = vmatpush1.bf16.msra.mxu0 %v11685_v45  ;;  %8434 = vmatprep.subr.bf16.mxu1 %v11690_v34  ;;  %v11756_v45 = vld [vmem:[%s12552_s7 + $0x884] ss:$16 sps:$4 sm:$0xff]   ;;  %v11759_v34 = vld [vmem:[%s12552_s7 + $0x68c] ss:$16 sps:$4 sm:$0xff]  }
 0x3fe   : > { %8680 = vmatprep.subr.bf16.mxu0 %v11693_v42  ;;  %v11754_v42 = vld [vmem:[%s12552_s7 + $0x880] ss:$16 sps:$4 sm:$0xff]  }
 0x400   : > { %8435 = vmatpush1.bf16.msra.mxu1 %v11688_v52  ;;  %v11757_v52 = vld [vmem:[%s12552_s7 + $0x688] ss:$16 sps:$4 sm:$0xff]  }
 0x401   : > { %8681 = vmatpush1.bf16.msra.mxu0 %v11691_v44  ;;  %8436 = vmatprep.subr.bf16.mxu1 %v11696_v46  ;;  %v11762_v44 = vld [vmem:[%s12552_s7 + $0x8a4] ss:$16 sps:$4 sm:$0xff]   ;;  %v11765_v46 = vld [vmem:[%s12552_s7 + $0x6ac] ss:$16 sps:$4 sm:$0xff]  }
 0x402   : > { %8682 = vmatprep.subr.bf16.mxu0 %v11699_v5  ;;  %v11760_v5 = vld [vmem:[%s12552_s7 + $0x8a0] ss:$16 sps:$4 sm:$0xff]  }
 0x404   : > { %8437 = vmatpush1.bf16.msra.mxu1 %v11694_v50 }
 0x405   : > { %8683 = vmatpush1.bf16.msra.mxu0 %v11697_v37  ;;  %8438 = vmatprep.subr.bf16.mxu1 %v11702_v55  ;;  %v346_v37 = vld [vmem:[#allocation2 + $0x18] sm:$0xf] }
 0x406   : > { %8684 = vmatprep.subr.bf16.mxu0 %v11705_v38 }
 0x408   : > { %8439 = vmatpush1.bf16.msra.mxu1 %v11700_v39  ;;  %v11769_v39 = vld [vmem:[%s12552_s7 + $0x6c8] ss:$16 sps:$4 sm:$0xff]  }
 0x409   : > { %8685 = vmatpush1.bf16.msra.mxu0 %v11703_v40  ;;  %8440 = vmatprep.subr.bf16.mxu1 %v11708_v57  ;;  %v11774_v40 = vld [vmem:[%s12552_s7 + $0x8e4] ss:$16 sps:$4 sm:$0xff]  }
 0x40a   : > { %8686 = vmatprep.subr.bf16.mxu0 %v11711_v22  ;;  %v11777_v22 = vld [vmem:[%s12552_s7 + $0x6ec] ss:$16 sps:$4 sm:$0xff]  }
 0x40c   : > { %8441 = vmatpush1.bf16.msra.mxu1 %v11706_v30  ;;  %v11775_v30 = vld [vmem:[%s12552_s7 + $0x6e8] ss:$16 sps:$4 sm:$0xff]  }
 0x40d   : > { %8687 = vmatpush1.bf16.msra.mxu0 %v11709_v36  ;;  %8442 = vmatprep.subr.bf16.mxu1 %v11714_v59  ;;  %v11780_v36 = vld [vmem:[%s12552_s7 + $0x904] ss:$16 sps:$4 sm:$0xff]   ;;  %v11783_v59 = vld [vmem:[%s12552_s7 + $0x70c] ss:$16 sps:$4 sm:$0xff]  }
 0x40e   : > { %8688 = vmatprep.subr.bf16.mxu0 %v11717_v60  ;;  %v11778_v60 = vld [vmem:[%s12552_s7 + $0x900] ss:$16 sps:$4 sm:$0xff]  }
 0x410   : > { %8443 = vmatpush1.bf16.msra.mxu1 %v11712_v61  ;;  %v11786_v61 = vld [vmem:[%s12552_s7 + $0x924] ss:$16 sps:$4 sm:$0xff]  }
 0x411   : > { %8689 = vmatpush1.bf16.msra.mxu0 %v11715_v29  ;;  %8444 = vmatprep.subr.bf16.mxu1 %v11720_v13  ;;  %v11789_v29 = vld [vmem:[%s12552_s7 + $0x72c] ss:$16 sps:$4 sm:$0xff]   ;;  %v11784_v13 = vld [vmem:[%s12552_s7 + $0x920] ss:$16 sps:$4 sm:$0xff]  }
 0x412   : > { %8690 = vmatprep.subr.bf16.mxu0 %v11723_v4  ;;  %v11787_v4 = vld [vmem:[%s12552_s7 + $0x728] ss:$16 sps:$4 sm:$0xff]  }
 0x414   : > { %8445 = vmatpush1.bf16.msra.mxu1 %v11718_v8  ;;  %v11792_v8 = vld [vmem:[%s12552_s7 + $0x944] ss:$16 sps:$4 sm:$0xff]  }
 0x415   : > { %8691 = vmatpush1.bf16.msra.mxu0 %v11721_v27  ;;  %8446 = vmatprep.subr.bf16.mxu1 %v11726_v10  ;;  %v11795_v27 = vld [vmem:[%s12552_s7 + $0x74c] ss:$16 sps:$4 sm:$0xff]   ;;  %v11790_v10 = vld [vmem:[%s12552_s7 + $0x940] ss:$16 sps:$4 sm:$0xff]  }
 0x416   : > { %8692 = vmatprep.subr.bf16.mxu0 %v11729_v24  ;;  %v11793_v24 = vld [vmem:[%s12552_s7 + $0x748] ss:$16 sps:$4 sm:$0xff]  }
 0x418   : > { %8447 = vmatpush1.bf16.msra.mxu1 %v11724_v9  ;;  %v11798_v9 = vld [vmem:[%s12552_s7 + $0x964] ss:$16 sps:$4 sm:$0xff]  }
 0x419   : > { %8693 = vmatpush1.bf16.msra.mxu0 %v11727_v14  ;;  %8457 = vmatprep.subr.bf16.mxu1 %v11732_v18  ;;  %v11801_v14 = vld [vmem:[%s12552_s7 + $0x76c] ss:$16 sps:$4 sm:$0xff]   ;;  %v11796_v18 = vld [vmem:[%s12552_s7 + $0x960] ss:$16 sps:$4 sm:$0xff]  }
 0x41a   : > { %8703 = vmatprep.subr.bf16.mxu0 %v11735_v20  ;;  %v11799_v20 = vld [vmem:[%s12552_s7 + $0x768] ss:$16 sps:$4 sm:$0xff]  }
 0x41b   : > { %8449 = vmatmul.mubr.bf16.vlgmr.msra.gmra.mrb[16].mxu1 %v13710_v1 }
 0x41c   : > { %8695 = vmatmul.mubr.bf16.vlgmr.msra.gmra.mrb[16].mxu0 %v13597_v53  ;;  %8458 = vmatpush1.bf16.msra.mxu1 %v11730_v0  ;;  %v11742_v53 = vld [vmem:[%s12552_s7 + $0x840] ss:$16 sps:$4 sm:$0xff]   ;;  %v11807_v0 = vld [vmem:[%s12552_s7 + $0x78c] ss:$16 sps:$4 sm:$0xff]  }
 0x41d   : > { %8489 = vmatprep.mubr.bf16.mxu1 %v13715_v26  ;;  %8704 = vmatpush1.bf16.msra.mxu0 %v11733_v2  ;;  %v11802_v2 = vld [vmem:[%s12552_s7 + $0x980] ss:$16 sps:$4 sm:$0xff]  }
 0x41e   : > { %8735 = vmatprep.mubr.bf16.mxu0 %v13602_v15  ;;  %8459 = vmatprep.subr.bf16.mxu1 %v11738_v25  ;;  %v11748_v15 = vld [vmem:[%s12552_s7 + $0x860] ss:$16 sps:$4 sm:$0xff]   ;;  %v11805_v25 = vld [vmem:[%s12552_s7 + $0x788] ss:$16 sps:$4 sm:$0xff]  }
 0x41f   : > { %8705 = vmatprep.subr.bf16.mxu0 %v11741_v28  ;;  %v11810_v28 = vld [vmem:[%s12552_s7 + $0x9a4] ss:$16 sps:$4 sm:$0xff]  }
 0x420   : > { %8460 = vmatpush1.bf16.msra.mxu1 %v11736_v31  ;;  %v11813_v31 = vld [vmem:[%s12552_s7 + $0x7ac] ss:$16 sps:$4 sm:$0xff]  }
 0x421   : > { %8706 = vmatpush1.bf16.msra.mxu0 %v11739_v54  ;;  %8461 = vmatprep.subr.bf16.mxu1 %v11744_v32  ;;  %v11808_v54 = vld [vmem:[%s12552_s7 + $0x9a0] ss:$16 sps:$4 sm:$0xff]   ;;  %v11811_v32 = vld [vmem:[%s12552_s7 + $0x7a8] ss:$16 sps:$4 sm:$0xff]  }
 0x422   : > { %8707 = vmatprep.subr.bf16.mxu0 %v11747_v19  ;;  %v11816_v19 = vld [vmem:[%s12552_s7 + $0x9c4] ss:$16 sps:$4 sm:$0xff]  }
 0x424   : > { %8462 = vmatpush1.bf16.msra.mxu1 %v11742_v53  ;;  %v11819_v53 = vld [vmem:[%s12552_s7 + $0x7cc] ss:$16 sps:$4 sm:$0xff]  }
 0x425   : > { %8708 = vmatpush1.bf16.msra.mxu0 %v11745_v12  ;;  %8463 = vmatprep.subr.bf16.mxu1 %v11750_v16  ;;  %v5552_v12 = vcombine.high %v13691_v7, %v13691_v7  ;;  %v11814_v16 = vld [vmem:[%s12552_s7 + $0x9c0] ss:$16 sps:$4 sm:$0xff]   ;;  %v11823_v7 = vld [vmem:[%s12552_s7 + $0x7e8] ss:$16 sps:$4 sm:$0xff]  }
 0x426   : > { %8709 = vmatprep.subr.bf16.mxu0 %v11753_v17  ;;  %v11817_v17 = vld [vmem:[%s12552_s7 + $0x7c8] ss:$16 sps:$4 sm:$0xff]  }
 0x428   : > { %8464 = vmatpush1.bf16.msra.mxu1 %v11748_v15  ;;  %v11822_v15 = vld [vmem:[%s12552_s7 + $0x9e4] ss:$16 sps:$4 sm:$0xff]  }
 0x429   : > { %8710 = vmatpush1.bf16.msra.mxu0 %v11751_v33  ;;  %8465 = vmatprep.subr.bf16.mxu1 %v11756_v45  ;;  %v11825_v33 = vld [vmem:[%s12552_s7 + $0x7ec] ss:$16 sps:$4 sm:$0xff]   ;;  %v13781_v45 = vrot.slane %v5552_v12, %v13102_v51  ;;  %v11892_v12 = vld [vmem:[%s12552_s7 + $0xb60] ss:$16 sps:$4 sm:$0xff]  }
 0x42a   : > { %8711 = vmatprep.subr.bf16.mxu0 %v11759_v34  ;;  %v11820_v34 = vld [vmem:[%s12552_s7 + $0x9e0] ss:$16 sps:$4 sm:$0xff]  }
 0x42c   : > { %8466 = vmatpush1.bf16.msra.mxu1 %v11754_v42  ;;  %v11828_v42 = vld [vmem:[%s12552_s7 + $0xa04] ss:$16 sps:$4 sm:$0xff]  }
 0x42d   : > { %8712 = vmatpush1.bf16.msra.mxu0 %v11757_v52  ;;  %8467 = vmatprep.subr.bf16.mxu1 %v11762_v44  ;;  %v11831_v52 = vld [vmem:[%s12552_s7 + $0x80c] ss:$16 sps:$4 sm:$0xff]   ;;  %v5568_v44 = vcombine.high %v13781_v45, %v13781_v45 }
 0x42e   : > { %8713 = vmatprep.subr.bf16.mxu0 %v11765_v46  ;;  %v11826_v46 = vld [vmem:[%s12552_s7 + $0xa00] ss:$16 sps:$4 sm:$0xff]  }
 0x42f   : > { %v5288_v48 = vpop.f32.mrb[12].mxu0 }
 0x430   : > { %v5290_v50 = vpop.f32.mrb[13].mxu0  ;;  %8468 = vmatpush1.bf16.msra.mxu1 %v11760_v5  ;;  %v13792_v5 = vpack.c.bf16 %v13699_v3, %v13699_v3  ;;  %v11835_v3 = vld [vmem:[%s12552_s7 + $0x828] ss:$16 sps:$4 sm:$0xff]  }
 0x431   : > { %v5360_v55 = vcombine.low %v5288_v48, %v5290_v50  ;;  %v5292_v38 = vpop.f32.mrb[14].mxu0  ;;  %8714 = vmatpush1.bf16.msra.mxu0 %v11763_v11  ;;  %8469 = vmatprep.subr.bf16.mxu1 %v11768_v47  ;;  %v11829_v11 = vld [vmem:[%s12552_s7 + $0x808] ss:$16 sps:$4 sm:$0xff]   ;;  %v11834_v47 = vld [vmem:[%s12552_s7 + $0xa24] ss:$16 sps:$4 sm:$0xff]   ;;  %v13797_v48 = vpack.c.bf16 %v5568_v44, %v5568_v44 }
 0x432   : > { %v5293_v62 = vpop.f32.mrb[15].mxu0  ;;  %8715 = vmatprep.subr.bf16.mxu0 %v11771_v49  ;;  %v11837_v49 = vld [vmem:[%s12552_s7 + $0x82c] ss:$16 sps:$4 sm:$0xff]   ;;  %v11832_v50 = vld [vmem:[%s12552_s7 + $0xa20] ss:$16 sps:$4 sm:$0xff]  }
 0x433   : > { %v5367_v57 = vrot.slane %v5360_v55, %v13102_v51  ;;  %v11843_v55 = vld [vmem:[%s12552_s7 + $0x84c] ss:$16 sps:$4 sm:$0xff]   ;;  %v11841_v38 = vld [vmem:[%s12552_s7 + $0x848] ss:$16 sps:$4 sm:$0xff]   ;;  %v11912_v44 = vld [vmem:[%s12552_s7 + $0xbc4] ss:$16 sps:$4 sm:$0xff]  }
 0x434   : > { %8470 = vmatpush1.bf16.msra.mxu1 %v11766_v56  ;;  %v11846_v56 = vld [vmem:[%s12552_s7 + $0xa64] ss:$16 sps:$4 sm:$0xff]   ;;  %v11849_v62 = vld [vmem:[%s12552_s7 + $0x86c] ss:$16 sps:$4 sm:$0xff]  }
 0x435   : > { %v5375_v63 = vadd.f32 %v5367_v57, %v346_v37  ;;  %8716 = vmatpush1.bf16.msra.mxu0 %v11769_v39  ;;  %8471 = vmatprep.subr.bf16.mxu1 %v11774_v40  ;;  %v11840_v37 = vld [vmem:[%s12552_s7 + $0xa44] ss:$16 sps:$4 sm:$0xff]   ;;  %v11847_v39 = vld [vmem:[%s12552_s7 + $0x868] ss:$16 sps:$4 sm:$0xff]   ;;  %v11855_v57 = vld [vmem:[%s12552_s7 + $0x88c] ss:$16 sps:$4 sm:$0xff]  }
 0x436   : > { %8717 = vmatprep.subr.bf16.mxu0 %v11777_v22  ;;  %v11852_v40 = vld [vmem:[%s12552_s7 + $0xa84] ss:$16 sps:$4 sm:$0xff]   ;;  %v11850_v22 = vld [vmem:[%s12552_s7 + $0xa80] ss:$16 sps:$4 sm:$0xff]  }
 0x437   : > { %5379 = vst [vmem:[#allocation2 + $0x18] sm:$0xf] %v5375_v63  ;;  %v11853_v63 = vld [vmem:[%s12552_s7 + $0x888] ss:$16 sps:$4 sm:$0xff]  }
 0x438   : > { %8472 = vmatpush1.bf16.msra.mxu1 %v11772_v58  ;;  %v11858_v58 = vld [vmem:[%s12552_s7 + $0xaa4] ss:$16 sps:$4 sm:$0xff]  }
 0x439   : > { %8718 = vmatpush1.bf16.msra.mxu0 %v11775_v30  ;;  %8473 = vmatprep.subr.bf16.mxu1 %v11780_v36  ;;  %v11861_v30 = vld [vmem:[%s12552_s7 + $0x8ac] ss:$16 sps:$4 sm:$0xff]   ;;  %v11856_v36 = vld [vmem:[%s12552_s7 + $0xaa0] ss:$16 sps:$4 sm:$0xff]  }
 0x43a   : > { %8719 = vmatprep.subr.bf16.mxu0 %v11783_v59  ;;  %v11859_v59 = vld [vmem:[%s12552_s7 + $0x8a8] ss:$16 sps:$4 sm:$0xff]  }
 0x43c   : > { %8474 = vmatpush1.bf16.msra.mxu1 %v11778_v60  ;;  %v11864_v60 = vld [vmem:[%s12552_s7 + $0xac4] ss:$16 sps:$4 sm:$0xff]  }
 0x43d   : > { %8720 = vmatpush1.bf16.msra.mxu0 %v11781_v6  ;;  %8475 = vmatprep.subr.bf16.mxu1 %v11786_v61  ;;  %v11867_v6 = vld [vmem:[%s12552_s7 + $0x8cc] ss:$16 sps:$4 sm:$0xff]   ;;  %v11862_v61 = vld [vmem:[%s12552_s7 + $0xac0] ss:$16 sps:$4 sm:$0xff]  }
 0x43e   : > { %8721 = vmatprep.subr.bf16.mxu0 %v11789_v29  ;;  %v11865_v29 = vld [vmem:[%s12552_s7 + $0x8c8] ss:$16 sps:$4 sm:$0xff]  }
 0x440   : > { %8476 = vmatpush1.bf16.msra.mxu1 %v11784_v13  ;;  %v11870_v13 = vld [vmem:[%s12552_s7 + $0xae4] ss:$16 sps:$4 sm:$0xff]  }
 0x441   : > { %8722 = vmatpush1.bf16.msra.mxu0 %v11787_v4  ;;  %8477 = vmatprep.subr.bf16.mxu1 %v11792_v8  ;;  %v11873_v4 = vld [vmem:[%s12552_s7 + $0x8ec] ss:$16 sps:$4 sm:$0xff]   ;;  %v11868_v8 = vld [vmem:[%s12552_s7 + $0xae0] ss:$16 sps:$4 sm:$0xff]  }
 0x442   : > { %8723 = vmatprep.subr.bf16.mxu0 %v11795_v27  ;;  %v11871_v27 = vld [vmem:[%s12552_s7 + $0x8e8] ss:$16 sps:$4 sm:$0xff]  }
 0x444   : > { %8478 = vmatpush1.bf16.msra.mxu1 %v11790_v10  ;;  %v11876_v10 = vld [vmem:[%s12552_s7 + $0xb04] ss:$16 sps:$4 sm:$0xff]  }
 0x445   : > { %8724 = vmatpush1.bf16.msra.mxu0 %v11793_v24  ;;  %8479 = vmatprep.subr.bf16.mxu1 %v11798_v9  ;;  %v11879_v24 = vld [vmem:[%s12552_s7 + $0x90c] ss:$16 sps:$4 sm:$0xff]   ;;  %v11874_v9 = vld [vmem:[%s12552_s7 + $0xb00] ss:$16 sps:$4 sm:$0xff]  }
 0x446   : > { %8725 = vmatprep.subr.bf16.mxu0 %v11801_v14  ;;  %v11877_v14 = vld [vmem:[%s12552_s7 + $0x908] ss:$16 sps:$4 sm:$0xff]  }
 0x448   : > { %8480 = vmatpush1.bf16.msra.mxu1 %v11796_v18  ;;  %v11882_v18 = vld [vmem:[%s12552_s7 + $0xb24] ss:$16 sps:$4 sm:$0xff]  }
 0x449   : > { %8726 = vmatpush1.bf16.msra.mxu0 %v11799_v20  ;;  %8481 = vmatprep.subr.bf16.mxu1 %v11804_v21  ;;  %v11885_v20 = vld [vmem:[%s12552_s7 + $0x92c] ss:$16 sps:$4 sm:$0xff]   ;;  %v11880_v21 = vld [vmem:[%s12552_s7 + $0xb20] ss:$16 sps:$4 sm:$0xff]  }
 0x44a   : > { %8727 = vmatprep.subr.bf16.mxu0 %v11807_v0  ;;  %v11883_v0 = vld [vmem:[%s12552_s7 + $0x928] ss:$16 sps:$4 sm:$0xff]  }
 0x44c   : > { %8482 = vmatpush1.bf16.msra.mxu1 %v11802_v2  ;;  %v11888_v2 = vld [vmem:[%s12552_s7 + $0xb44] ss:$16 sps:$4 sm:$0xff]  }
 0x44d   : > { %8728 = vmatpush1.bf16.msra.mxu0 %v11805_v25  ;;  %8483 = vmatprep.subr.bf16.mxu1 %v11810_v28  ;;  %v11891_v25 = vld [vmem:[%s12552_s7 + $0x94c] ss:$16 sps:$4 sm:$0xff]   ;;  %v11886_v28 = vld [vmem:[%s12552_s7 + $0xb40] ss:$16 sps:$4 sm:$0xff]  }
 0x44e   : > { %8729 = vmatprep.subr.bf16.mxu0 %v11813_v31  ;;  %v11889_v31 = vld [vmem:[%s12552_s7 + $0x948] ss:$16 sps:$4 sm:$0xff]  }
 0x450   : > { %8484 = vmatpush1.bf16.msra.mxu1 %v11808_v54  ;;  %v11894_v54 = vld [vmem:[%s12552_s7 + $0xb64] ss:$16 sps:$4 sm:$0xff]  }
 0x451   : > { %8730 = vmatpush1.bf16.msra.mxu0 %v11811_v32  ;;  %8485 = vmatprep.subr.bf16.mxu1 %v11816_v19  ;;  %v11897_v32 = vld [vmem:[%s12552_s7 + $0x96c] ss:$16 sps:$4 sm:$0xff]   ;;  %v5442_v19 = vrot.slane %v13653_v23, %v5409_v35  ;;  %v11898_v35 = vld [vmem:[%s12552_s7 + $0xb80] ss:$16 sps:$4 sm:$0xff]  }
 0x452   : > { %8731 = vmatprep.subr.bf16.mxu0 %v11819_v53  ;;  %v5446_v53 = vrot.slane %v13653_v23, %v5413_v41  ;;  %v11906_v41 = vld [vmem:[%s12552_s7 + $0xba4] ss:$16 sps:$4 sm:$0xff]   ;;  %v11909_v23 = vld [vmem:[%s12552_s7 + $0x9ac] ss:$16 sps:$4 sm:$0xff]  }
 0x454   : > { %8486 = vmatpush1.bf16.msra.mxu1 %v11814_v16  ;;  %v11895_v16 = vld [vmem:[%s12552_s7 + $0x968] ss:$16 sps:$4 sm:$0xff]  }
 0x455   : > { %8732 = vmatpush1.bf16.msra.mxu0 %v11817_v17  ;;  %8487 = vmatprep.subr.bf16.mxu1 %v11822_v15  ;;  %v11900_v17 = vld [vmem:[%s12552_s7 + $0xb84] ss:$16 sps:$4 sm:$0xff]   ;;  %v11903_v15 = vld [vmem:[%s12552_s7 + $0x98c] ss:$16 sps:$4 sm:$0xff]  }
 0x456   : > { %8733 = vmatprep.subr.bf16.mxu0 %v11825_v33  ;;  %v5498_v33 = vcombine.low %v5442_v19, %v5446_v53  ;;  %v11973_v19 = vld [vmem:[%s12552_s7 + $0xb08] ss:$16 sps:$4 sm:$0xff]   ;;  %v11978_v53 = vld [vmem:[%s12552_s7 + $0xd24] ss:$16 sps:$4 sm:$0xff]  }
 0x458   : > { %8488 = vmatpush1.bf16.msra.mxu1 %v11820_v34  ;;  %v5505_v34 = vrot.slane %v5498_v33, %v13102_v51  ;;  %v11987_v33 = vld [vmem:[%s12552_s7 + $0xb4c] ss:$16 sps:$4 sm:$0xff]  }
 0x459   : > { %8734 = vmatpush1.bf16.msra.mxu0 %v11823_v7  ;;  %8498 = vmatprep.subr.bf16.mxu1 %v11828_v42  ;;  %v11904_v7 = vld [vmem:[%s12552_s7 + $0xba0] ss:$16 sps:$4 sm:$0xff]   ;;  %v5386_v42 = vld [vmem:[#allocation2 + $0x18] sm:$0xf] }
 0x45a   : > { %8744 = vmatprep.subr.bf16.mxu0 %v11831_v52  ;;  %v11907_v52 = vld [vmem:[%s12552_s7 + $0x9a8] ss:$16 sps:$4 sm:$0xff]  }
 0x45b   : > { %8490 = vmatmul.mubr.bf16.vlgmr.msra.gmra.mrb[16].mxu1 %v13792_v5 }
 0x45c   : > { %8736 = vmatmul.mubr.bf16.vlgmr.msra.gmra.mrb[16].mxu0 %v13710_v1  ;;  %8499 = vmatpush1.bf16.msra.mxu1 %v11826_v46  ;;  %v11838_v1 = vld [vmem:[%s12552_s7 + $0xa40] ss:$16 sps:$4 sm:$0xff]   ;;  %v11915_v46 = vld [vmem:[%s12552_s7 + $0x9cc] ss:$16 sps:$4 sm:$0xff]  }
 0x45d   : > { %8530 = vmatprep.mubr.bf16.mxu1 %v13797_v48  ;;  %8745 = vmatpush1.bf16.msra.mxu0 %v11829_v11  ;;  %v5513_v11 = vadd.f32 %v5505_v34, %v5386_v42  ;;  %v11988_v34 = vld [vmem:[%s12552_s7 + $0xd60] ss:$16 sps:$4 sm:$0xff]   ;;  %v11996_v42 = vld [vmem:[%s12552_s7 + $0xd84] ss:$16 sps:$4 sm:$0xff]  }
 0x45e   : > { %8776 = vmatprep.mubr.bf16.mxu0 %v13715_v26  ;;  %8500 = vmatprep.subr.bf16.mxu1 %v11834_v47  ;;  %v11844_v26 = vld [vmem:[%s12552_s7 + $0xa60] ss:$16 sps:$4 sm:$0xff]  }
 0x45f   : > { %8746 = vmatprep.subr.bf16.mxu0 %v11837_v49  ;;  %v11910_v47 = vld [vmem:[%s12552_s7 + $0xbc0] ss:$16 sps:$4 sm:$0xff]   ;;  %v11913_v49 = vld [vmem:[%s12552_s7 + $0x9c8] ss:$16 sps:$4 sm:$0xff]  }
 0x460   : > { %8501 = vmatpush1.bf16.msra.mxu1 %v11832_v50  ;;  %v11918_v50 = vld [vmem:[%s12552_s7 + $0xbe4] ss:$16 sps:$4 sm:$0xff]  }
 0x461   : > { %8747 = vmatpush1.bf16.msra.mxu0 %v11835_v3  ;;  %8502 = vmatprep.subr.bf16.mxu1 %v11840_v37  ;;  %v11921_v3 = vld [vmem:[%s12552_s7 + $0x9ec] ss:$16 sps:$4 sm:$0xff]   ;;  %v13867_v37 = vrot.slane %v5513_v11, %v13102_v51  ;;  %v12002_v11 = vld [vmem:[%s12552_s7 + $0xda4] ss:$16 sps:$4 sm:$0xff]  }
 0x462   : > { %8748 = vmatprep.subr.bf16.mxu0 %v11843_v55  ;;  %v11916_v55 = vld [vmem:[%s12552_s7 + $0xbe0] ss:$16 sps:$4 sm:$0xff]  }
 0x464   : > { %8503 = vmatpush1.bf16.msra.mxu1 %v11838_v1  ;;  %v11919_v1 = vld [vmem:[%s12552_s7 + $0x9e8] ss:$16 sps:$4 sm:$0xff]  }
 0x465   : > { %8749 = vmatpush1.bf16.msra.mxu0 %v11841_v38  ;;  %8504 = vmatprep.subr.bf16.mxu1 %v11846_v56  ;;  %v11924_v38 = vld [vmem:[%s12552_s7 + $0xc04] ss:$16 sps:$4 sm:$0xff]   ;;  %v11927_v56 = vld [vmem:[%s12552_s7 + $0xa0c] ss:$16 sps:$4 sm:$0xff]  }
 0x466   : > { %8750 = vmatprep.subr.bf16.mxu0 %v11849_v62  ;;  %v5576_v62 = vcombine.high %v13867_v37, %v13867_v37 }
 0x468   : > { %8505 = vmatpush1.bf16.msra.mxu1 %v11844_v26  ;;  %v11922_v26 = vld [vmem:[%s12552_s7 + $0xc00] ss:$16 sps:$4 sm:$0xff]  }
 0x469   : > { %8751 = vmatpush1.bf16.msra.mxu0 %v11847_v39  ;;  %8506 = vmatprep.subr.bf16.mxu1 %v11852_v40  ;;  %v13878_v39 = vpack.c.bf16 %v13781_v45, %v13781_v45  ;;  %v11925_v40 = vld [vmem:[%s12552_s7 + $0xa08] ss:$16 sps:$4 sm:$0xff]  }
 0x46a   : > { %8752 = vmatprep.subr.bf16.mxu0 %v11855_v57  ;;  %v11930_v57 = vld [vmem:[%s12552_s7 + $0xc24] ss:$16 sps:$4 sm:$0xff]   ;;  %v11931_v45 = vld [vmem:[%s12552_s7 + $0xa28] ss:$16 sps:$4 sm:$0xff]  }
 0x46c   : > { %8507 = vmatpush1.bf16.msra.mxu1 %v11850_v22  ;;  %v13883_v22 = vpack.c.bf16 %v5576_v62, %v5576_v62  ;;  %v12017_v62 = vld [vmem:[%s12552_s7 + $0xbec] ss:$16 sps:$4 sm:$0xff]  }
 0x46d   : > { %8753 = vmatpush1.bf16.msra.mxu0 %v11853_v63  ;;  %8508 = vmatprep.subr.bf16.mxu1 %v11858_v58  ;;  %v11933_v63 = vld [vmem:[%s12552_s7 + $0xa2c] ss:$16 sps:$4 sm:$0xff]   ;;  %v11928_v58 = vld [vmem:[%s12552_s7 + $0xc20] ss:$16 sps:$4 sm:$0xff]  }
 0x46e   : > { %8754 = vmatprep.subr.bf16.mxu0 %v11861_v30  ;;  %v11936_v30 = vld [vmem:[%s12552_s7 + $0xc44] ss:$16 sps:$4 sm:$0xff]  }
 0x470   : > { %8509 = vmatpush1.bf16.msra.mxu1 %v11856_v36  ;;  %v11939_v36 = vld [vmem:[%s12552_s7 + $0xa4c] ss:$16 sps:$4 sm:$0xff]  }
 0x471   : > { %8755 = vmatpush1.bf16.msra.mxu0 %v11859_v59  ;;  %8510 = vmatprep.subr.bf16.mxu1 %v11864_v60  ;;  %v11937_v59 = vld [vmem:[%s12552_s7 + $0xa48] ss:$16 sps:$4 sm:$0xff]   ;;  %v11942_v60 = vld [vmem:[%s12552_s7 + $0xc64] ss:$16 sps:$4 sm:$0xff]  }
 0x472   : > { %8756 = vmatprep.subr.bf16.mxu0 %v11867_v6  ;;  %v11945_v6 = vld [vmem:[%s12552_s7 + $0xa6c] ss:$16 sps:$4 sm:$0xff]  }
 0x474   : > { %8511 = vmatpush1.bf16.msra.mxu1 %v11862_v61  ;;  %v11943_v61 = vld [vmem:[%s12552_s7 + $0xa68] ss:$16 sps:$4 sm:$0xff]  }
 0x475   : > { %8757 = vmatpush1.bf16.msra.mxu0 %v11865_v29  ;;  %8512 = vmatprep.subr.bf16.mxu1 %v11870_v13  ;;  %v11948_v29 = vld [vmem:[%s12552_s7 + $0xc84] ss:$16 sps:$4 sm:$0xff]   ;;  %v11951_v13 = vld [vmem:[%s12552_s7 + $0xa8c] ss:$16 sps:$4 sm:$0xff]  }
 0x476   : > { %8758 = vmatprep.subr.bf16.mxu0 %v11873_v4  ;;  %v11946_v4 = vld [vmem:[%s12552_s7 + $0xc80] ss:$16 sps:$4 sm:$0xff]  }
 0x478   : > { %8513 = vmatpush1.bf16.msra.mxu1 %v11868_v8  ;;  %v11949_v8 = vld [vmem:[%s12552_s7 + $0xa88] ss:$16 sps:$4 sm:$0xff]  }
 0x479   : > { %8759 = vmatpush1.bf16.msra.mxu0 %v11871_v27  ;;  %8514 = vmatprep.subr.bf16.mxu1 %v11876_v10  ;;  %v11954_v27 = vld [vmem:[%s12552_s7 + $0xca4] ss:$16 sps:$4 sm:$0xff]   ;;  %v11957_v10 = vld [vmem:[%s12552_s7 + $0xaac] ss:$16 sps:$4 sm:$0xff]  }
 0x47a   : > { %8760 = vmatprep.subr.bf16.mxu0 %v11879_v24  ;;  %v11952_v24 = vld [vmem:[%s12552_s7 + $0xca0] ss:$16 sps:$4 sm:$0xff]  }
 0x47c   : > { %8515 = vmatpush1.bf16.msra.mxu1 %v11874_v9  ;;  %v11955_v9 = vld [vmem:[%s12552_s7 + $0xaa8] ss:$16 sps:$4 sm:$0xff]  }
 0x47d   : > { %8761 = vmatpush1.bf16.msra.mxu0 %v11877_v14  ;;  %8516 = vmatprep.subr.bf16.mxu1 %v11882_v18  ;;  %v11960_v14 = vld [vmem:[%s12552_s7 + $0xcc4] ss:$16 sps:$4 sm:$0xff]   ;;  %v11963_v18 = vld [vmem:[%s12552_s7 + $0xacc] ss:$16 sps:$4 sm:$0xff]  }
 0x47e   : > { %8762 = vmatprep.subr.bf16.mxu0 %v11885_v20  ;;  %v11958_v20 = vld [vmem:[%s12552_s7 + $0xcc0] ss:$16 sps:$4 sm:$0xff]  }
 0x480   : > { %8517 = vmatpush1.bf16.msra.mxu1 %v11880_v21  ;;  %v11961_v21 = vld [vmem:[%s12552_s7 + $0xac8] ss:$16 sps:$4 sm:$0xff]  }
 0x481   : > { %8763 = vmatpush1.bf16.msra.mxu0 %v11883_v0  ;;  %8518 = vmatprep.subr.bf16.mxu1 %v11888_v2  ;;  %v11966_v0 = vld [vmem:[%s12552_s7 + $0xce4] ss:$16 sps:$4 sm:$0xff]   ;;  %v11969_v2 = vld [vmem:[%s12552_s7 + $0xaec] ss:$16 sps:$4 sm:$0xff]  }
 0x482   : > { %8764 = vmatprep.subr.bf16.mxu0 %v11891_v25  ;;  %v11964_v25 = vld [vmem:[%s12552_s7 + $0xce0] ss:$16 sps:$4 sm:$0xff]  }
 0x484   : > { %8519 = vmatpush1.bf16.msra.mxu1 %v11886_v28  ;;  %v11967_v28 = vld [vmem:[%s12552_s7 + $0xae8] ss:$16 sps:$4 sm:$0xff]  }
 0x485   : > { %8765 = vmatpush1.bf16.msra.mxu0 %v11889_v31  ;;  %8520 = vmatprep.subr.bf16.mxu1 %v11894_v54  ;;  %v11972_v31 = vld [vmem:[%s12552_s7 + $0xd04] ss:$16 sps:$4 sm:$0xff]   ;;  %v11975_v54 = vld [vmem:[%s12552_s7 + $0xb0c] ss:$16 sps:$4 sm:$0xff]  }
 0x486   : > { %8766 = vmatprep.subr.bf16.mxu0 %v11897_v32  ;;  %v11970_v32 = vld [vmem:[%s12552_s7 + $0xd00] ss:$16 sps:$4 sm:$0xff]  }
 0x488   : > { %8521 = vmatpush1.bf16.msra.mxu1 %v11892_v12  ;;  %v11981_v12 = vld [vmem:[%s12552_s7 + $0xb2c] ss:$16 sps:$4 sm:$0xff]  }
 0x489   : > { %8767 = vmatpush1.bf16.msra.mxu0 %v11895_v16  ;;  %8522 = vmatprep.subr.bf16.mxu1 %v11900_v17  ;;  %v11976_v16 = vld [vmem:[%s12552_s7 + $0xd20] ss:$16 sps:$4 sm:$0xff]   ;;  %v11979_v17 = vld [vmem:[%s12552_s7 + $0xb28] ss:$16 sps:$4 sm:$0xff]  }
 0x48a   : > { %8768 = vmatprep.subr.bf16.mxu0 %v11903_v15  ;;  %v11984_v15 = vld [vmem:[%s12552_s7 + $0xd44] ss:$16 sps:$4 sm:$0xff]  }
 0x48c   : > { %8523 = vmatpush1.bf16.msra.mxu1 %v11898_v35  ;;  %v11982_v35 = vld [vmem:[%s12552_s7 + $0xd40] ss:$16 sps:$4 sm:$0xff]  }
 0x48d   : > { %8769 = vmatpush1.bf16.msra.mxu0 %v11901_v43  ;;  %8524 = vmatprep.subr.bf16.mxu1 %v11906_v41  ;;  %v11985_v43 = vld [vmem:[%s12552_s7 + $0xb48] ss:$16 sps:$4 sm:$0xff]   ;;  %v11990_v41 = vld [vmem:[%s12552_s7 + $0xd64] ss:$16 sps:$4 sm:$0xff]  }
 0x48e   : > { %8770 = vmatprep.subr.bf16.mxu0 %v11909_v23  ;;  %v11993_v23 = vld [vmem:[%s12552_s7 + $0xb6c] ss:$16 sps:$4 sm:$0xff]  }
 0x490   : > { %8525 = vmatpush1.bf16.msra.mxu1 %v11904_v7  ;;  %v11991_v7 = vld [vmem:[%s12552_s7 + $0xb68] ss:$16 sps:$4 sm:$0xff]  }
 0x491   : > { %8771 = vmatpush1.bf16.msra.mxu0 %v11907_v52  ;;  %8526 = vmatprep.subr.bf16.mxu1 %v11912_v44  ;;  %v11999_v52 = vld [vmem:[%s12552_s7 + $0xb8c] ss:$16 sps:$4 sm:$0xff]   ;;  %v11994_v44 = vld [vmem:[%s12552_s7 + $0xd80] ss:$16 sps:$4 sm:$0xff]  }
 0x492   : > { %8772 = vmatprep.subr.bf16.mxu0 %v11915_v46  ;;  %v11997_v46 = vld [vmem:[%s12552_s7 + $0xb88] ss:$16 sps:$4 sm:$0xff]  }
 0x494   : > { %8527 = vmatpush1.bf16.msra.mxu1 %v11910_v47  ;;  %v12005_v47 = vld [vmem:[%s12552_s7 + $0xbac] ss:$16 sps:$4 sm:$0xff]  }
 0x495   : > { %8773 = vmatpush1.bf16.msra.mxu0 %v11913_v49  ;;  %8528 = vmatprep.subr.bf16.mxu1 %v11918_v50  ;;  %v12000_v49 = vld [vmem:[%s12552_s7 + $0xda0] ss:$16 sps:$4 sm:$0xff]   ;;  %v12003_v50 = vld [vmem:[%s12552_s7 + $0xba8] ss:$16 sps:$4 sm:$0xff]  }
 0x496   : > { %8774 = vmatprep.subr.bf16.mxu0 %v11921_v3  ;;  %v12008_v3 = vld [vmem:[%s12552_s7 + $0xdc4] ss:$16 sps:$4 sm:$0xff]  }
 0x498   : > { %8529 = vmatpush1.bf16.msra.mxu1 %v11916_v55  ;;  %v12011_v55 = vld [vmem:[%s12552_s7 + $0xbcc] ss:$16 sps:$4 sm:$0xff]  }
 0x499   : > { %8775 = vmatpush1.bf16.msra.mxu0 %v11919_v1  ;;  %8539 = vmatprep.subr.bf16.mxu1 %v11924_v38  ;;  %v12006_v1 = vld [vmem:[%s12552_s7 + $0xdc0] ss:$16 sps:$4 sm:$0xff]   ;;  %v12009_v38 = vld [vmem:[%s12552_s7 + $0xbc8] ss:$16 sps:$4 sm:$0xff]  }
 0x49a   : > { %8785 = vmatprep.subr.bf16.mxu0 %v11927_v56  ;;  %v12014_v56 = vld [vmem:[%s12552_s7 + $0xde4] ss:$16 sps:$4 sm:$0xff]  }
 0x49b   : > { %8531 = vmatmul.mubr.bf16.vlgmr.msra.gmra.mrb[16].mxu1 %v13878_v39 }
 0x49c   : > { %8777 = vmatmul.mubr.bf16.vlgmr.msra.gmra.mrb[16].mxu0 %v13792_v5  ;;  %8540 = vmatpush1.bf16.msra.mxu1 %v11922_v26  ;;  %v11934_v5 = vld [vmem:[%s12552_s7 + $0xc40] ss:$16 sps:$4 sm:$0xff]  }
 0x49d   : > { %8571 = vmatprep.mubr.bf16.mxu1 %v13883_v22  ;;  %8786 = vmatpush1.bf16.msra.mxu0 %v11925_v40  ;;  %v12012_v26 = vld [vmem:[%s12552_s7 + $0xde0] ss:$16 sps:$4 sm:$0xff]   ;;  %v12015_v40 = vld [vmem:[%s12552_s7 + $0xbe8] ss:$16 sps:$4 sm:$0xff]  }
 0x49e   : > { %8817 = vmatprep.mubr.bf16.mxu0 %v13797_v48  ;;  %8541 = vmatprep.subr.bf16.mxu1 %v11930_v57  ;;  %v11940_v48 = vld [vmem:[%s12552_s7 + $0xc60] ss:$16 sps:$4 sm:$0xff]   ;;  %v12020_v57 = vld [vmem:[%s12552_s7 + $0xc0c] ss:$16 sps:$4 sm:$0xff]  }
 0x49f   : > { %8787 = vmatprep.subr.bf16.mxu0 %v11933_v63  ;;  %v13950_v63 = vpack.c.bf16 %v13867_v37, %v13867_v37  ;;  %v12024_v37 = vld [vmem:[%s12552_s7 + $0xc48] ss:$16 sps:$4 sm:$0xff]  }
 0x4a0   : > { %8542 = vmatpush1.bf16.msra.mxu1 %v11928_v58  ;;  %v12018_v58 = vld [vmem:[%s12552_s7 + $0xc08] ss:$16 sps:$4 sm:$0xff]  }
 0x4a1   : > { %8788 = vmatpush1.bf16.msra.mxu0 %v11931_v45  ;;  %8543 = vmatprep.subr.bf16.mxu1 %v11936_v30  ;;  %v12023_v45 = vld [vmem:[%s12552_s7 + $0xc2c] ss:$16 sps:$4 sm:$0xff]   ;;  %v12021_v30 = vld [vmem:[%s12552_s7 + $0xc28] ss:$16 sps:$4 sm:$0xff]  }
 0x4a2   : > { %8789 = vmatprep.subr.bf16.mxu0 %v11939_v36  ;;  %v12026_v36 = vld [vmem:[%s12552_s7 + $0xc4c] ss:$16 sps:$4 sm:$0xff]  }
 0x4a4   : > { %8544 = vmatpush1.bf16.msra.mxu1 %v11934_v5  ;;  %v12029_v5 = vld [vmem:[%s12552_s7 + $0xc6c] ss:$16 sps:$4 sm:$0xff]  }
 0x4a5   : > { %8790 = vmatpush1.bf16.msra.mxu0 %v11937_v59  ;;  %8545 = vmatprep.subr.bf16.mxu1 %v11942_v60  ;;  %v12027_v59 = vld [vmem:[%s12552_s7 + $0xc68] ss:$16 sps:$4 sm:$0xff]  }
 0x4a6   : > { %8791 = vmatprep.subr.bf16.mxu0 %v11945_v6  ;;  %v12030_v60 = vld [vmem:[%s12552_s7 + $0xc88] ss:$16 sps:$4 sm:$0xff]  }
 0x4a7   : > { %v12033_v6 = vld [vmem:[%s12552_s7 + $0xca8] ss:$16 sps:$4 sm:$0xff]  }
 0x4a8   : > { %8546 = vmatpush1.bf16.msra.mxu1 %v11940_v48  ;;  %v12038_v48 = vld [vmem:[%s12552_s7 + $0xccc] ss:$16 sps:$4 sm:$0xff]  }
 0x4a9   : > { %8792 = vmatpush1.bf16.msra.mxu0 %v11943_v61  ;;  %8547 = vmatprep.subr.bf16.mxu1 %v11948_v29  ;;  %v12036_v61 = vld [vmem:[%s12552_s7 + $0xcc8] ss:$16 sps:$4 sm:$0xff]   ;;  %v12041_v29 = vld [vmem:[%s12552_s7 + $0xcec] ss:$16 sps:$4 sm:$0xff]  }
 0x4aa   : > { %8793 = vmatprep.subr.bf16.mxu0 %v11951_v13  ;;  %v12039_v13 = vld [vmem:[%s12552_s7 + $0xce8] ss:$16 sps:$4 sm:$0xff]  }
 0x4ac   : > { %8548 = vmatpush1.bf16.msra.mxu1 %v11946_v4  ;;  %v12044_v4 = vld [vmem:[%s12552_s7 + $0xd0c] ss:$16 sps:$4 sm:$0xff]  }
 0x4ad   : > { %8794 = vmatpush1.bf16.msra.mxu0 %v11949_v8  ;;  %8549 = vmatprep.subr.bf16.mxu1 %v11954_v27  ;;  %v12042_v8 = vld [vmem:[%s12552_s7 + $0xd08] ss:$16 sps:$4 sm:$0xff]   ;;  %v12047_v27 = vld [vmem:[%s12552_s7 + $0xd2c] ss:$16 sps:$4 sm:$0xff]  }
 0x4ae   : > { %8795 = vmatprep.subr.bf16.mxu0 %v11957_v10  ;;  %v12045_v10 = vld [vmem:[%s12552_s7 + $0xd28] ss:$16 sps:$4 sm:$0xff]  }
 0x4b0   : > { %8550 = vmatpush1.bf16.msra.mxu1 %v11952_v24  ;;  %v12050_v24 = vld [vmem:[%s12552_s7 + $0xd4c] ss:$16 sps:$4 sm:$0xff]  }
 0x4b1   : > { %8796 = vmatpush1.bf16.msra.mxu0 %v11955_v9  ;;  %8551 = vmatprep.subr.bf16.mxu1 %v11960_v14  ;;  %v12048_v9 = vld [vmem:[%s12552_s7 + $0xd48] ss:$16 sps:$4 sm:$0xff]   ;;  %v12053_v14 = vld [vmem:[%s12552_s7 + $0xd6c] ss:$16 sps:$4 sm:$0xff]  }
 0x4b2   : > { %8797 = vmatprep.subr.bf16.mxu0 %v11963_v18  ;;  %v12051_v18 = vld [vmem:[%s12552_s7 + $0xd68] ss:$16 sps:$4 sm:$0xff]  }
 0x4b4   : > { %8552 = vmatpush1.bf16.msra.mxu1 %v11958_v20  ;;  %v12056_v20 = vld [vmem:[%s12552_s7 + $0xd8c] ss:$16 sps:$4 sm:$0xff]  }
 0x4b5   : > { %8798 = vmatpush1.bf16.msra.mxu0 %v11961_v21  ;;  %8553 = vmatprep.subr.bf16.mxu1 %v11966_v0  ;;  %v12054_v21 = vld [vmem:[%s12552_s7 + $0xd88] ss:$16 sps:$4 sm:$0xff]   ;;  %v12059_v0 = vld [vmem:[%s12552_s7 + $0xdac] ss:$16 sps:$4 sm:$0xff]  }
 0x4b6   : > { %8799 = vmatprep.subr.bf16.mxu0 %v11969_v2  ;;  %v12057_v2 = vld [vmem:[%s12552_s7 + $0xda8] ss:$16 sps:$4 sm:$0xff]  }
 0x4b8   : > { %8554 = vmatpush1.bf16.msra.mxu1 %v11964_v25  ;;  %v12062_v25 = vld [vmem:[%s12552_s7 + $0xdcc] ss:$16 sps:$4 sm:$0xff]  }
 0x4b9   : > { %8800 = vmatpush1.bf16.msra.mxu0 %v11967_v28  ;;  %8555 = vmatprep.subr.bf16.mxu1 %v11972_v31  ;;  %v12060_v28 = vld [vmem:[%s12552_s7 + $0xdc8] ss:$16 sps:$4 sm:$0xff]   ;;  %v12065_v31 = vld [vmem:[%s12552_s7 + $0xdec] ss:$16 sps:$4 sm:$0xff]  }
 0x4ba   : > { %8801 = vmatprep.subr.bf16.mxu0 %v11975_v54  ;;  %v12063_v54 = vld [vmem:[%s12552_s7 + $0xde8] ss:$16 sps:$4 sm:$0xff]  }
 0x4bc   : > { %8556 = vmatpush1.bf16.msra.mxu1 %v11970_v32 }
 0x4bd   : > { %8802 = vmatpush1.bf16.msra.mxu0 %v11973_v19  ;;  %8557 = vmatprep.subr.bf16.mxu1 %v11978_v53 }
 0x4be   : > { %8803 = vmatprep.subr.bf16.mxu0 %v11981_v12 }
 0x4c0   : > { %8558 = vmatpush1.bf16.msra.mxu1 %v11976_v16 }
 0x4c1   : > { %8804 = vmatpush1.bf16.msra.mxu0 %v11979_v17  ;;  %8559 = vmatprep.subr.bf16.mxu1 %v11984_v15 }
 0x4c2   : > { %8805 = vmatprep.subr.bf16.mxu0 %v11987_v33 }
 0x4c4   : > { %8560 = vmatpush1.bf16.msra.mxu1 %v11982_v35 }
 0x4c5   : > { %8806 = vmatpush1.bf16.msra.mxu0 %v11985_v43  ;;  %8561 = vmatprep.subr.bf16.mxu1 %v11990_v41 }
 0x4c6   : > { %8807 = vmatprep.subr.bf16.mxu0 %v11993_v23 }
 0x4c8   : > { %8562 = vmatpush1.bf16.msra.mxu1 %v11988_v34 }
 0x4c9   : > { %8808 = vmatpush1.bf16.msra.mxu0 %v11991_v7  ;;  %8563 = vmatprep.subr.bf16.mxu1 %v11996_v42 }
 0x4ca   : > { %8809 = vmatprep.subr.bf16.mxu0 %v11999_v52 }
 0x4cc   : > { %8564 = vmatpush1.bf16.msra.mxu1 %v11994_v44 }
 0x4cd   : > { %8810 = vmatpush1.bf16.msra.mxu0 %v11997_v46  ;;  %8565 = vmatprep.subr.bf16.mxu1 %v12002_v11 }
 0x4ce   : > { %8811 = vmatprep.subr.bf16.mxu0 %v12005_v47 }
 0x4d0   : > { %8566 = vmatpush1.bf16.msra.mxu1 %v12000_v49 }
 0x4d1   : > { %8812 = vmatpush1.bf16.msra.mxu0 %v12003_v50  ;;  %8567 = vmatprep.subr.bf16.mxu1 %v12008_v3 }
 0x4d2   : > { %8813 = vmatprep.subr.bf16.mxu0 %v12011_v55 }
 0x4d4   : > { %8568 = vmatpush1.bf16.msra.mxu1 %v12006_v1 }
 0x4d5   : > { %8814 = vmatpush1.bf16.msra.mxu0 %v12009_v38  ;;  %8569 = vmatprep.subr.bf16.mxu1 %v12014_v56 }
 0x4d6   : > { %8815 = vmatprep.subr.bf16.mxu0 %v12017_v62 }
 0x4d8   : > { %8570 = vmatpush1.bf16.msra.mxu1 %v12012_v26 }
 0x4d9   : > { %8816 = vmatpush1.bf16.msra.mxu0 %v12015_v40 }
 0x4da   : > { %8826 = vmatprep.subr.bf16.mxu0 %v12020_v57 }
 0x4db   : > { %8572 = vmatmul.mubr.bf16.vlgmr.msra.gmra.mrb[16].mxu1 %v13950_v63 }
 0x4dc   : > { %8818 = vmatmul.mubr.bf16.vlgmr.msra.gmra.mrb[16].mxu0 %v13878_v39  ;;  %v12032_v39 = vld [vmem:[%s12552_s7 + $0xc8c] ss:$16 sps:$4 sm:$0xff]  }
 0x4dd   : > { %8827 = vmatpush1.bf16.msra.mxu0 %v12018_v58  ;;  %8858 = vmatprep.mubr.bf16.mxu0 %v13883_v22  ;;  %v12035_v22 = vld [vmem:[%s12552_s7 + $0xcac] ss:$16 sps:$4 sm:$0xff]  }
 0x4de   : > { %8828 = vmatprep.subr.bf16.mxu0 %v12023_v45 }
 0x4e1   : > { %8829 = vmatpush1.bf16.msra.mxu0 %v12021_v30 }
 0x4e2   : > { %8830 = vmatprep.subr.bf16.mxu0 %v12026_v36 }
 0x4e5   : > { %8831 = vmatpush1.bf16.msra.mxu0 %v12024_v37 }
 0x4e6   : > { %8832 = vmatprep.subr.bf16.mxu0 %v12029_v5 }
 0x4e9   : > { %8833 = vmatpush1.bf16.msra.mxu0 %v12027_v59 }
 0x4ea   : > { %8834 = vmatprep.subr.bf16.mxu0 %v12032_v39 }
 0x4ed   : > { %8835 = vmatpush1.bf16.msra.mxu0 %v12030_v60 }
 0x4ee   : > { %8836 = vmatprep.subr.bf16.mxu0 %v12035_v22 }
 0x4f1   : > { %8837 = vmatpush1.bf16.msra.mxu0 %v12033_v6 }
 0x4f2   : > { %8838 = vmatprep.subr.bf16.mxu0 %v12038_v48 }
 0x4f5   : > { %8839 = vmatpush1.bf16.msra.mxu0 %v12036_v61 }
 0x4f6   : > { %8840 = vmatprep.subr.bf16.mxu0 %v12041_v29 }
 0x4f9   : > { %8841 = vmatpush1.bf16.msra.mxu0 %v12039_v13 }
 0x4fa   : > { %8842 = vmatprep.subr.bf16.mxu0 %v12044_v4 }
 0x4fd   : > { %8843 = vmatpush1.bf16.msra.mxu0 %v12042_v8 }
 0x4fe   : > { %8844 = vmatprep.subr.bf16.mxu0 %v12047_v27 }
 0x501   : > { %8845 = vmatpush1.bf16.msra.mxu0 %v12045_v10 }
 0x502   : > { %8846 = vmatprep.subr.bf16.mxu0 %v12050_v24 }
 0x505   : > { %8847 = vmatpush1.bf16.msra.mxu0 %v12048_v9 }
 0x506   : > { %8848 = vmatprep.subr.bf16.mxu0 %v12053_v14 }
 0x509   : > { %8849 = vmatpush1.bf16.msra.mxu0 %v12051_v18 }
 0x50a   : > { %8850 = vmatprep.subr.bf16.mxu0 %v12056_v20 }
 0x50d   : > { %8851 = vmatpush1.bf16.msra.mxu0 %v12054_v21 }
 0x50e   : > { %8852 = vmatprep.subr.bf16.mxu0 %v12059_v0 }
 0x511   : > { %8853 = vmatpush1.bf16.msra.mxu0 %v12057_v2 }
 0x512   : > { %8854 = vmatprep.subr.bf16.mxu0 %v12062_v25 }
 0x515   : > { %8855 = vmatpush1.bf16.msra.mxu0 %v12060_v28 }
 0x516   : > { %8856 = vmatprep.subr.bf16.mxu0 %v12065_v31 }
 0x519   : > { %8857 = vmatpush1.bf16.msra.mxu0 %v12063_v54 }
 0x51c   : > { %8859 = vmatmul.mubr.bf16.vlgmr.msra.gmra.mrb[16].mxu0 %v13950_v63 }
 0x5ae   : > { %v8573_v32 = vpop.f32.mrb[16].mxu1 }
 0x5af   : > { %v8575_v19 = vpop.f32.mrb[17].mxu1 }
 0x5b0   : > { %v8871_v53 = vcombine.low %v8573_v32, %v8575_v19  ;;  %v8577_v12 = vpop.f32.mrb[18].mxu1 }
 0x5b1   : > { %v8578_v16 = vpop.f32.mrb[19].mxu1 }
 0x5b2   : > { %v8879_v41 = vrot.slane %v8871_v53, %v13102_v51 }
 0x5ef   : > { %v8860_v17 = vpop.f32.mrb[16].mxu0 }
 0x5f0   : > { %v8862_v15 = vpop.f32.mrb[17].mxu0 }
 0x5f1   : > { %v8872_v33 = vcombine.low %v8860_v17, %v8862_v15  ;;  %v8864_v35 = vpop.f32.mrb[18].mxu0 }
 0x5f2   : > { %v8865_v43 = vpop.f32.mrb[19].mxu0 }
 0x5f3   : > { %v8886_v23 = vrot.slane %v8872_v33, %v13102_v51 }
 0x5f5   : > { %v8887_v34 = vcombine.low %v8879_v41, %v8886_v23 }
 0x5f7   : > { %8889 = vst [vmem:[%s329_s21] sm:$0xff] %v8887_v34 }
 0x5f8   : > { %12197 = shalt.err (!%p12194_p2)
}
 0x5f9   : > { %s12198_s11 = scalar_lea.hbm %s13994_s17, 128  ;;  %s12202_s6 = scalar_lea.hbm %s14046_s4, 384 }
 0x5fa   : > { %p12199_p11 = scmp.ne.s32.totalorder %s13994_s17, %s12198_s11  ;;  %p12203_p5 = scmp.lt.u32.totalorder %s13994_s17, %s14046_s4 }
 0x5fb   : > { %p12204_p1 = scmp.lt.u32.totalorder %s12202_s6, %s12198_s11  ;;  %p12206_p4 = scmp.lt.u32.totalorder %s12198_s11, %s13994_s17 }
 0x5fc   : > { %p12200_p3 = pnand %p12199_p11, %p14079_p9 }
 0x5fd   : > { %p12205_p0 = por %p12204_p1, %p12203_p5 }
 0x5fe   : > { %p12201_p10 = pneg %p12200_p3 }
 0x5ff   : > { %p12207_p12 = por %p12206_p4, %p12205_p0 }
 0x601   : > { %p12208_p13 = pnand %p12207_p12, %p12201_p10 }
 0x603   : > { %12211 = shalt.err (!%p12208_p13)
}
 0x604   : > { %10304 = dma.vmem_to_hbm [thread:$0]  (%p14079_p9), %s13996_s30, 128, %s13994_s17, %s8891_s27  }
 0x605 PF: > { %s14080_s29 = sld [smem:[#allocation19_spill]]  ;;  %p10327_p7 = scmp.ge.s32.totalorder %s12274_s20, 2 }
 0x606   : > { %s8917_s13 = sand.u32 1, %s12254_s15  }
 0x607   : > { %s8918_s12 = scalar_lea.sflag [#allocation5], %s8917_s13 }
 0x60b   : > { %p14081_p6 = scmp.ne.s32.totalorder %s14080_s29, 0 }
 0x60d   : > { %p10321_p8 = pnand %p10327_p7, %p14081_p6 }
 0x60f   : > { %12249 = dma.done.wait (!%p10321_p8), %s8918_s12, 128  }
 0x610   : > { %12251 = vsyncadd (!%p10321_p8), %s8918_s12, 4294967168  ;;  %s24_s20 = sadd.s32 1, %s12274_s20   ;;  %s14082_s7 = sld [smem:[#allocation16_spill]] }
 0x611   : > { %p21_p2 = scmp.ge.s32.totalorder %s24_s20, 5   ;;  %s14083_s17 = sld [smem:[#allocation18_spill]] }
 0x612   : > { %s14084_s5 = sld [smem:[#allocation17_spill]]  ;;  %s14085_s15 = smov %s12258_s16 }
 0x613   : > { %s14087_s18 = smov %s12270_s19  ;;  %23 = sbr.rel (!%p21_p2) target bundleno = 11 (0xb), region = 119 }
 0x616   : > { %s14086_s16 = smov %s14082_s7 }
 0x618   : > { %s14088_s19 = smov %s14084_s5 }
 0x61a   :  { %8923 = vsyncpa [#allocation4], 1 }
 0x61b   :  { %8925 = vsyncpa [#allocation4 + $0x1], 1 }
 0x61c   :  { %8926 = vsyncpa [#allocation7], 1 }
 0x61d   :  { %8928 = vsyncpa [#allocation7 + $0x1], 1 }
 0x61e   :  { %8929 = vsyncpa [#allocation10], 1 }
 0x61f   :  { %8931 = vsyncpa [#allocation10 + $0x1], 1 }
 0x620   :  { %8932 = vsyncpa [#allocation5], 1 }
 0x621   :  { %8934 = vsyncpa [#allocation5 + $0x1], 1 }

</bundles_post_ra>
